<compile_context>
chip_gen: v7x
topology: tpu7x:2x2x1
jax: 0.10.0
libtpu: 0.0.40
codegen_flags: <defaults>
</compile_context>

<pallas_src>
import functools

import jax
import jax.numpy as jnp
from jax.experimental import pallas as pl
from jax.experimental.pallas import tpu as pltpu

HIDDEN = 100   # matches nn.Linear(2,100)/(100,100)/(100,2) in the module
H_PAD = 128    # padded hidden width for clean MXU / vreg tiling


def pinn_kernel(xt_ref,
                w1_ref, b1_ref, w2_ref, b2_ref, w3_ref, b3_ref,
                w4_ref, b4_ref, wo_ref, bo_ref,
                f_ref, s_ref, *, tb, matmul_dtype):
    x = xt_ref[:, 0:1]            # (tb, 1)
    t = xt_ref[:, 1:2]            # (tb, 1)
    ones = jnp.ones_like(x)

    # ---- first layer: input is cat([x, t], dim=1); use the two rows of W1
    W1 = w1_ref[...]              # (2, H_PAD)
    b1 = b1_ref[...]              # (1, H_PAD)
    w1x = W1[0:1, :]              # weights acting on x
    w1t = W1[1:2, :]              # weights acting on t

    y = x * w1x + t * w1t + b1    # (tb, H_PAD)
    yx = ones * w1x               # dy/dx
    yt = ones * w1t               # dy/dt

    a = jnp.tanh(y)
    da = 1.0 - a * a              # tanh'
    d2a = -2.0 * a * da           # tanh''

    # stacked streams: [h; hx; ht; hxx] as sublane-contiguous quarters
    s_ref[0 * tb:1 * tb, :] = a
    s_ref[1 * tb:2 * tb, :] = da * yx
    s_ref[2 * tb:3 * tb, :] = da * yt
    s_ref[3 * tb:4 * tb, :] = d2a * yx * yx      # d2y/dx2 == 0 for layer 1

    # ---- hidden layers 2..4 (tanh): one fused (4*tb,H)x(H,H) dot per layer
    for w_ref, b_ref in ((w2_ref, b2_ref), (w3_ref, b3_ref), (w4_ref, b4_ref)):
        W = w_ref[...].astype(matmul_dtype)      # (H_PAD, H_PAD)
        b = b_ref[...]                           # (1, H_PAD)
        S = s_ref[...].astype(matmul_dtype)      # (4*tb, H_PAD)
        Y = jnp.dot(S, W, preferred_element_type=jnp.float32)

        y = Y[0 * tb:1 * tb, :] + b
        yx = Y[1 * tb:2 * tb, :]
        yt = Y[2 * tb:3 * tb, :]
        yxx = Y[3 * tb:4 * tb, :]

        a = jnp.tanh(y)
        da = 1.0 - a * a
        d2a = -2.0 * a * da

        s_ref[0 * tb:1 * tb, :] = a
        s_ref[1 * tb:2 * tb, :] = da * yx
        s_ref[2 * tb:3 * tb, :] = da * yt
        s_ref[3 * tb:4 * tb, :] = d2a * yx * yx + da * yxx

    # ---- output layer (linear): single stacked dot against Wo
    Wo = wo_ref[...].astype(matmul_dtype)        # (H_PAD, 2)
    bo = bo_ref[...]                             # (1, 2)
    S = s_ref[...].astype(matmul_dtype)
    O = jnp.dot(S, Wo, preferred_element_type=jnp.float32)   # (4*tb, 2)

    o = O[0 * tb:1 * tb, :] + bo                 # [u_r,    u_i]
    ot = O[2 * tb:3 * tb, :]                     # [u_t_r,  u_t_i]
    oxx = O[3 * tb:4 * tb, :]                    # [u_xx_r, u_xx_i]

    u_r, u_i = o[:, 0:1], o[:, 1:2]
    u_t_r, u_t_i = ot[:, 0:1], ot[:, 1:2]
    u_xx_r, u_xx_i = oxx[:, 0:1], oxx[:, 1:2]

    mag = u_r * u_r + u_i * u_i
    f_ref[:, 0:1] = -u_t_i + 0.5 * u_xx_r + mag * u_r
    f_ref[:, 1:2] = u_t_r + 0.5 * u_xx_i + mag * u_i


def _pad_params(params):
    """Zero-pad hidden width HIDDEN -> H_PAD; biases reshaped to (1, out)."""
    n = len(params)
    padded = []
    for idx, (W, b) in enumerate(params):
        W = W.astype(jnp.float32)
        b = b.reshape(1, -1).astype(jnp.float32)
        fi, fo = W.shape
        fi_pad = fi if idx == 0 else H_PAD        # first layer keeps in-dim 2
        fo_pad = fo if idx == n - 1 else H_PAD    # output layer keeps out-dim 2
        Wp = jnp.zeros((fi_pad, fo_pad), jnp.float32).at[:fi, :fo].set(W)
        bp = jnp.zeros((1, fo_pad), jnp.float32).at[:, :fo].set(b)
        padded.append((Wp, bp))
    return padded


def pinn_forward(x, t, params, *, tb=256, matmul_dtype=jnp.float32):
    """x, t: (N, 1) float32. params: list of (W, b) for the 5 linear layers.

    Returns (f_r, f_i), each (N, 1) float32.
    Set matmul_dtype=jnp.bfloat16 on v6e/v7x for faster MXU at reduced
    precision on the second-derivative path.
    """
    x = x.astype(jnp.float32).reshape(-1, 1)
    t = t.astype(jnp.float32).reshape(-1, 1)
    N = x.shape[0]

    xt = jnp.concatenate([x, t], axis=1)                  # (N, 2)
    n_pad = pl.cdiv(N, tb) * tb
    if n_pad != N:
        xt = jnp.pad(xt, ((0, n_pad - N), (0, 0)))        # pad rows; sliced off below

    flat_args = [xt]
    in_specs = [pl.BlockSpec((tb, 2), lambda i: (i, 0))]
    for W, b in _pad_params(params):
        flat_args += [W, b]
        in_specs += [pl.BlockSpec(W.shape, lambda i: (0, 0)),   # weights resident
                     pl.BlockSpec(b.shape, lambda i: (0, 0))]

    kernel = functools.partial(pinn_kernel, tb=tb, matmul_dtype=matmul_dtype)
    f = pl.pallas_call(
        kernel,
        out_shape=jax.ShapeDtypeStruct((n_pad, 2), jnp.float32),
        grid=(n_pad // tb,),
        in_specs=in_specs,
        out_specs=pl.BlockSpec((tb, 2), lambda i: (i, 0)),
        scratch_shapes=[pltpu.VMEM((4 * tb, H_PAD), jnp.float32)],
        compiler_params=pltpu.CompilerParams(
            dimension_semantics=("parallel",)),
    )(*flat_args)

    f = f[:N]
    return f[:, 0:1], f[:, 1:2]


# ---------------- pure-JAX reference (mirrors torch.autograd.grad semantics) ----
def _dnn_apply(params, xs, ts):
    h = jnp.stack([xs, ts])                  # (2,)
    for W, b in params[:-1]:
        h = jnp.tanh(h @ W + b)
    W, b = params[-1]
    o = h @ W + b
    return o[0], o[1]                        # u_r, u_i (scalars)


def _ref_residuals(params, xs, ts):
    ur = lambda a, b: _dnn_apply(params, a, b)[0]
    ui = lambda a, b: _dnn_apply(params, a, b)[1]
    u_r = ur(xs, ts)
    u_i = ui(xs, ts)
    u_t_r = jax.grad(ur, argnums=1)(xs, ts)
    u_t_i = jax.grad(ui, argnums=1)(xs, ts)
    u_xx_r = jax.grad(jax.grad(ur, argnums=0), argnums=0)(xs, ts)
    u_xx_i = jax.grad(jax.grad(ui, argnums=0), argnums=0)(xs, ts)
    mag = u_r ** 2 + u_i ** 2
    f_r = -u_t_i + 0.5 * u_xx_r + mag * u_r
    f_i = u_t_r + 0.5 * u_xx_i + mag * u_i
    return f_r, f_i


def make_params(key):
    sizes = [(2, HIDDEN), (HIDDEN, HIDDEN), (HIDDEN, HIDDEN),
             (HIDDEN, HIDDEN), (HIDDEN, 2)]
    params = []
    for fan_in, fan_out in sizes:
        key, kw, kb = jax.random.split(key, 3)
        scale = 1.0 / jnp.sqrt(jnp.float32(fan_in))
        W = jax.random.uniform(kw, (fan_in, fan_out), jnp.float32, -scale, scale)
        b = jax.random.uniform(kb, (fan_out,), jnp.float32, -scale, scale)
        params.append((W, b))
    return params


if __name__ == "__main__":
    key = jax.random.PRNGKey(0)
    kx, kt, kp = jax.random.split(key, 3)

    N = 256
    x = jax.random.uniform(kx, (N, 1), jnp.float32, -5.0, 5.0)
    t = jax.random.uniform(kt, (N, 1), jnp.float32, 0.0, 1.57)
    params = make_params(kp)

    # tb=128 so the demo grid has length 2 (keeps both TCs busy on v7x);
    # for realistic N use the default tb=256.
    f_r, f_i = jax.jit(functools.partial(pinn_forward, tb=128))(x, t, params)
    jax.block_until_ready((f_r, f_i))

    # correctness check against JAX autodiff (same semantics as torch.autograd.grad)
    ref_fr, ref_fi = jax.vmap(functools.partial(_ref_residuals, params))(
        x[:, 0], t[:, 0])
    assert jnp.allclose(f_r[:, 0], ref_fr, atol=1e-4, rtol=1e-3)
    assert jnp.allclose(f_i[:, 0], ref_fi, atol=1e-4, rtol=1e-3)

    print("KERNEL_OK")
</pallas_src>

<mosaic_0001>
module attributes {stable_mosaic.version = 11 : i64} {
  func.func @pinn_kernel(%arg0: i32, %arg1: memref<128x2xf32, #tpu.memory_space<vmem>>, %arg2: memref<2x128xf32, #tpu.memory_space<vmem>>, %arg3: memref<1x128xf32, #tpu.memory_space<vmem>>, %arg4: memref<128x128xf32, #tpu.memory_space<vmem>>, %arg5: memref<1x128xf32, #tpu.memory_space<vmem>>, %arg6: memref<128x128xf32, #tpu.memory_space<vmem>>, %arg7: memref<1x128xf32, #tpu.memory_space<vmem>>, %arg8: memref<128x128xf32, #tpu.memory_space<vmem>>, %arg9: memref<1x128xf32, #tpu.memory_space<vmem>>, %arg10: memref<128x2xf32, #tpu.memory_space<vmem>>, %arg11: memref<1x2xf32, #tpu.memory_space<vmem>>, %arg12: memref<128x2xf32, #tpu.memory_space<vmem>>, %arg13: memref<512x128xf32, #tpu.memory_space<vmem>>) attributes {dimension_semantics = [#tpu.dimension_semantics<parallel>], iteration_bounds = array<i64: 2>, scalar_prefetch = 0 : i64, scratch_operands = 1 : i64, tpu.core_type = #tpu.core_type<tc>, window_params = [{transform_indices = @transform_0, window_bounds = array<i64: 128, 2>}, {pipeline_mode = #tpu.pipeline_mode<synchronous>, transform_indices = @transform_1, window_bounds = array<i64: 2, 128>}, {pipeline_mode = #tpu.pipeline_mode<synchronous>, transform_indices = @transform_2, window_bounds = array<i64: 1, 128>}, {pipeline_mode = #tpu.pipeline_mode<synchronous>, transform_indices = @transform_3, window_bounds = array<i64: 128, 128>}, {pipeline_mode = #tpu.pipeline_mode<synchronous>, transform_indices = @transform_4, window_bounds = array<i64: 1, 128>}, {pipeline_mode = #tpu.pipeline_mode<synchronous>, transform_indices = @transform_5, window_bounds = array<i64: 128, 128>}, {pipeline_mode = #tpu.pipeline_mode<synchronous>, transform_indices = @transform_6, window_bounds = array<i64: 1, 128>}, {pipeline_mode = #tpu.pipeline_mode<synchronous>, transform_indices = @transform_7, window_bounds = array<i64: 128, 128>}, {pipeline_mode = #tpu.pipeline_mode<synchronous>, transform_indices = @transform_8, window_bounds = array<i64: 1, 128>}, {pipeline_mode = #tpu.pipeline_mode<synchronous>, transform_indices = @transform_9, window_bounds = array<i64: 128, 2>}, {pipeline_mode = #tpu.pipeline_mode<synchronous>, transform_indices = @transform_10, window_bounds = array<i64: 1, 2>}, {transform_indices = @transform_11, window_bounds = array<i64: 128, 2>}]} {
    %c0 = arith.constant 0 : index
    %c0_0 = arith.constant 0 : index
    %0 = vector.load %arg1[%c0, %c0_0] : memref<128x2xf32, #tpu.memory_space<vmem>>, vector<128x1xf32>
    %c0_1 = arith.constant 0 : index
    %c1 = arith.constant 1 : index
    %1 = vector.load %arg1[%c0_1, %c1] : memref<128x2xf32, #tpu.memory_space<vmem>>, vector<128x1xf32>
    %cst = arith.constant 1.000000e+00 : f32
    %2 = vector.broadcast %cst : f32 to vector<128x1xf32>
    %c0_2 = arith.constant 0 : index
    %c0_3 = arith.constant 0 : index
    %3 = vector.load %arg2[%c0_2, %c0_3] : memref<2x128xf32, #tpu.memory_space<vmem>>, vector<2x128xf32>
    %c0_4 = arith.constant 0 : index
    %c0_5 = arith.constant 0 : index
    %4 = vector.load %arg3[%c0_4, %c0_5] : memref<1x128xf32, #tpu.memory_space<vmem>>, vector<1x128xf32>
    %5 = vector.extract_strided_slice %3 {offsets = [0, 0], sizes = [1, 128], strides = [1, 1]} : vector<2x128xf32> to vector<1x128xf32>
    %6 = vector.extract_strided_slice %3 {offsets = [1, 0], sizes = [1, 128], strides = [1, 1]} : vector<2x128xf32> to vector<1x128xf32>
    %7 = vector.broadcast %0 : vector<128x1xf32> to vector<128x128xf32>
    %8 = vector.broadcast %5 : vector<1x128xf32> to vector<128x128xf32>
    %9 = arith.mulf %7, %8 : vector<128x128xf32>
    %10 = vector.broadcast %1 : vector<128x1xf32> to vector<128x128xf32>
    %11 = vector.broadcast %6 : vector<1x128xf32> to vector<128x128xf32>
    %12 = arith.mulf %10, %11 : vector<128x128xf32>
    %13 = arith.addf %9, %12 : vector<128x128xf32>
    %14 = vector.broadcast %4 : vector<1x128xf32> to vector<128x128xf32>
    %15 = arith.addf %13, %14 : vector<128x128xf32>
    %16 = vector.broadcast %2 : vector<128x1xf32> to vector<128x128xf32>
    %17 = vector.broadcast %5 : vector<1x128xf32> to vector<128x128xf32>
    %18 = arith.mulf %16, %17 : vector<128x128xf32>
    %19 = vector.broadcast %2 : vector<128x1xf32> to vector<128x128xf32>
    %20 = vector.broadcast %6 : vector<1x128xf32> to vector<128x128xf32>
    %21 = arith.mulf %19, %20 : vector<128x128xf32>
    %22 = math.tanh %15 : vector<128x128xf32>
    %23 = arith.mulf %22, %22 : vector<128x128xf32>
    %cst_6 = arith.constant 1.000000e+00 : f32
    %24 = vector.broadcast %cst_6 : f32 to vector<128x128xf32>
    %25 = arith.subf %24, %23 : vector<128x128xf32>
    %cst_7 = arith.constant -2.000000e+00 : f32
    %26 = vector.broadcast %cst_7 : f32 to vector<128x128xf32>
    %27 = arith.mulf %26, %22 : vector<128x128xf32>
    %28 = arith.mulf %27, %25 : vector<128x128xf32>
    %c0_8 = arith.constant 0 : index
    %c0_9 = arith.constant 0 : index
    %29 = vector.load %arg13[%c0_8, %c0_9] : memref<512x128xf32, #tpu.memory_space<vmem>>, vector<128x128xf32>
    tpu.vector_store %arg13[%c0_8, %c0_9], %22 {strides = array<i32>} : memref<512x128xf32, #tpu.memory_space<vmem>>, vector<128x128xf32>,
    %30 = arith.mulf %25, %18 : vector<128x128xf32>
    %c128 = arith.constant 128 : index
    %c0_10 = arith.constant 0 : index
    %31 = vector.load %arg13[%c128, %c0_10] : memref<512x128xf32, #tpu.memory_space<vmem>>, vector<128x128xf32>
    tpu.vector_store %arg13[%c128, %c0_10], %30 {strides = array<i32>} : memref<512x128xf32, #tpu.memory_space<vmem>>, vector<128x128xf32>,
    %32 = arith.mulf %25, %21 : vector<128x128xf32>
    %c256 = arith.constant 256 : index
    %c0_11 = arith.constant 0 : index
    %33 = vector.load %arg13[%c256, %c0_11] : memref<512x128xf32, #tpu.memory_space<vmem>>, vector<128x128xf32>
    tpu.vector_store %arg13[%c256, %c0_11], %32 {strides = array<i32>} : memref<512x128xf32, #tpu.memory_space<vmem>>, vector<128x128xf32>,
    %34 = arith.mulf %28, %18 : vector<128x128xf32>
    %35 = arith.mulf %34, %18 : vector<128x128xf32>
    %c384 = arith.constant 384 : index
    %c0_12 = arith.constant 0 : index
    %36 = vector.load %arg13[%c384, %c0_12] : memref<512x128xf32, #tpu.memory_space<vmem>>, vector<128x128xf32>
    tpu.vector_store %arg13[%c384, %c0_12], %35 {strides = array<i32>} : memref<512x128xf32, #tpu.memory_space<vmem>>, vector<128x128xf32>,
    %c0_13 = arith.constant 0 : index
    %c0_14 = arith.constant 0 : index
    %37 = vector.load %arg4[%c0_13, %c0_14] : memref<128x128xf32, #tpu.memory_space<vmem>>, vector<128x128xf32>
    %c0_15 = arith.constant 0 : index
    %c0_16 = arith.constant 0 : index
    %38 = vector.load %arg5[%c0_15, %c0_16] : memref<1x128xf32, #tpu.memory_space<vmem>>, vector<1x128xf32>
    %c0_17 = arith.constant 0 : index
    %c0_18 = arith.constant 0 : index
    %39 = vector.load %arg13[%c0_17, %c0_18] : memref<512x128xf32, #tpu.memory_space<vmem>>, vector<512x128xf32>
    %cst_19 = arith.constant dense<0.000000e+00> : vector<512x128xf32>
    %40 = tpu.matmul %39, %37, %cst_19 {dimension_numbers = #tpu.dot_dimension_numbers<[1], [0], [0], [1], [0, 0, 1, 1], [], []>} : vector<512x128xf32>, vector<128x128xf32>, vector<512x128xf32> -> vector<512x128xf32>
    %41 = vector.extract_strided_slice %40 {offsets = [0, 0], sizes = [128, 128], strides = [1, 1]} : vector<512x128xf32> to vector<128x128xf32>
    %42 = vector.broadcast %38 : vector<1x128xf32> to vector<128x128xf32>
    %43 = arith.addf %41, %42 : vector<128x128xf32>
    %44 = vector.extract_strided_slice %40 {offsets = [128, 0], sizes = [128, 128], strides = [1, 1]} : vector<512x128xf32> to vector<128x128xf32>
    %45 = vector.extract_strided_slice %40 {offsets = [256, 0], sizes = [128, 128], strides = [1, 1]} : vector<512x128xf32> to vector<128x128xf32>
    %46 = vector.extract_strided_slice %40 {offsets = [384, 0], sizes = [128, 128], strides = [1, 1]} : vector<512x128xf32> to vector<128x128xf32>
    %47 = math.tanh %43 : vector<128x128xf32>
    %48 = arith.mulf %47, %47 : vector<128x128xf32>
    %cst_20 = arith.constant 1.000000e+00 : f32
    %49 = vector.broadcast %cst_20 : f32 to vector<128x128xf32>
    %50 = arith.subf %49, %48 : vector<128x128xf32>
    %cst_21 = arith.constant -2.000000e+00 : f32
    %51 = vector.broadcast %cst_21 : f32 to vector<128x128xf32>
    %52 = arith.mulf %51, %47 : vector<128x128xf32>
    %53 = arith.mulf %52, %50 : vector<128x128xf32>
    %c0_22 = arith.constant 0 : index
    %c0_23 = arith.constant 0 : index
    %54 = vector.load %arg13[%c0_22, %c0_23] : memref<512x128xf32, #tpu.memory_space<vmem>>, vector<128x128xf32>
    tpu.vector_store %arg13[%c0_22, %c0_23], %47 {strides = array<i32>} : memref<512x128xf32, #tpu.memory_space<vmem>>, vector<128x128xf32>,
    %55 = arith.mulf %50, %44 : vector<128x128xf32>
    %c128_24 = arith.constant 128 : index
    %c0_25 = arith.constant 0 : index
    %56 = vector.load %arg13[%c128_24, %c0_25] : memref<512x128xf32, #tpu.memory_space<vmem>>, vector<128x128xf32>
    tpu.vector_store %arg13[%c128_24, %c0_25], %55 {strides = array<i32>} : memref<512x128xf32, #tpu.memory_space<vmem>>, vector<128x128xf32>,
    %57 = arith.mulf %50, %45 : vector<128x128xf32>
    %c256_26 = arith.constant 256 : index
    %c0_27 = arith.constant 0 : index
    %58 = vector.load %arg13[%c256_26, %c0_27] : memref<512x128xf32, #tpu.memory_space<vmem>>, vector<128x128xf32>
    tpu.vector_store %arg13[%c256_26, %c0_27], %57 {strides = array<i32>} : memref<512x128xf32, #tpu.memory_space<vmem>>, vector<128x128xf32>,
    %59 = arith.mulf %53, %44 : vector<128x128xf32>
    %60 = arith.mulf %59, %44 : vector<128x128xf32>
    %61 = arith.mulf %50, %46 : vector<128x128xf32>
    %62 = arith.addf %60, %61 : vector<128x128xf32>
    %c384_28 = arith.constant 384 : index
    %c0_29 = arith.constant 0 : index
    %63 = vector.load %arg13[%c384_28, %c0_29] : memref<512x128xf32, #tpu.memory_space<vmem>>, vector<128x128xf32>
    tpu.vector_store %arg13[%c384_28, %c0_29], %62 {strides = array<i32>} : memref<512x128xf32, #tpu.memory_space<vmem>>, vector<128x128xf32>,
    %c0_30 = arith.constant 0 : index
    %c0_31 = arith.constant 0 : index
    %64 = vector.load %arg6[%c0_30, %c0_31] : memref<128x128xf32, #tpu.memory_space<vmem>>, vector<128x128xf32>
    %c0_32 = arith.constant 0 : index
    %c0_33 = arith.constant 0 : index
    %65 = vector.load %arg7[%c0_32, %c0_33] : memref<1x128xf32, #tpu.memory_space<vmem>>, vector<1x128xf32>
    %c0_34 = arith.constant 0 : index
    %c0_35 = arith.constant 0 : index
    %66 = vector.load %arg13[%c0_34, %c0_35] : memref<512x128xf32, #tpu.memory_space<vmem>>, vector<512x128xf32>
    %cst_36 = arith.constant dense<0.000000e+00> : vector<512x128xf32>
    %67 = tpu.matmul %66, %64, %cst_36 {dimension_numbers = #tpu.dot_dimension_numbers<[1], [0], [0], [1], [0, 0, 1, 1], [], []>} : vector<512x128xf32>, vector<128x128xf32>, vector<512x128xf32> -> vector<512x128xf32>
    %68 = vector.extract_strided_slice %67 {offsets = [0, 0], sizes = [128, 128], strides = [1, 1]} : vector<512x128xf32> to vector<128x128xf32>
    %69 = vector.broadcast %65 : vector<1x128xf32> to vector<128x128xf32>
    %70 = arith.addf %68, %69 : vector<128x128xf32>
    %71 = vector.extract_strided_slice %67 {offsets = [128, 0], sizes = [128, 128], strides = [1, 1]} : vector<512x128xf32> to vector<128x128xf32>
    %72 = vector.extract_strided_slice %67 {offsets = [256, 0], sizes = [128, 128], strides = [1, 1]} : vector<512x128xf32> to vector<128x128xf32>
    %73 = vector.extract_strided_slice %67 {offsets = [384, 0], sizes = [128, 128], strides = [1, 1]} : vector<512x128xf32> to vector<128x128xf32>
    %74 = math.tanh %70 : vector<128x128xf32>
    %75 = arith.mulf %74, %74 : vector<128x128xf32>
    %cst_37 = arith.constant 1.000000e+00 : f32
    %76 = vector.broadcast %cst_37 : f32 to vector<128x128xf32>
    %77 = arith.subf %76, %75 : vector<128x128xf32>
    %cst_38 = arith.constant -2.000000e+00 : f32
    %78 = vector.broadcast %cst_38 : f32 to vector<128x128xf32>
    %79 = arith.mulf %78, %74 : vector<128x128xf32>
    %80 = arith.mulf %79, %77 : vector<128x128xf32>
    %c0_39 = arith.constant 0 : index
    %c0_40 = arith.constant 0 : index
    %81 = vector.load %arg13[%c0_39, %c0_40] : memref<512x128xf32, #tpu.memory_space<vmem>>, vector<128x128xf32>
    tpu.vector_store %arg13[%c0_39, %c0_40], %74 {strides = array<i32>} : memref<512x128xf32, #tpu.memory_space<vmem>>, vector<128x128xf32>,
    %82 = arith.mulf %77, %71 : vector<128x128xf32>
    %c128_41 = arith.constant 128 : index
    %c0_42 = arith.constant 0 : index
    %83 = vector.load %arg13[%c128_41, %c0_42] : memref<512x128xf32, #tpu.memory_space<vmem>>, vector<128x128xf32>
    tpu.vector_store %arg13[%c128_41, %c0_42], %82 {strides = array<i32>} : memref<512x128xf32, #tpu.memory_space<vmem>>, vector<128x128xf32>,
    %84 = arith.mulf %77, %72 : vector<128x128xf32>
    %c256_43 = arith.constant 256 : index
    %c0_44 = arith.constant 0 : index
    %85 = vector.load %arg13[%c256_43, %c0_44] : memref<512x128xf32, #tpu.memory_space<vmem>>, vector<128x128xf32>
    tpu.vector_store %arg13[%c256_43, %c0_44], %84 {strides = array<i32>} : memref<512x128xf32, #tpu.memory_space<vmem>>, vector<128x128xf32>,
    %86 = arith.mulf %80, %71 : vector<128x128xf32>
    %87 = arith.mulf %86, %71 : vector<128x128xf32>
    %88 = arith.mulf %77, %73 : vector<128x128xf32>
    %89 = arith.addf %87, %88 : vector<128x128xf32>
    %c384_45 = arith.constant 384 : index
    %c0_46 = arith.constant 0 : index
    %90 = vector.load %arg13[%c384_45, %c0_46] : memref<512x128xf32, #tpu.memory_space<vmem>>, vector<128x128xf32>
    tpu.vector_store %arg13[%c384_45, %c0_46], %89 {strides = array<i32>} : memref<512x128xf32, #tpu.memory_space<vmem>>, vector<128x128xf32>,
    %c0_47 = arith.constant 0 : index
    %c0_48 = arith.constant 0 : index
    %91 = vector.load %arg8[%c0_47, %c0_48] : memref<128x128xf32, #tpu.memory_space<vmem>>, vector<128x128xf32>
    %c0_49 = arith.constant 0 : index
    %c0_50 = arith.constant 0 : index
    %92 = vector.load %arg9[%c0_49, %c0_50] : memref<1x128xf32, #tpu.memory_space<vmem>>, vector<1x128xf32>
    %c0_51 = arith.constant 0 : index
    %c0_52 = arith.constant 0 : index
    %93 = vector.load %arg13[%c0_51, %c0_52] : memref<512x128xf32, #tpu.memory_space<vmem>>, vector<512x128xf32>
    %cst_53 = arith.constant dense<0.000000e+00> : vector<512x128xf32>
    %94 = tpu.matmul %93, %91, %cst_53 {dimension_numbers = #tpu.dot_dimension_numbers<[1], [0], [0], [1], [0, 0, 1, 1], [], []>} : vector<512x128xf32>, vector<128x128xf32>, vector<512x128xf32> -> vector<512x128xf32>
    %95 = vector.extract_strided_slice %94 {offsets = [0, 0], sizes = [128, 128], strides = [1, 1]} : vector<512x128xf32> to vector<128x128xf32>
    %96 = vector.broadcast %92 : vector<1x128xf32> to vector<128x128xf32>
    %97 = arith.addf %95, %96 : vector<128x128xf32>
    %98 = vector.extract_strided_slice %94 {offsets = [128, 0], sizes = [128, 128], strides = [1, 1]} : vector<512x128xf32> to vector<128x128xf32>
    %99 = vector.extract_strided_slice %94 {offsets = [256, 0], sizes = [128, 128], strides = [1, 1]} : vector<512x128xf32> to vector<128x128xf32>
    %100 = vector.extract_strided_slice %94 {offsets = [384, 0], sizes = [128, 128], strides = [1, 1]} : vector<512x128xf32> to vector<128x128xf32>
    %101 = math.tanh %97 : vector<128x128xf32>
    %102 = arith.mulf %101, %101 : vector<128x128xf32>
    %cst_54 = arith.constant 1.000000e+00 : f32
    %103 = vector.broadcast %cst_54 : f32 to vector<128x128xf32>
    %104 = arith.subf %103, %102 : vector<128x128xf32>
    %cst_55 = arith.constant -2.000000e+00 : f32
    %105 = vector.broadcast %cst_55 : f32 to vector<128x128xf32>
    %106 = arith.mulf %105, %101 : vector<128x128xf32>
    %107 = arith.mulf %106, %104 : vector<128x128xf32>
    %c0_56 = arith.constant 0 : index
    %c0_57 = arith.constant 0 : index
    %108 = vector.load %arg13[%c0_56, %c0_57] : memref<512x128xf32, #tpu.memory_space<vmem>>, vector<128x128xf32>
    tpu.vector_store %arg13[%c0_56, %c0_57], %101 {strides = array<i32>} : memref<512x128xf32, #tpu.memory_space<vmem>>, vector<128x128xf32>,
    %109 = arith.mulf %104, %98 : vector<128x128xf32>
    %c128_58 = arith.constant 128 : index
    %c0_59 = arith.constant 0 : index
    %110 = vector.load %arg13[%c128_58, %c0_59] : memref<512x128xf32, #tpu.memory_space<vmem>>, vector<128x128xf32>
    tpu.vector_store %arg13[%c128_58, %c0_59], %109 {strides = array<i32>} : memref<512x128xf32, #tpu.memory_space<vmem>>, vector<128x128xf32>,
    %111 = arith.mulf %104, %99 : vector<128x128xf32>
    %c256_60 = arith.constant 256 : index
    %c0_61 = arith.constant 0 : index
    %112 = vector.load %arg13[%c256_60, %c0_61] : memref<512x128xf32, #tpu.memory_space<vmem>>, vector<128x128xf32>
    tpu.vector_store %arg13[%c256_60, %c0_61], %111 {strides = array<i32>} : memref<512x128xf32, #tpu.memory_space<vmem>>, vector<128x128xf32>,
    %113 = arith.mulf %107, %98 : vector<128x128xf32>
    %114 = arith.mulf %113, %98 : vector<128x128xf32>
    %115 = arith.mulf %104, %100 : vector<128x128xf32>
    %116 = arith.addf %114, %115 : vector<128x128xf32>
    %c384_62 = arith.constant 384 : index
    %c0_63 = arith.constant 0 : index
    %117 = vector.load %arg13[%c384_62, %c0_63] : memref<512x128xf32, #tpu.memory_space<vmem>>, vector<128x128xf32>
    tpu.vector_store %arg13[%c384_62, %c0_63], %116 {strides = array<i32>} : memref<512x128xf32, #tpu.memory_space<vmem>>, vector<128x128xf32>,
    %c0_64 = arith.constant 0 : index
    %c0_65 = arith.constant 0 : index
    %118 = vector.load %arg10[%c0_64, %c0_65] : memref<128x2xf32, #tpu.memory_space<vmem>>, vector<128x2xf32>
    %c0_66 = arith.constant 0 : index
    %c0_67 = arith.constant 0 : index
    %119 = vector.load %arg11[%c0_66, %c0_67] : memref<1x2xf32, #tpu.memory_space<vmem>>, vector<1x2xf32>
    %c0_68 = arith.constant 0 : index
    %c0_69 = arith.constant 0 : index
    %120 = vector.load %arg13[%c0_68, %c0_69] : memref<512x128xf32, #tpu.memory_space<vmem>>, vector<512x128xf32>
    %cst_70 = arith.constant dense<0.000000e+00> : vector<512x2xf32>
    %121 = tpu.matmul %120, %118, %cst_70 {dimension_numbers = #tpu.dot_dimension_numbers<[1], [0], [0], [1], [0, 0, 1, 1], [], []>} : vector<512x128xf32>, vector<128x2xf32>, vector<512x2xf32> -> vector<512x2xf32>
    %122 = vector.extract_strided_slice %121 {offsets = [0, 0], sizes = [128, 2], strides = [1, 1]} : vector<512x2xf32> to vector<128x2xf32>
    %123 = vector.broadcast %119 : vector<1x2xf32> to vector<128x2xf32>
    %124 = arith.addf %122, %123 : vector<128x2xf32>
    %125 = vector.extract_strided_slice %121 {offsets = [256, 0], sizes = [128, 2], strides = [1, 1]} : vector<512x2xf32> to vector<128x2xf32>
    %126 = vector.extract_strided_slice %121 {offsets = [384, 0], sizes = [128, 2], strides = [1, 1]} : vector<512x2xf32> to vector<128x2xf32>
    %127 = vector.extract_strided_slice %124 {offsets = [0, 0], sizes = [128, 1], strides = [1, 1]} : vector<128x2xf32> to vector<128x1xf32>
    %128 = vector.extract_strided_slice %124 {offsets = [0, 1], sizes = [128, 1], strides = [1, 1]} : vector<128x2xf32> to vector<128x1xf32>
    %129 = vector.extract_strided_slice %125 {offsets = [0, 0], sizes = [128, 1], strides = [1, 1]} : vector<128x2xf32> to vector<128x1xf32>
    %130 = vector.extract_strided_slice %125 {offsets = [0, 1], sizes = [128, 1], strides = [1, 1]} : vector<128x2xf32> to vector<128x1xf32>
    %131 = vector.extract_strided_slice %126 {offsets = [0, 0], sizes = [128, 1], strides = [1, 1]} : vector<128x2xf32> to vector<128x1xf32>
    %132 = vector.extract_strided_slice %126 {offsets = [0, 1], sizes = [128, 1], strides = [1, 1]} : vector<128x2xf32> to vector<128x1xf32>
    %133 = arith.mulf %127, %127 : vector<128x1xf32>
    %134 = arith.mulf %128, %128 : vector<128x1xf32>
    %135 = arith.addf %133, %134 : vector<128x1xf32>
    %cst_71 = arith.constant 0.000000e+00 : f32
    %136 = vector.broadcast %cst_71 : f32 to vector<128x1xf32>
    %137 = arith.subf %136, %130 : vector<128x1xf32>
    %cst_72 = arith.constant 5.000000e-01 : f32
    %138 = vector.broadcast %cst_72 : f32 to vector<128x1xf32>
    %139 = arith.mulf %138, %131 : vector<128x1xf32>
    %140 = arith.addf %137, %139 : vector<128x1xf32>
    %141 = arith.mulf %135, %127 : vector<128x1xf32>
    %142 = arith.addf %140, %141 : vector<128x1xf32>
    %c0_73 = arith.constant 0 : index
    %c0_74 = arith.constant 0 : index
    %143 = vector.load %arg12[%c0_73, %c0_74] : memref<128x2xf32, #tpu.memory_space<vmem>>, vector<128x1xf32>
    tpu.vector_store %arg12[%c0_73, %c0_74], %142 {strides = array<i32>} : memref<128x2xf32, #tpu.memory_space<vmem>>, vector<128x1xf32>,
    %cst_75 = arith.constant 5.000000e-01 : f32
    %144 = vector.broadcast %cst_75 : f32 to vector<128x1xf32>
    %145 = arith.mulf %144, %132 : vector<128x1xf32>
    %146 = arith.addf %129, %145 : vector<128x1xf32>
    %147 = arith.mulf %135, %128 : vector<128x1xf32>
    %148 = arith.addf %146, %147 : vector<128x1xf32>
    %c0_76 = arith.constant 0 : index
    %c1_77 = arith.constant 1 : index
    %149 = vector.load %arg12[%c0_76, %c1_77] : memref<128x2xf32, #tpu.memory_space<vmem>>, vector<128x1xf32>
    tpu.vector_store %arg12[%c0_76, %c1_77], %148 {strides = array<i32>} : memref<128x2xf32, #tpu.memory_space<vmem>>, vector<128x1xf32>,
    return
  }
  func.func @transform_0(%arg0: i32) -> (i32, i32) {
    %c0_i32 = arith.constant 0 : i32
    %c0_i32_0 = arith.constant 0 : i32
    return %arg0, %c0_i32 : i32, i32
  }
  func.func @transform_1(%arg0: i32) -> (i32, i32) {
    %c0_i32 = arith.constant 0 : i32
    %c0_i32_0 = arith.constant 0 : i32
    %c0_i32_1 = arith.constant 0 : i32
    return %c0_i32, %c0_i32_0 : i32, i32
  }
  func.func @transform_2(%arg0: i32) -> (i32, i32) {
    %c0_i32 = arith.constant 0 : i32
    %c0_i32_0 = arith.constant 0 : i32
    %c0_i32_1 = arith.constant 0 : i32
    return %c0_i32, %c0_i32_0 : i32, i32
  }
  func.func @transform_3(%arg0: i32) -> (i32, i32) {
    %c0_i32 = arith.constant 0 : i32
    %c0_i32_0 = arith.constant 0 : i32
    %c0_i32_1 = arith.constant 0 : i32
    return %c0_i32, %c0_i32_0 : i32, i32
  }
  func.func @transform_4(%arg0: i32) -> (i32, i32) {
    %c0_i32 = arith.constant 0 : i32
    %c0_i32_0 = arith.constant 0 : i32
    %c0_i32_1 = arith.constant 0 : i32
    return %c0_i32, %c0_i32_0 : i32, i32
  }
  func.func @transform_5(%arg0: i32) -> (i32, i32) {
    %c0_i32 = arith.constant 0 : i32
    %c0_i32_0 = arith.constant 0 : i32
    %c0_i32_1 = arith.constant 0 : i32
    return %c0_i32, %c0_i32_0 : i32, i32
  }
  func.func @transform_6(%arg0: i32) -> (i32, i32) {
    %c0_i32 = arith.constant 0 : i32
    %c0_i32_0 = arith.constant 0 : i32
    %c0_i32_1 = arith.constant 0 : i32
    return %c0_i32, %c0_i32_0 : i32, i32
  }
  func.func @transform_7(%arg0: i32) -> (i32, i32) {
    %c0_i32 = arith.constant 0 : i32
    %c0_i32_0 = arith.constant 0 : i32
    %c0_i32_1 = arith.constant 0 : i32
    return %c0_i32, %c0_i32_0 : i32, i32
  }
  func.func @transform_8(%arg0: i32) -> (i32, i32) {
    %c0_i32 = arith.constant 0 : i32
    %c0_i32_0 = arith.constant 0 : i32
    %c0_i32_1 = arith.constant 0 : i32
    return %c0_i32, %c0_i32_0 : i32, i32
  }
  func.func @transform_9(%arg0: i32) -> (i32, i32) {
    %c0_i32 = arith.constant 0 : i32
    %c0_i32_0 = arith.constant 0 : i32
    %c0_i32_1 = arith.constant 0 : i32
    return %c0_i32, %c0_i32_0 : i32, i32
  }
  func.func @transform_10(%arg0: i32) -> (i32, i32) {
    %c0_i32 = arith.constant 0 : i32
    %c0_i32_0 = arith.constant 0 : i32
    %c0_i32_1 = arith.constant 0 : i32
    return %c0_i32, %c0_i32_0 : i32, i32
  }
  func.func @transform_11(%arg0: i32) -> (i32, i32) {
    %c0_i32 = arith.constant 0 : i32
    %c0_i32_0 = arith.constant 0 : i32
    return %arg0, %c0_i32 : i32, i32
  }
}

</mosaic_0001>

<bundles_post_ra>
// kernel: pinn_forward.1
= control target key start
LH: loop header
LB: loop body
LE: loop exit
PB: predicated region body
PF: predicated region fallthrough
CT: control target
= control target key end

     0   :  { %s5369_s17 = smov 0   ;;  %s7079_s0 = inlined_call_operand.vmem [shape: f32[256,2], index: 0, kind: input, shape index: {}]   ;;  %s7080_s1 = inlined_call_operand.vmem [shape: f32[2,128], index: 1, kind: input, shape index: {}]   ;;  %s7081_s2 = inlined_call_operand.vmem [shape: f32[1,128], index: 2, kind: input, shape index: {}]   ;;  %s7082_s3 = inlined_call_operand.vmem [shape: f32[128,128], index: 3, kind: input, shape index: {}]   ;;  %s7083_s4 = inlined_call_operand.vmem [shape: f32[1,128], index: 4, kind: input, shape index: {}]   ;;  %s7084_s5 = inlined_call_operand.vmem [shape: f32[128,128], index: 5, kind: input, shape index: {}]   ;;  %s7085_s6 = inlined_call_operand.vmem [shape: f32[1,128], index: 6, kind: input, shape index: {}]   ;;  %s7086_s7 = inlined_call_operand.vmem [shape: f32[128,128], index: 7, kind: input, shape index: {}]   ;;  %s7087_s8 = inlined_call_operand.vmem [shape: f32[1,128], index: 8, kind: input, shape index: {}]   ;;  %s7088_s9 = inlined_call_operand.vmem [shape: f32[128,2], index: 9, kind: input, shape index: {}]   ;;  %s7089_s10 = inlined_call_operand.vmem [shape: f32[1,2], index: 10, kind: input, shape index: {}]   ;;  %s7090_s11 = inlined_call_operand.vmem [shape: f32[256,2], index: 11, kind: output, shape index: {}]  }
   0x1 LB: > { %s4176_s18 = sadd.s32 4294967295, %s5303_s17   ;;  %p4180_p0 = scmp.ge.s32.totalorder %s5303_s17, 1  ;;  %s5303_s17 = sphi %s5369_s17, %s21_s17  }
   0x2   : > { %p338_p1 = scmp.lt.s32.totalorder %s5303_s17, 3 }
   0x4   : > { %p339_p2 = pnand %p4180_p0, %p338_p1 }
   0x6   : > { %342 = sbr.rel (%p339_p2) target bundleno = 1520 (0x5f0), region = 64 }
   0xd   : > { %s4181_s19 = sshll.u32 %s4176_s18, 4  ;;  %v838_v0 = vld [vmem:[%s7082_s3] sm:$0xff]  ;;  %v839_v1 = vld [vmem:[%s7082_s3 + $0x8] sm:$0xff]  ;;  %v840_v2 = vld [vmem:[%s7082_s3 + $0x10] sm:$0xff]  ;;  %v5305_v3 = vmov 0   ;;  %v5306_v12 = vmov 1   ;;  %v488_v42 = vlaneseq }
   0xe   : > { %5166 = vset.pattern.permute.xlu1 %v5305_v3  ;;  %5164 = vset.pattern.permute.xlu0 %v5305_v3  ;;  %p379_p3 = scmp.lt.s32.totalorder %s4181_s19, 31  ;;  %v5024_v4 = vpack.c.bf16 %v839_v1, %v838_v0  ;;  %v841_v5 = vld [vmem:[%s7082_s3 + $0x18] sm:$0xff]  ;;  %v842_v7 = vld [vmem:[%s7082_s3 + $0x20] sm:$0xff]  ;;  %v843_v8 = vld [vmem:[%s7082_s3 + $0x28] sm:$0xff]  ;;  %s5307_s20 = smov 127   ;;  %vm3862_vm0 = vcmask 7168  }
   0xf   : > { %v5028_v6 = vpack.c.bf16 %v841_v5, %v840_v2  ;;  %v5032_v9 = vpack.c.bf16 %v843_v8, %v842_v7  ;;  %v844_v13 = vld [vmem:[%s7082_s3 + $0x30] sm:$0xff]  ;;  %v845_v14 = vld [vmem:[%s7082_s3 + $0x38] sm:$0xff]  ;;  %v846_v16 = vld [vmem:[%s7082_s3 + $0x40] sm:$0xff]  ;;  %v489_v43 = vshrl.u32 %v488_v42, 7  ;;  %s5308_s21 = smov 1   ;;  %vm4103_vm1 = vcmask 15368  }
  0x10   : > { %s7151_s19 = smov (!%p379_p3, %s4181_s19), 31  ;;  %5025 = vmatprep.subr.bf16.mxu0 %v5024_v4  ;;  %v5036_v15 = vpack.c.bf16 %v845_v14, %v844_v13  ;;  %v847_v17 = vld [vmem:[%s7082_s3 + $0x48] sm:$0xff]  ;;  %v848_v20 = vld [vmem:[%s7082_s3 + $0x50] sm:$0xff]  ;;  %v849_v21 = vld [vmem:[%s7082_s3 + $0x58] sm:$0xff] }
  0x11   : > { %5027 = vmatpush3.bf16.msra.mxu0 %v5024_v4  ;;  %s4182_s13 = sshll.u32 %s7151_s19, 3  ;;  %v5040_v19 = vpack.c.bf16 %v847_v17, %v846_v16  ;;  %v5044_v23 = vpack.c.bf16 %v849_v21, %v848_v20  ;;  %v850_v24 = vld [vmem:[%s7082_s3 + $0x60] sm:$0xff]  ;;  %v851_v25 = vld [vmem:[%s7082_s3 + $0x68] sm:$0xff]  ;;  %v852_v28 = vld [vmem:[%s7082_s3 + $0x70] sm:$0xff]  ;;  %v490_v44 = vsub.s32 0, %v489_v43  ;;  %v574_v45 = vsub.s32 1, %v489_v43 }
  0x12   : > { %5029 = vmatprep.subr.bf16.mxu0 %v5028_v6  ;;  %s5403_s16 = scalar_lea.vmem %s7079_s0, %s4182_s13  ;;  %v5048_v27 = vpack.c.bf16 %v851_v25, %v850_v24  ;;  %v853_v29 = vld [vmem:[%s7082_s3 + $0x78] sm:$0xff]  ;;  %v406_v46 = vld [vmem:[%s7080_s1] sm:$0x3]  ;;  %s7010_s24 = scalar_lea.vmem %s7090_s11, %s4182_s13 }
  0x13   : > { %v391_v10 = vld [vmem:[%s5403_s16 + $0x8] sm:$0xff]  ;;  %v390_v11 = vld [vmem:[%s5403_s16] sm:$0xff]  ;;  %v392_v18 = vld [vmem:[%s5403_s16 + $0x10] sm:$0xff]  ;;  %v5052_v31 = vpack.c.bf16 %v853_v29, %v852_v28  ;;  %v5454_v49 = vrot.slane %v406_v46, %v490_v44  ;;  %v5456_v50 = vrot.slane %v406_v46, %v574_v45 }
  0x14   : > { %415 = vperm.xlu1 %5166, %v391_v10   ;;  %410 = vperm.xlu0 %5164, %v390_v11   ;;  %v393_v22 = vld [vmem:[%s5403_s16 + $0x18] sm:$0xff]  ;;  %v394_v26 = vld [vmem:[%s5403_s16 + $0x20] sm:$0xff]  ;;  %v395_v30 = vld [vmem:[%s5403_s16 + $0x28] sm:$0xff] }
  0x15   : > { %5031 = vmatpush3.bf16.msra.mxu0 %v5028_v6  ;;  %v396_v32 = vld [vmem:[%s5403_s16 + $0x30] sm:$0xff]  ;;  %v397_v33 = vld [vmem:[%s5403_s16 + $0x38] sm:$0xff]  ;;  %v398_v34 = vld [vmem:[%s5403_s16 + $0x40] sm:$0xff] }
  0x16   : > { %5033 = vmatprep.subr.bf16.mxu0 %v5032_v9  ;;  %v399_v35 = vld [vmem:[%s5403_s16 + $0x48] sm:$0xff]  ;;  %v400_v36 = vld [vmem:[%s5403_s16 + $0x50] sm:$0xff]  ;;  %v401_v37 = vld [vmem:[%s5403_s16 + $0x58] sm:$0xff] }
  0x17   : > { %v402_v38 = vld [vmem:[%s5403_s16 + $0x60] sm:$0xff]  ;;  %v403_v39 = vld [vmem:[%s5403_s16 + $0x68] sm:$0xff]  ;;  %v404_v40 = vld [vmem:[%s5403_s16 + $0x70] sm:$0xff] }
  0x18   : > { %5167 = vset.pattern.permute.xlu1 %v5306_v12  ;;  %5165 = vset.pattern.permute.xlu0 %v5306_v12  ;;  %v405_v41 = vld [vmem:[%s5403_s16 + $0x78] sm:$0xff]  ;;  %v5465_v57 = vld [vmem:[%s7081_s2] ss:$0 sm:$0xff] }
  0x19   : > { %513 = vperm.xlu1 %5167, %v391_v10   ;;  %509 = vperm.xlu0 %5165, %v390_v11  }
  0x1a   : > { %5035 = vmatpush3.bf16.msra.mxu0 %v5032_v9 }
  0x1b   : > { %5037 = vmatprep.subr.bf16.mxu0 %v5036_v15 }
  0x1d   : > { %5168 = vset.pattern.permute.xlu1 %v5305_v3  ;;  %517 = vperm.xlu0 %5165, %v392_v18  }
  0x1e   : > { %420 = vperm.xlu1 %5168, %v392_v18   ;;  %5039 = vmatpush3.bf16.msra.mxu0 %v5036_v15 }
  0x1f   : > { %5041 = vmatprep.subr.bf16.mxu0 %v5040_v19 }
  0x21   : > { %521 = vperm.xlu0 %5165, %v393_v22  }
  0x22   : > { %425 = vperm.xlu1 %5168, %v393_v22   ;;  %5043 = vmatpush3.bf16.msra.mxu0 %v5040_v19 }
  0x23   : > { %5045 = vmatprep.subr.bf16.mxu0 %v5044_v23 }
  0x25   : > { %525 = vperm.xlu0 %5165, %v394_v26  }
  0x26   : > { %430 = vperm.xlu1 %5168, %v394_v26   ;;  %5047 = vmatpush3.bf16.msra.mxu0 %v5044_v23 }
  0x27   : > { %5049 = vmatprep.subr.bf16.mxu0 %v5048_v27 }
  0x29   : > { %529 = vperm.xlu0 %5165, %v395_v30  }
  0x2a   : > { %435 = vperm.xlu1 %5168, %v395_v30   ;;  %5051 = vmatpush3.bf16.msra.mxu0 %v5048_v27 }
  0x2b   : > { %5053 = vmatprep.subr.bf16.mxu0 %v5052_v31 }
  0x2d   : > { %533 = vperm.xlu0 %5165, %v396_v32  }
  0x2e   : > { %440 = vperm.xlu1 %5168, %v396_v32   ;;  %5055 = vmatpush3.bf16.msra.mxu0 %v5052_v31 }
  0x31   : > { %537 = vperm.xlu0 %5165, %v397_v33  }
  0x32   : > { %445 = vperm.xlu1 %5168, %v397_v33  }
  0x35   : > { %541 = vperm.xlu0 %5165, %v398_v34  }
  0x36   : > { %450 = vperm.xlu1 %5168, %v398_v34  }
  0x39   : > { %545 = vperm.xlu0 %5165, %v399_v35  }
  0x3a   : > { %455 = vperm.xlu1 %5168, %v399_v35  }
  0x3d   : > { %549 = vperm.xlu0 %5165, %v400_v36  }
  0x3e   : > { %460 = vperm.xlu1 %5168, %v400_v36  }
  0x41   : > { %553 = vperm.xlu0 %5165, %v401_v37  }
  0x42   : > { %465 = vperm.xlu1 %5168, %v401_v37  }
  0x45   : > { %557 = vperm.xlu0 %5165, %v402_v38  }
  0x46   : > { %470 = vperm.xlu1 %5168, %v402_v38  }
  0x49   : > { %561 = vperm.xlu0 %5165, %v403_v39  }
  0x4a   : > { %475 = vperm.xlu1 %5168, %v403_v39  }
  0x4d   : > { %565 = vperm.xlu0 %5165, %v404_v40  }
  0x4e   : > { %480 = vperm.xlu1 %5168, %v404_v40  }
  0x51   : > { %569 = vperm.xlu0 %5165, %v405_v41  }
  0x52   : > { %485 = vperm.xlu1 %5168, %v405_v41  }
  0x93   : > { %v416_v47 = vpop.permute.xlu1 %415  ;;  %v411_v48 = vpop.permute.xlu0 %410 }
  0x94   : > { %v493_v53 = vmul.f32 %v5454_v49, %v416_v47  ;;  %v492_v54 = vmul.f32 %v5454_v49, %v411_v48 }
  0x98   : > { %v514_v51 = vpop.permute.xlu1 %513  ;;  %v510_v52 = vpop.permute.xlu0 %509 }
  0x99   : > { %v577_v55 = vmul.f32 %v5456_v50, %v514_v51  ;;  %v576_v56 = vmul.f32 %v5456_v50, %v510_v52 }
  0x9b   : > { %v593_v58 = vadd.f32 %v577_v55, %v493_v53  ;;  %v592_v59 = vadd.f32 %v576_v56, %v492_v54 }
  0x9c   : > { %v518_v60 = vpop.permute.xlu0 %517 }
  0x9d   : > { %v615_v61 = vadd.f32 %v5465_v57, %v593_v58  ;;  %v614_v62 = vadd.f32 %v5465_v57, %v592_v59  ;;  %v578_v63 = vmul.f32 %v5456_v50, %v518_v60  ;;  %v421_v0 = vpop.permute.xlu1 %420 }
  0x9e   : > { %v494_v1 = vmul.f32 %v5454_v49, %v421_v0 }
  0x9f   : > { %5169 = vtanh.f32 %v615_v61 }
  0xa0   : > { %5171 = vtanh.f32 %v614_v62  ;;  %v594_v2 = vadd.f32 %v578_v63, %v494_v1  ;;  %v522_v3 = vpop.permute.xlu0 %521 }
  0xa1   : > { %v579_v4 = vmul.f32 %v5456_v50, %v522_v3  ;;  %v426_v5 = vpop.permute.xlu1 %425  ;;  %v1566_v3 = vld [vmem:[%s7084_s5] sm:$0xff] }
  0xa2   : > { %v616_v6 = vadd.f32 %v5465_v57, %v594_v2  ;;  %v495_v7 = vmul.f32 %v5454_v49, %v426_v5  ;;  %v1568_v5 = vld [vmem:[%s7084_s5 + $0x10] sm:$0xff] }
  0xa4   : > { %5173 = vtanh.f32 %v616_v6  ;;  %v595_v8 = vadd.f32 %v579_v4, %v495_v7  ;;  %v526_v9 = vpop.permute.xlu0 %525  ;;  %v1567_v4 = vld [vmem:[%s7084_s5 + $0x8] sm:$0xff] }
  0xa5   : > { %v580_v10 = vmul.f32 %v5456_v50, %v526_v9  ;;  %v431_v11 = vpop.permute.xlu1 %430 }
  0xa6   : > { %v617_v12 = vadd.f32 %v5465_v57, %v595_v8  ;;  %v496_v13 = vmul.f32 %v5454_v49, %v431_v11  ;;  %v1569_v8 = vld [vmem:[%s7084_s5 + $0x18] sm:$0xff]  ;;  %v5056_v11 = vpack.c.bf16 %v1567_v4, %v1566_v3 }
  0xa8   : > { %5175 = vtanh.f32 %v617_v12  ;;  %v596_v14 = vadd.f32 %v580_v10, %v496_v13  ;;  %v530_v15 = vpop.permute.xlu0 %529  ;;  %5057 = vmatprep.subr.bf16.mxu1 %v5056_v11 }
  0xa9   : > { %v5477_v16 = vpop.eup %5169  ;;  %v581_v17 = vmul.f32 %v5456_v50, %v530_v15  ;;  %v436_v18 = vpop.permute.xlu1 %435  ;;  %v5060_v15 = vpack.c.bf16 %v1569_v8, %v1568_v5  ;;  %5059 = vmatpush3.bf16.msra.mxu1 %v5056_v11 }
  0xaa   : > { %v5480_v19 = vpop.eup %5171  ;;  %v618_v20 = vadd.f32 %v5465_v57, %v596_v14  ;;  %v497_v21 = vmul.f32 %v5454_v49, %v436_v18  ;;  %v1571_v18 = vld [vmem:[%s7084_s5 + $0x28] sm:$0xff] }
  0xab   : > { %4544 = vmatprep.mubr.f32.mxu0 %v5480_v19  ;;  %5061 = vmatprep.subr.bf16.mxu1 %v5060_v15 }
  0xac   : > { %5177 = vtanh.f32 %v618_v20  ;;  %v597_v22 = vadd.f32 %v581_v17, %v497_v21  ;;  %4545 = vmatmul.mubr.f32.vlgmr.msra.gmra.mrb[0].mxu0 %v5477_v16  ;;  %v534_v23 = vpop.permute.xlu0 %533  ;;  %v1570_v17 = vld [vmem:[%s7084_s5 + $0x20] sm:$0xff] }
  0xad   : > { %v582_v24 = vmul.f32 %v5456_v50, %v534_v23  ;;  %v441_v25 = vpop.permute.xlu1 %440  ;;  %5063 = vmatpush3.bf16.msra.mxu1 %v5060_v15 }
  0xae   : > { %v5487_v26 = vpop.eup %5173  ;;  %v619_v27 = vadd.f32 %v5465_v57, %v597_v22  ;;  %v498_v28 = vmul.f32 %v5454_v49, %v441_v25 }
  0xaf   : > { %4547 = vmatprep.mubr.f32.mxu0 %v5487_v26 }
  0xb0   : > { %5179 = vtanh.f32 %v619_v27  ;;  %v598_v29 = vadd.f32 %v582_v24, %v498_v28  ;;  %v538_v30 = vpop.permute.xlu0 %537  ;;  %v5064_v28 = vpack.c.bf16 %v1571_v18, %v1570_v17 }
  0xb1   : > { %v583_v31 = vmul.f32 %v5456_v50, %v538_v30  ;;  %v446_v32 = vpop.permute.xlu1 %445  ;;  %v1573_v30 = vld [vmem:[%s7084_s5 + $0x38] sm:$0xff] }
  0xb2   : > { %v5493_v33 = vpop.eup %5175  ;;  %v620_v34 = vadd.f32 %v5465_v57, %v598_v29  ;;  %v499_v35 = vmul.f32 %v5454_v49, %v446_v32  ;;  %v1572_v29 = vld [vmem:[%s7084_s5 + $0x30] sm:$0xff]  ;;  %5065 = vmatprep.subr.bf16.mxu1 %v5064_v28 }
  0xb3   : > { %4548 = vmatmul.mubr.f32.gmra.mrb[2].mxu0 %v5493_v33  ;;  %5067 = vmatpush3.bf16.msra.mxu1 %v5064_v28 }
  0xb4   : > { %5181 = vtanh.f32 %v620_v34  ;;  %v599_v36 = vadd.f32 %v583_v31, %v499_v35  ;;  %v542_v37 = vpop.permute.xlu0 %541 }
  0xb5   : > { %v584_v38 = vmul.f32 %v5456_v50, %v542_v37  ;;  %v451_v39 = vpop.permute.xlu1 %450 }
  0xb6   : > { %v5499_v40 = vpop.eup %5177  ;;  %v621_v41 = vadd.f32 %v5465_v57, %v599_v36  ;;  %v500_v42 = vmul.f32 %v5454_v49, %v451_v39  ;;  %v5068_v39 = vpack.c.bf16 %v1573_v30, %v1572_v29 }
  0xb7   : > { %4550 = vmatprep.mubr.f32.mxu0 %v5499_v40  ;;  %v650_v3 = vmul.f32 %v5499_v40, %v5499_v40 }
  0xb8   : > { %5183 = vtanh.f32 %v621_v41  ;;  %v600_v43 = vadd.f32 %v584_v38, %v500_v42  ;;  %v546_v44 = vpop.permute.xlu0 %545  ;;  %5069 = vmatprep.subr.bf16.mxu1 %v5068_v39 }
  0xb9   : > { %v585_v45 = vmul.f32 %v5456_v50, %v546_v44  ;;  %v456_v46 = vpop.permute.xlu1 %455  ;;  %5071 = vmatpush3.bf16.msra.mxu1 %v5068_v39  ;;  %v5609_v8 = vsub.f32 1.0, %v650_v3  ;;  %v1576_v3 = vld [vmem:[%s7084_s5 + $0x50] sm:$0xff] }
  0xba   : > { %v5505_v47 = vpop.eup %5179  ;;  %v622_v48 = vadd.f32 %v5465_v57, %v600_v43  ;;  %v501_v51 = vmul.f32 %v5454_v49, %v456_v46 }
  0xbb   : > { %4551 = vmatmul.mubr.f32.gmra.mrb[4].mxu0 %v5505_v47 }
  0xbc   : > { %5185 = vtanh.f32 %v622_v48  ;;  %v601_v52 = vadd.f32 %v585_v45, %v501_v51  ;;  %v550_v53 = vpop.permute.xlu0 %549 }
  0xbd   : > { %v586_v54 = vmul.f32 %v5456_v50, %v550_v53  ;;  %v461_v55 = vpop.permute.xlu1 %460 }
  0xbe   : > { %v5511_v56 = vpop.eup %5181  ;;  %v623_v58 = vadd.f32 %v5465_v57, %v601_v52  ;;  %v502_v59 = vmul.f32 %v5454_v49, %v461_v55  ;;  %v646_v55 = vmul.f32 %v5480_v19, %v5480_v19 }
  0xbf   : > { %4553 = vmatprep.mubr.f32.mxu0 %v5511_v56 }
  0xc0   : > { %5187 = vtanh.f32 %v623_v58  ;;  %v602_v60 = vadd.f32 %v586_v54, %v502_v59  ;;  %v554_v61 = vpop.permute.xlu0 %553  ;;  %v647_v58 = vmul.f32 %v5477_v16, %v5477_v16 }
  0xc1   : > { %v587_v62 = vmul.f32 %v5456_v50, %v554_v61  ;;  %v466_v63 = vpop.permute.xlu1 %465 }
  0xc2   : > { %v5517_v0 = vpop.eup %5183  ;;  %v624_v1 = vadd.f32 %v5465_v57, %v602_v60  ;;  %v503_v2 = vmul.f32 %v5454_v49, %v466_v63  ;;  %v5583_v60 = vsub.f32 1.0, %v646_v55  ;;  %v5588_v61 = vsub.f32 1.0, %v647_v58  ;;  %v1574_v55 = vld [vmem:[%s7084_s5 + $0x40] sm:$0xff]  ;;  %v1575_v58 = vld [vmem:[%s7084_s5 + $0x48] sm:$0xff] }
  0xc3   : > { %4554 = vmatmul.mubr.f32.gmra.mrb[6].mxu0 %v5517_v0 }
  0xc4   : > { %5189 = vtanh.f32 %v624_v1  ;;  %v603_v6 = vadd.f32 %v587_v62, %v503_v2  ;;  %v558_v7 = vpop.permute.xlu0 %557  ;;  %v649_v62 = vmul.f32 %v5493_v33, %v5493_v33  ;;  %v726_v1 = vmul.f32 %v5583_v60, %v5454_v49 }
  0xc5   : > { %v588_v9 = vmul.f32 %v5456_v50, %v558_v7  ;;  %v471_v10 = vpop.permute.xlu1 %470  ;;  %v727_v4 = vmul.f32 %v5588_v61, %v5454_v49 }
  0xc6   : > { %v5535_v12 = vpop.eup %5185  ;;  %v625_v13 = vadd.f32 %v5465_v57, %v603_v6  ;;  %v504_v14 = vmul.f32 %v5454_v49, %v471_v10  ;;  %v5603_v5 = vsub.f32 1.0, %v649_v62  ;;  %v651_v6 = vmul.f32 %v5505_v47, %v5505_v47 }
  0xc7   : > { %4556 = vmatprep.mubr.f32.mxu0 %v5535_v12  ;;  %v654_v17 = vmul.f32 %v5535_v12, %v5535_v12  ;;  %v5072_v62 = vpack.c.bf16 %v1575_v58, %v1574_v55  ;;  %v680_v55 = vmul.f32 -2.0, %v5487_v26 }
  0xc8   : > { %5191 = vtanh.f32 %v625_v13  ;;  %v604_v20 = vadd.f32 %v588_v9, %v504_v14  ;;  %v562_v21 = vpop.permute.xlu0 %561  ;;  %v652_v9 = vmul.f32 %v5511_v56, %v5511_v56  ;;  %v729_v10 = vmul.f32 %v5603_v5, %v5454_v49 }
  0xc9   : > { %v589_v22 = vmul.f32 %v5456_v50, %v562_v21  ;;  %v476_v23 = vpop.permute.xlu1 %475  ;;  %v5615_v11 = vsub.f32 1.0, %v651_v6  ;;  %v653_v13 = vmul.f32 %v5517_v0, %v5517_v0  ;;  %v730_v14 = vmul.f32 %v5609_v8, %v5454_v49  ;;  %5073 = vmatprep.subr.bf16.mxu1 %v5072_v62 }
  0xca   : > { %v5547_v24 = vpop.eup %5187  ;;  %v626_v25 = vadd.f32 %v5465_v57, %v604_v20  ;;  %v505_v27 = vmul.f32 %v5454_v49, %v476_v23  ;;  %v5621_v15 = vsub.f32 1.0, %v652_v9  ;;  %v5633_v23 = vsub.f32 1.0, %v654_v17  ;;  %5075 = vmatpush3.bf16.msra.mxu1 %v5072_v62 }
  0xcb   : > { %4557 = vmatmul.mubr.f32.gmra.mrb[8].mxu0 %v5547_v24  ;;  %v731_v18 = vmul.f32 %v5615_v11, %v5454_v49  ;;  %v5627_v20 = vsub.f32 1.0, %v653_v13  ;;  %v655_v21 = vmul.f32 %v5547_v24, %v5547_v24  ;;  %v758_v6 = vmul.f32 %v5583_v60, %v5456_v50  ;;  %v1579_v13 = vld [vmem:[%s7084_s5 + $0x68] sm:$0xff] }
  0xcc   : > { %5193 = vtanh.f32 %v626_v25  ;;  %v605_v31 = vadd.f32 %v589_v22, %v505_v27  ;;  %v566_v32 = vpop.permute.xlu0 %565  ;;  %v732_v22 = vmul.f32 %v5621_v15, %v5454_v49  ;;  %v734_v30 = vmul.f32 %v5633_v23, %v5454_v49 }
  0xcd   : > { %v590_v34 = vmul.f32 %v5456_v50, %v566_v32  ;;  %v481_v35 = vpop.permute.xlu1 %480  ;;  %v733_v27 = vmul.f32 %v5627_v20, %v5454_v49  ;;  %v5639_v28 = vsub.f32 1.0, %v655_v21  ;;  %v759_v9 = vmul.f32 %v5588_v61, %v5456_v50  ;;  %v1580_v21 = vld [vmem:[%s7084_s5 + $0x70] sm:$0xff] }
  0xce   : > { %v5559_v36 = vpop.eup %5189  ;;  %v627_v37 = vadd.f32 %v5465_v57, %v605_v31  ;;  %v506_v38 = vmul.f32 %v5454_v49, %v481_v35 }
  0xcf   : > { %4559 = vmatprep.mubr.f32.mxu0 %v5559_v36  ;;  %v656_v25 = vmul.f32 %v5559_v36, %v5559_v36 }
  0xd0   : > { %5195 = vtanh.f32 %v627_v37  ;;  %v606_v41 = vadd.f32 %v590_v34, %v506_v38  ;;  %v570_v42 = vpop.permute.xlu0 %569  ;;  %v735_v34 = vmul.f32 %v5639_v28, %v5454_v49 }
  0xd1   : > { %v591_v43 = vmul.f32 %v5456_v50, %v570_v42  ;;  %v486_v44 = vpop.permute.xlu1 %485  ;;  %v5645_v31 = vsub.f32 1.0, %v656_v25  ;;  %v762_v25 = vmul.f32 %v5609_v8, %v5456_v50 }
  0xd2   : > { %v5565_v45 = vpop.eup %5191  ;;  %v628_v46 = vadd.f32 %v5465_v57, %v606_v41  ;;  %v507_v48 = vmul.f32 %v5454_v49, %v486_v44 }
  0xd3   : > { %4560 = vmatmul.mubr.f32.gmra.mrb[10].mxu0 %v5565_v45  ;;  %v657_v29 = vmul.f32 %v5565_v45, %v5565_v45  ;;  %v736_v38 = vmul.f32 %v5645_v31, %v5454_v49 }
  0xd4   : > { %5197 = vtanh.f32 %v628_v46  ;;  %v607_v51 = vadd.f32 %v591_v43, %v507_v48 }
  0xd5   : > { %v5651_v35 = vsub.f32 1.0, %v657_v29  ;;  %v763_v29 = vmul.f32 %v5615_v11, %v5456_v50 }
  0xd6   : > { %v5570_v52 = vpop.eup %5193  ;;  %v629_v53 = vadd.f32 %v5465_v57, %v607_v51  ;;  %v648_v57 = vmul.f32 %v5487_v26, %v5487_v26 }
  0xd7   : > { %4562 = vmatprep.mubr.f32.mxu0 %v5570_v52  ;;  %v658_v32 = vmul.f32 %v5570_v52, %v5570_v52  ;;  %v737_v42 = vmul.f32 %v5651_v35, %v5454_v49 }
  0xd8   : > { %5199 = vtanh.f32 %v629_v53  ;;  %v5596_v2 = vsub.f32 1.0, %v648_v57 }
  0xd9   : > { %v5657_v39 = vsub.f32 1.0, %v658_v32  ;;  %v765_v32 = vmul.f32 %v5627_v20, %v5456_v50 }
  0xda   : > { %v5574_v54 = vpop.eup %5195  ;;  %v728_v7 = vmul.f32 %v5596_v2, %v5454_v49 }
  0xdb   : > { %4563 = vmatmul.mubr.f32.gmra.mrb[12].mxu0 %v5574_v54  ;;  %v659_v37 = vmul.f32 %v5574_v54, %v5574_v54  ;;  %v738_v46 = vmul.f32 %v5657_v39, %v5454_v49 }
  0xdd   : > { %v5663_v43 = vsub.f32 1.0, %v659_v37  ;;  %v767_v37 = vmul.f32 %v5639_v28, %v5456_v50 }
  0xde   : > { %v5581_v59 = vpop.eup %5197 }
  0xdf   : > { %4565 = vmatprep.mubr.f32.mxu0 %v5581_v59  ;;  %v660_v41 = vmul.f32 %v5581_v59, %v5581_v59  ;;  %v739_v51 = vmul.f32 %v5663_v43, %v5454_v49  ;;  %v771_v58 = vmul.f32 %v5663_v43, %v5456_v50 }
  0xe1   : > { %v5669_v48 = vsub.f32 1.0, %v660_v41  ;;  %v678_v41 = vmul.f32 -2.0, %v5480_v19 }
  0xe2   : > { %v5592_v63 = vpop.eup %5199 }
  0xe3   : > { %4566 = vmatmul.mubr.f32.gmra.mrb[14].mxu0 %v5592_v63  ;;  %v661_v44 = vmul.f32 %v5592_v63, %v5592_v63  ;;  %v740_v57 = vmul.f32 %v5669_v48, %v5454_v49  ;;  %v772_v19 = vmul.f32 %v5669_v48, %v5456_v50 }
  0xe4   : > { %4568 = vmatprep.mubr.f32.mxu0 %v726_v1 }
  0xe5   : > { %v5673_v53 = vsub.f32 1.0, %v661_v44  ;;  %v770_v44 = vmul.f32 %v5657_v39, %v5456_v50 }
  0xe7   : > { %4569 = vmatmul.mubr.f32.gmra.mrb[16].mxu0 %v727_v4  ;;  %v741_v1 = vmul.f32 %v5673_v53, %v5454_v49  ;;  %v1577_v4 = vld [vmem:[%s7084_s5 + $0x58] sm:$0xff]  ;;  %v773_v26 = vmul.f32 %v5673_v53, %v5456_v50 }
  0xe8   : > { %4571 = vmatprep.mubr.f32.mxu0 %v728_v7  ;;  %v5076_v7 = vpack.c.bf16 %v1577_v4, %v1576_v3 }
  0xea   : > { %5077 = vmatprep.subr.bf16.mxu1 %v5076_v7 }
  0xeb   : > { %4572 = vmatmul.mubr.f32.gmra.mrb[18].mxu0 %v729_v10  ;;  %5079 = vmatpush3.bf16.msra.mxu1 %v5076_v7  ;;  %v1578_v10 = vld [vmem:[%s7084_s5 + $0x60] sm:$0xff] }
  0xec   : > { %4574 = vmatprep.mubr.f32.mxu0 %v730_v14  ;;  %v760_v14 = vmul.f32 %v5596_v2, %v5456_v50  ;;  %v5080_v17 = vpack.c.bf16 %v1579_v13, %v1578_v10 }
  0xee   : > { %5081 = vmatprep.subr.bf16.mxu1 %v5080_v17 }
  0xef   : > { %4575 = vmatmul.mubr.f32.gmra.mrb[20].mxu0 %v731_v18  ;;  %v761_v18 = vmul.f32 %v5603_v5, %v5456_v50  ;;  %5083 = vmatpush3.bf16.msra.mxu1 %v5080_v17 }
  0xf0   : > { %4577 = vmatprep.mubr.f32.mxu0 %v732_v22  ;;  %v1581_v22 = vld [vmem:[%s7084_s5 + $0x78] sm:$0xff] }
  0xf3   : > { %4578 = vmatmul.mubr.f32.gmra.mrb[22].mxu0 %v733_v27  ;;  %v5084_v27 = vpack.c.bf16 %v1581_v22, %v1580_v21 }
  0xf4   : > { %4580 = vmatprep.mubr.f32.mxu0 %v734_v30  ;;  %v764_v30 = vmul.f32 %v5621_v15, %v5456_v50 }
  0xf5   : > { %5085 = vmatprep.subr.bf16.mxu1 %v5084_v27 }
  0xf6   : > { %5087 = vmatpush3.bf16.msra.mxu1 %v5084_v27 }
  0xf7   : > { %4581 = vmatmul.mubr.f32.gmra.mrb[24].mxu0 %v735_v34  ;;  %v766_v34 = vmul.f32 %v5633_v23, %v5456_v50 }
  0xf8   : > { %4583 = vmatprep.mubr.f32.mxu0 %v736_v38  ;;  %v768_v38 = vmul.f32 %v5645_v31, %v5456_v50 }
  0xfb   : > { %4584 = vmatmul.mubr.f32.gmra.mrb[26].mxu0 %v737_v42  ;;  %v769_v42 = vmul.f32 %v5651_v35, %v5456_v50 }
  0xfc   : > { %4586 = vmatprep.mubr.f32.mxu0 %v738_v46  ;;  %v694_v46 = vmul.f32 %v678_v41, %v5583_v60  ;;  %v681_v60 = vmul.f32 -2.0, %v5493_v33  ;;  %v684_v33 = vmul.f32 -2.0, %v5511_v56 }
  0xfe   : > { %v790_v62 = vmul.f32 %v694_v46, %v5454_v49  ;;  %v700_v13 = vmul.f32 %v684_v33, %v5621_v15  ;;  %v687_v15 = vmul.f32 -2.0, %v5547_v24  ;;  %v690_v24 = vmul.f32 -2.0, %v5570_v52  ;;  %v2295_v33 = vld [vmem:[%s7086_s7 + $0x8] sm:$0xff] }
  0xff   : > { %4587 = vmatmul.mubr.f32.gmra.mrb[28].mxu0 %v739_v51  ;;  %v679_v51 = vmul.f32 -2.0, %v5477_v16  ;;  %v682_v16 = vmul.f32 -2.0, %v5499_v40 }
 0x100   : > { %4589 = vmatprep.mubr.f32.mxu0 %v740_v57  ;;  %v806_v4 = vmul.f32 %v790_v62, %v5454_v49 }
 0x101   : > { %v695_v57 = vmul.f32 %v679_v51, %v5588_v61  ;;  %v697_v61 = vmul.f32 %v681_v60, %v5603_v5  ;;  %v698_v7 = vmul.f32 %v682_v16, %v5609_v8  ;;  %v685_v8 = vmul.f32 -2.0, %v5517_v0 }
 0x102   : > { %v688_v0 = vmul.f32 -2.0, %v5559_v36 }
 0x103   : > { %4590 = vmatmul.mubr.f32.gmra.mrb[30].mxu0 %v741_v1  ;;  %v696_v1 = vmul.f32 %v680_v55, %v5596_v2  ;;  %v791_v3 = vmul.f32 %v695_v57, %v5454_v49  ;;  %v683_v2 = vmul.f32 -2.0, %v5505_v47  ;;  %v793_v50 = vmul.f32 %v697_v61, %v5454_v49 }
 0x104   : > { %4592 = vmatprep.mubr.f32.mxu0 %v758_v6  ;;  %v794_v10 = vmul.f32 %v698_v7, %v5454_v49  ;;  %v686_v47 = vmul.f32 -2.0, %v5535_v12  ;;  %v701_v17 = vmul.f32 %v685_v8, %v5627_v20 }
 0x105   : > { %v792_v6 = vmul.f32 %v696_v1, %v5454_v49  ;;  %v807_v40 = vmul.f32 %v791_v3, %v5454_v49  ;;  %v809_v56 = vmul.f32 %v793_v50, %v5454_v49 }
 0x106   : > { %v702_v21 = vmul.f32 %v686_v47, %v5633_v23  ;;  %v797_v22 = vmul.f32 %v701_v17, %v5454_v49  ;;  %v689_v23 = vmul.f32 -2.0, %v5565_v45  ;;  %v692_v45 = vmul.f32 -2.0, %v5581_v59 }
 0x107   : > { %4593 = vmatmul.mubr.f32.gmra.mrb[32].mxu0 %v759_v9  ;;  %v699_v9 = vmul.f32 %v683_v2, %v5615_v11  ;;  %v808_v5 = vmul.f32 %v792_v6, %v5454_v49  ;;  %v810_v11 = vmul.f32 %v794_v10, %v5454_v49  ;;  %v2294_v2 = vld [vmem:[%s7086_s7] sm:$0xff] }
 0x108   : > { %4595 = vmatprep.mubr.f32.mxu0 %v760_v14  ;;  %v798_v27 = vmul.f32 %v702_v21, %v5454_v49  ;;  %v813_v36 = vmul.f32 %v797_v22, %v5454_v49  ;;  %v5088_v10 = vpack.c.bf16 %v2295_v33, %v2294_v2  ;;  %v2303_v2 = vld [vmem:[%s7086_s7 + $0x48] sm:$0xff] }
 0x109   : > { %v795_v14 = vmul.f32 %v699_v9, %v5454_v49 }
 0x10a   : > { %5089 = vmatprep.subr.bf16.mxu0 %v5088_v10 }
 0x10b   : > { %4596 = vmatmul.mubr.f32.gmra.mrb[34].mxu0 %v761_v18  ;;  %v796_v18 = vmul.f32 %v700_v13, %v5454_v49  ;;  %v811_v12 = vmul.f32 %v795_v14, %v5454_v49 }
 0x10c   : > { %4598 = vmatprep.mubr.f32.mxu0 %v762_v25  ;;  %v703_v25 = vmul.f32 %v687_v15, %v5639_v28  ;;  %v814_v28 = vmul.f32 %v798_v27, %v5454_v49  ;;  %5091 = vmatpush3.bf16.msra.mxu0 %v5088_v10 }
 0x10d   : > { %v812_v20 = vmul.f32 %v796_v18, %v5454_v49 }
 0x10f   : > { %4599 = vmatmul.mubr.f32.gmra.mrb[36].mxu0 %v763_v29  ;;  %v704_v29 = vmul.f32 %v688_v0, %v5645_v31  ;;  %v691_v31 = vmul.f32 -2.0, %v5574_v54 }
 0x110   : > { %4601 = vmatprep.mubr.f32.mxu0 %v764_v30  ;;  %v799_v30 = vmul.f32 %v703_v25, %v5454_v49 }
 0x111   : > { %v707_v41 = vmul.f32 %v691_v31, %v5663_v43 }
 0x112   : > { %v815_v52 = vmul.f32 %v799_v30, %v5454_v49  ;;  %v2296_v30 = vld [vmem:[%s7086_s7 + $0x10] sm:$0xff] }
 0x113   : > { %4602 = vmatmul.mubr.f32.gmra.mrb[38].mxu0 %v765_v32  ;;  %v705_v32 = vmul.f32 %v689_v23, %v5651_v35  ;;  %v803_v59 = vmul.f32 %v707_v41, %v5454_v49 }
 0x114   : > { %4604 = vmatprep.mubr.f32.mxu0 %v766_v34  ;;  %v800_v34 = vmul.f32 %v704_v29, %v5454_v49 }
 0x115   : > { %v819_v55 = vmul.f32 %v803_v59, %v5454_v49 }
 0x116   : > { %v816_v35 = vmul.f32 %v800_v34, %v5454_v49 }
 0x117   : > { %4605 = vmatmul.mubr.f32.gmra.mrb[40].mxu0 %v767_v37  ;;  %v706_v37 = vmul.f32 %v690_v24, %v5657_v39  ;;  %v693_v39 = vmul.f32 -2.0, %v5592_v63 }
 0x118   : > { %4607 = vmatprep.mubr.f32.mxu0 %v768_v38  ;;  %v801_v38 = vmul.f32 %v705_v32, %v5454_v49  ;;  %v2297_v32 = vld [vmem:[%s7086_s7 + $0x18] sm:$0xff] }
 0x119   : > { %v709_v46 = vmul.f32 %v693_v39, %v5673_v53  ;;  %v5802_v53 = vld [vmem:[%s7083_s4] ss:$0 sm:$0xff] }
 0x11a   : > { %v817_v54 = vmul.f32 %v801_v38, %v5454_v49 }
 0x11b   : > { %4608 = vmatmul.mubr.f32.gmra.mrb[42].mxu0 %v769_v42  ;;  %v802_v42 = vmul.f32 %v706_v37, %v5454_v49  ;;  %v5092_v37 = vpack.c.bf16 %v2297_v32, %v2296_v30 }
 0x11c   : > { %4610 = vmatprep.mubr.f32.mxu0 %v770_v44  ;;  %v708_v44 = vmul.f32 %v692_v45, %v5669_v48  ;;  %v805_v48 = vmul.f32 %v709_v46, %v5454_v49 }
 0x11d   : > { %v818_v51 = vmul.f32 %v802_v42, %v5454_v49  ;;  %5093 = vmatprep.subr.bf16.mxu0 %v5092_v37 }
 0x11e   : > { %v804_v43 = vmul.f32 %v708_v44, %v5454_v49  ;;  %v821_v63 = vmul.f32 %v805_v48, %v5454_v49  ;;  %5095 = vmatpush3.bf16.msra.mxu0 %v5092_v37 }
 0x11f   : > { %4611 = vmatmul.mubr.f32.gmra.mrb[44].mxu0 %v771_v58 }
 0x120   : > { %4613 = vmatprep.mubr.f32.mxu0 %v772_v19  ;;  %v820_v58 = vmul.f32 %v804_v43, %v5454_v49 }
 0x123   : > { %4614 = vmatmul.mubr.f32.gmra.mrb[46].mxu0 %v773_v26 }
 0x124   : > { %4616 = vmatprep.mubr.f32.mxu0 %v806_v4 }
 0x127   : > { %4617 = vmatmul.mubr.f32.gmra.mrb[48].mxu0 %v807_v40 }
 0x128   : > { %4619 = vmatprep.mubr.f32.mxu0 %v808_v5 }
 0x12b   : > { %4620 = vmatmul.mubr.f32.gmra.mrb[50].mxu0 %v809_v56 }
 0x12c   : > { %4622 = vmatprep.mubr.f32.mxu0 %v810_v11 }
 0x12f   : > { %4623 = vmatmul.mubr.f32.gmra.mrb[52].mxu0 %v811_v12 }
 0x130   : > { %4625 = vmatprep.mubr.f32.mxu0 %v812_v20 }
 0x133   : > { %4626 = vmatmul.mubr.f32.gmra.mrb[54].mxu0 %v813_v36 }
 0x134   : > { %4628 = vmatprep.mubr.f32.mxu0 %v814_v28 }
 0x137   : > { %4629 = vmatmul.mubr.f32.gmra.mrb[56].mxu0 %v815_v52 }
 0x138   : > { %4631 = vmatprep.mubr.f32.mxu0 %v816_v35 }
 0x13b   : > { %4632 = vmatmul.mubr.f32.gmra.mrb[58].mxu0 %v817_v54 }
 0x13c   : > { %4634 = vmatprep.mubr.f32.mxu0 %v818_v51 }
 0x13f   : > { %4635 = vmatmul.mubr.f32.gmra.mrb[60].mxu0 %v819_v55 }
 0x140   : > { %4637 = vmatprep.mubr.f32.mxu0 %v820_v58 }
 0x143   : > { %4638 = vmatmul.mubr.f32.gmra.mrb[62].mxu0 %v821_v63 }
 0x17f   : > { %v4546_v57 = vpop.f32.mrb[0].mxu0 }
 0x180   : > { %v1311_v19 = vadd.f32 %v4546_v57, %v5802_v53  ;;  %v985_v62 = vpop.f32.mrb[1].mxu0  ;;  %v2298_v57 = vld [vmem:[%s7086_s7 + $0x20] sm:$0xff] }
 0x181   : > { %v1310_v1 = vadd.f32 %v5802_v53, %v985_v62  ;;  %v2300_v62 = vld [vmem:[%s7086_s7 + $0x30] sm:$0xff] }
 0x182   : > { %5201 = vtanh.f32 %v1311_v19  ;;  %v2299_v19 = vld [vmem:[%s7086_s7 + $0x28] sm:$0xff] }
 0x183   : > { %5203 = vtanh.f32 %v1310_v1 }
 0x186   : > { %v4549_v60 = vpop.f32.mrb[2].mxu0 }
 0x187   : > { %v1313_v16 = vadd.f32 %v4549_v60, %v5802_v53  ;;  %v995_v26 = vpop.f32.mrb[3].mxu0 }
 0x188   : > { %v1312_v49 = vadd.f32 %v5802_v53, %v995_v26 }
 0x189   : > { %5205 = vtanh.f32 %v1313_v16 }
 0x18a   : > { %5207 = vtanh.f32 %v1312_v49  ;;  %v5096_v49 = vpack.c.bf16 %v2299_v19, %v2298_v57 }
 0x18c   : > { %v5202_v3 = vpop.eup %5201  ;;  %5097 = vmatprep.subr.bf16.mxu0 %v5096_v49 }
 0x18d   : > { %v5204_v61 = vpop.eup %5203  ;;  %v1343_v4 = vmul.f32 %v5202_v3, %v5202_v3  ;;  %v1375_v5 = vmul.f32 -2.0, %v5202_v3  ;;  %5099 = vmatpush3.bf16.msra.mxu0 %v5096_v49 }
 0x18e   : > { %4672 = vmatprep.mubr.f32.mxu1 %v5204_v61  ;;  %v4552_v6 = vpop.f32.mrb[4].mxu0  ;;  %v1342_v7 = vmul.f32 %v5204_v61, %v5204_v61  ;;  %v1374_v47 = vmul.f32 -2.0, %v5204_v61 }
 0x18f   : > { %v1315_v40 = vadd.f32 %v4552_v6, %v5802_v53  ;;  %4673 = vmatmul.mubr.f32.vlgmr.msra.gmra.mrb[0].mxu1 %v5202_v3  ;;  %v1005_v50 = vpop.f32.mrb[5].mxu0  ;;  %v5815_v9 = vsub.f32 1.0, %v1343_v4  ;;  %v2301_v3 = vld [vmem:[%s7086_s7 + $0x38] sm:$0xff] }
 0x190   : > { %v1314_v13 = vadd.f32 %v5802_v53, %v1005_v50  ;;  %v5818_v8 = vsub.f32 1.0, %v1342_v7  ;;  %v5100_v6 = vpack.c.bf16 %v2301_v3, %v2300_v62  ;;  %v2302_v7 = vld [vmem:[%s7086_s7 + $0x40] sm:$0xff] }
 0x191   : > { %5209 = vtanh.f32 %v1315_v40  ;;  %v5821_v56 = vmul.f32 %v1375_v5, %v5815_v9  ;;  %v5104_v50 = vpack.c.bf16 %v2303_v2, %v2302_v7 }
 0x192   : > { %5211 = vtanh.f32 %v1314_v13  ;;  %v5824_v14 = vmul.f32 %v1374_v47, %v5818_v8  ;;  %5101 = vmatprep.subr.bf16.mxu0 %v5100_v6  ;;  %v2304_v13 = vld [vmem:[%s7086_s7 + $0x50] sm:$0xff]  ;;  %v2305_v47 = vld [vmem:[%s7086_s7 + $0x58] sm:$0xff] }
 0x193   : > { %v5206_v17 = vpop.eup %5205  ;;  %5103 = vmatpush3.bf16.msra.mxu0 %v5100_v6 }
 0x194   : > { %v5208_v11 = vpop.eup %5207  ;;  %v1345_v18 = vmul.f32 %v5206_v17, %v5206_v17  ;;  %v1377_v12 = vmul.f32 -2.0, %v5206_v17  ;;  %5105 = vmatprep.subr.bf16.mxu0 %v5104_v50 }
 0x195   : > { %4675 = vmatprep.mubr.f32.mxu1 %v5208_v11  ;;  %v1344_v21 = vmul.f32 %v5208_v11, %v5208_v11  ;;  %v1376_v27 = vmul.f32 -2.0, %v5208_v11 }
 0x196   : > { %v4555_v15 = vpop.f32.mrb[6].mxu0  ;;  %4676 = vmatmul.mubr.f32.gmra.mrb[2].mxu1 %v5206_v17  ;;  %v5826_v0 = vsub.f32 1.0, %v1345_v18 }
 0x197   : > { %v1317_v22 = vadd.f32 %v4555_v15, %v5802_v53  ;;  %v1015_v25 = vpop.f32.mrb[7].mxu0  ;;  %v5829_v20 = vsub.f32 1.0, %v1344_v21  ;;  %5107 = vmatpush3.bf16.msra.mxu0 %v5104_v50 }
 0x198   : > { %v1316_v29 = vadd.f32 %v5802_v53, %v1015_v25  ;;  %v5833_v23 = vmul.f32 %v1377_v12, %v5826_v0 }
 0x199   : > { %5213 = vtanh.f32 %v1317_v22  ;;  %v5836_v24 = vmul.f32 %v1376_v27, %v5829_v20  ;;  %v5108_v27 = vpack.c.bf16 %v2305_v47, %v2304_v13 }
 0x19a   : > { %5215 = vtanh.f32 %v1316_v29 }
 0x19b   : > { %v5210_v36 = vpop.eup %5209  ;;  %5109 = vmatprep.subr.bf16.mxu0 %v5108_v27 }
 0x19c   : > { %v5212_v28 = vpop.eup %5211  ;;  %v1347_v34 = vmul.f32 %v5210_v36, %v5210_v36  ;;  %v1379_v38 = vmul.f32 -2.0, %v5210_v36  ;;  %5111 = vmatpush3.bf16.msra.mxu0 %v5108_v27 }
 0x19d   : > { %4678 = vmatprep.mubr.f32.mxu1 %v5212_v28  ;;  %v1346_v31 = vmul.f32 %v5212_v28, %v5212_v28  ;;  %v1378_v44 = vmul.f32 -2.0, %v5212_v28 }
 0x19e   : > { %v4558_v45 = vpop.f32.mrb[8].mxu0  ;;  %4679 = vmatmul.mubr.f32.gmra.mrb[4].mxu1 %v5210_v36  ;;  %v5844_v52 = vsub.f32 1.0, %v1347_v34 }
 0x19f   : > { %v1319_v41 = vadd.f32 %v4558_v45, %v5802_v53  ;;  %v1025_v35 = vpop.f32.mrb[9].mxu0  ;;  %v5847_v42 = vsub.f32 1.0, %v1346_v31 }
 0x1a0   : > { %v1318_v39 = vadd.f32 %v5802_v53, %v1025_v35  ;;  %v5851_v54 = vmul.f32 %v1379_v38, %v5844_v52 }
 0x1a1   : > { %5217 = vtanh.f32 %v1319_v41  ;;  %v5854_v59 = vmul.f32 %v1378_v44, %v5847_v42 }
 0x1a2   : > { %5219 = vtanh.f32 %v1318_v39 }
 0x1a3   : > { %v5214_v46 = vpop.eup %5213 }
 0x1a4   : > { %v5216_v51 = vpop.eup %5215  ;;  %v1349_v43 = vmul.f32 %v5214_v46, %v5214_v46  ;;  %v1381_v63 = vmul.f32 -2.0, %v5214_v46 }
 0x1a5   : > { %4681 = vmatprep.mubr.f32.mxu1 %v5216_v51  ;;  %v1348_v55 = vmul.f32 %v5216_v51, %v5216_v51  ;;  %v1380_v26 = vmul.f32 -2.0, %v5216_v51 }
 0x1a6   : > { %v4561_v48 = vpop.f32.mrb[10].mxu0  ;;  %4682 = vmatmul.mubr.f32.gmra.mrb[6].mxu1 %v5214_v46  ;;  %v5856_v58 = vsub.f32 1.0, %v1349_v43 }
 0x1a7   : > { %v1321_v1 = vadd.f32 %v4561_v48, %v5802_v53  ;;  %v1035_v60 = vpop.f32.mrb[11].mxu0  ;;  %v5868_v16 = vsub.f32 1.0, %v1348_v55 }
 0x1a8   : > { %v1320_v61 = vadd.f32 %v5802_v53, %v1035_v60  ;;  %v5875_v4 = vmul.f32 %v1381_v63, %v5856_v58 }
 0x1a9   : > { %5221 = vtanh.f32 %v1321_v1  ;;  %v5884_v33 = vmul.f32 %v1380_v26, %v5868_v16 }
 0x1aa   : > { %5223 = vtanh.f32 %v1320_v61 }
 0x1ab   : > { %v5218_v40 = vpop.eup %5217 }
 0x1ac   : > { %v5220_v5 = vpop.eup %5219  ;;  %v1351_v10 = vmul.f32 %v5218_v40, %v5218_v40  ;;  %v1383_v21 = vmul.f32 -2.0, %v5218_v40 }
 0x1ad   : > { %4684 = vmatprep.mubr.f32.mxu1 %v5220_v5  ;;  %v1350_v17 = vmul.f32 %v5220_v5, %v5220_v5  ;;  %v1382_v25 = vmul.f32 -2.0, %v5220_v5 }
 0x1ae   : > { %v4564_v11 = vpop.f32.mrb[12].mxu0  ;;  %4685 = vmatmul.mubr.f32.gmra.mrb[8].mxu1 %v5218_v40  ;;  %v5892_v18 = vsub.f32 1.0, %v1351_v10 }
 0x1af   : > { %v1323_v15 = vadd.f32 %v4564_v11, %v5802_v53  ;;  %v1045_v12 = vpop.f32.mrb[13].mxu0  ;;  %v5895_v22 = vsub.f32 1.0, %v1350_v17 }
 0x1b0   : > { %v1322_v29 = vadd.f32 %v5802_v53, %v1045_v12  ;;  %v5899_v36 = vmul.f32 %v1383_v21, %v5892_v18 }
 0x1b1   : > { %5225 = vtanh.f32 %v1323_v15  ;;  %v5902_v30 = vmul.f32 %v1382_v25, %v5895_v22 }
 0x1b2   : > { %5227 = vtanh.f32 %v1322_v29 }
 0x1b3   : > { %v5222_v32 = vpop.eup %5221 }
 0x1b4   : > { %v5224_v28 = vpop.eup %5223  ;;  %v1353_v34 = vmul.f32 %v5222_v32, %v5222_v32  ;;  %v1385_v38 = vmul.f32 -2.0, %v5222_v32 }
 0x1b5   : > { %4687 = vmatprep.mubr.f32.mxu1 %v5224_v28  ;;  %v1352_v37 = vmul.f32 %v5224_v28, %v5224_v28  ;;  %v1384_v39 = vmul.f32 -2.0, %v5224_v28 }
 0x1b6   : > { %v4567_v31 = vpop.f32.mrb[14].mxu0  ;;  %4688 = vmatmul.mubr.f32.gmra.mrb[10].mxu1 %v5222_v32  ;;  %v5904_v45 = vsub.f32 1.0, %v1353_v34 }
 0x1b7   : > { %v1325_v41 = vadd.f32 %v4567_v31, %v5802_v53  ;;  %v1055_v35 = vpop.f32.mrb[15].mxu0  ;;  %v5907_v44 = vsub.f32 1.0, %v1352_v37 }
 0x1b8   : > { %v1324_v46 = vadd.f32 %v5802_v53, %v1055_v35  ;;  %v5911_v51 = vmul.f32 %v1385_v38, %v5904_v45 }
 0x1b9   : > { %5229 = vtanh.f32 %v1325_v41  ;;  %v5914_v43 = vmul.f32 %v1384_v39, %v5907_v44 }
 0x1ba   : > { %5231 = vtanh.f32 %v1324_v46  ;;  %v4570_v55 = vpop.f32.mrb[16].mxu0 }
 0x1bb   : > { %v5226_v48 = vpop.eup %5225  ;;  %v1423_v63 = vmul.f32 %v4570_v55, %v5815_v9  ;;  %v1487_v57 = vmul.f32 %v4570_v55, %v5821_v56  ;;  %v1065_v19 = vpop.f32.mrb[17].mxu0 }
 0x1bc   : > { %v5228_v62 = vpop.eup %5227  ;;  %v1422_v1 = vmul.f32 %v5818_v8, %v1065_v19  ;;  %v1486_v53 = vmul.f32 %v5824_v14, %v1065_v19  ;;  %v1355_v60 = vmul.f32 %v5226_v48, %v5226_v48  ;;  %v1387_v7 = vmul.f32 -2.0, %v5226_v48 }
 0x1bd   : > { %v5920_v26 = vmul.f32 %v4570_v55, %v1487_v57  ;;  %4690 = vmatprep.mubr.f32.mxu1 %v5228_v62  ;;  %v1354_v49 = vmul.f32 %v5228_v62, %v5228_v62  ;;  %v1386_v14 = vmul.f32 -2.0, %v5228_v62 }
 0x1be   : > { %v5922_v3 = vmul.f32 %v1486_v53, %v1065_v19  ;;  %v4573_v61 = vpop.f32.mrb[18].mxu0  ;;  %4691 = vmatmul.mubr.f32.gmra.mrb[12].mxu1 %v5226_v48  ;;  %v5924_v6 = vsub.f32 1.0, %v1355_v60 }
 0x1bf   : > { %v1425_v56 = vmul.f32 %v4573_v61, %v5826_v0  ;;  %v1489_v2 = vmul.f32 %v4573_v61, %v5833_v23  ;;  %v1075_v40 = vpop.f32.mrb[19].mxu0  ;;  %v5928_v50 = vsub.f32 1.0, %v1354_v49 }
 0x1c0   : > { %v1424_v5 = vmul.f32 %v5829_v20, %v1075_v40  ;;  %v1488_v10 = vmul.f32 %v5836_v24, %v1075_v40  ;;  %v1403_v13 = vmul.f32 %v1387_v7, %v5924_v6 }
 0x1c1   : > { %v5933_v47 = vmul.f32 %v4573_v61, %v1489_v2  ;;  %v1402_v17 = vmul.f32 %v1386_v14, %v5928_v50 }
 0x1c2   : > { %v5936_v11 = vmul.f32 %v1488_v10, %v1075_v40  ;;  %v4576_v21 = vpop.f32.mrb[20].mxu0 }
 0x1c3   : > { %v5230_v15 = vpop.eup %5229  ;;  %v1427_v23 = vmul.f32 %v4576_v21, %v5844_v52  ;;  %v1491_v12 = vmul.f32 %v4576_v21, %v5851_v54  ;;  %v1085_v25 = vpop.f32.mrb[21].mxu0 }
 0x1c4   : > { %v5232_v27 = vpop.eup %5231  ;;  %v1426_v29 = vmul.f32 %v5847_v42, %v1085_v25  ;;  %v1490_v24 = vmul.f32 %v5854_v59, %v1085_v25  ;;  %v1357_v32 = vmul.f32 %v5230_v15, %v5230_v15  ;;  %v1389_v41 = vmul.f32 -2.0, %v5230_v15 }
 0x1c5   : > { %v5942_v28 = vmul.f32 %v4576_v21, %v1491_v12  ;;  %4693 = vmatprep.mubr.f32.mxu1 %v5232_v27  ;;  %v1356_v34 = vmul.f32 %v5232_v27, %v5232_v27  ;;  %v1388_v59 = vmul.f32 -2.0, %v5232_v27 }
 0x1c6   : > { %v5944_v37 = vmul.f32 %v1490_v24, %v1085_v25  ;;  %v4579_v31 = vpop.f32.mrb[22].mxu0  ;;  %4694 = vmatmul.mubr.f32.gmra.mrb[14].mxu1 %v5230_v15  ;;  %v5946_v38 = vsub.f32 1.0, %v1357_v32 }
 0x1c7   : > { %v1429_v54 = vmul.f32 %v4579_v31, %v5856_v58  ;;  %v1493_v35 = vmul.f32 %v4579_v31, %v5875_v4  ;;  %v1095_v39 = vpop.f32.mrb[23].mxu0  ;;  %4696 = vmatprep.mubr.f32.mxu1 %v1422_v1  ;;  %v5950_v46 = vsub.f32 1.0, %v1356_v34 }
 0x1c8   : > { %v1428_v55 = vmul.f32 %v5868_v16, %v1095_v39  ;;  %v1492_v48 = vmul.f32 %v5884_v33, %v1095_v39  ;;  %v1405_v57 = vmul.f32 %v1389_v41, %v5946_v38 }
 0x1c9   : > { %v5955_v19 = vmul.f32 %v4579_v31, %v1493_v35  ;;  %v1404_v62 = vmul.f32 %v1388_v59, %v5950_v46 }
 0x1ca   : > { %v5958_v53 = vmul.f32 %v1492_v48, %v1095_v39  ;;  %v4582_v60 = vpop.f32.mrb[24].mxu0  ;;  %4697 = vmatmul.mubr.f32.gmra.mrb[16].mxu1 %v1423_v63 }
 0x1cb   : > { %v1431_v4 = vmul.f32 %v4582_v60, %v5892_v18  ;;  %v1495_v1 = vmul.f32 %v4582_v60, %v5899_v36  ;;  %v1105_v49 = vpop.f32.mrb[25].mxu0  ;;  %4699 = vmatprep.mubr.f32.mxu1 %v1424_v5 }
 0x1cc   : > { %v1430_v61 = vmul.f32 %v5895_v22, %v1105_v49  ;;  %v1494_v33 = vmul.f32 %v5902_v30, %v1105_v49 }
 0x1cd   : > { %v5964_v7 = vmul.f32 %v4582_v60, %v1495_v1 }
 0x1ce   : > { %v5966_v2 = vmul.f32 %v1494_v33, %v1105_v49  ;;  %v4585_v40 = vpop.f32.mrb[26].mxu0  ;;  %4700 = vmatmul.mubr.f32.gmra.mrb[18].mxu1 %v1425_v56 }
 0x1cf   : > { %v1433_v14 = vmul.f32 %v4585_v40, %v5904_v45  ;;  %v1497_v63 = vmul.f32 %v4585_v40, %v5911_v51  ;;  %v1115_v10 = vpop.f32.mrb[27].mxu0  ;;  %4702 = vmatprep.mubr.f32.mxu1 %v1426_v29 }
 0x1d0   : > { %v1432_v36 = vmul.f32 %v5907_v44, %v1115_v10  ;;  %v1496_v5 = vmul.f32 %v5914_v43, %v1115_v10 }
 0x1d1   : > { %v5972_v21 = vmul.f32 %v4585_v40, %v1497_v63  ;;  %v2306_v63 = vld [vmem:[%s7086_s7 + $0x60] sm:$0xff] }
 0x1d2   : > { %v5974_v15 = vmul.f32 %v1496_v5, %v1115_v10  ;;  %v4588_v30 = vpop.f32.mrb[28].mxu0  ;;  %4703 = vmatmul.mubr.f32.gmra.mrb[20].mxu1 %v1427_v23  ;;  %v2307_v10 = vld [vmem:[%s7086_s7 + $0x68] sm:$0xff] }
 0x1d3   : > { %v1435_v12 = vmul.f32 %v4588_v30, %v5924_v6  ;;  %v1499_v25 = vmul.f32 %v4588_v30, %v1403_v13  ;;  %v1125_v56 = vpop.f32.mrb[29].mxu0  ;;  %4705 = vmatprep.mubr.f32.mxu1 %v1428_v55 }
 0x1d4   : > { %v1434_v27 = vmul.f32 %v5928_v50, %v1125_v56  ;;  %v1498_v51 = vmul.f32 %v1402_v17, %v1125_v56 }
 0x1d5   : > { %v5978_v24 = vmul.f32 %v4588_v30, %v1499_v25 }
 0x1d6   : > { %v5980_v29 = vmul.f32 %v1498_v51, %v1125_v56  ;;  %v4591_v32 = vpop.f32.mrb[30].mxu0  ;;  %4706 = vmatmul.mubr.f32.gmra.mrb[22].mxu1 %v1429_v54  ;;  %v2308_v56 = vld [vmem:[%s7086_s7 + $0x70] sm:$0xff] }
 0x1d7   : > { %v1437_v43 = vmul.f32 %v4591_v32, %v5946_v38  ;;  %v1501_v34 = vmul.f32 %v4591_v32, %v1405_v57  ;;  %v1135_v31 = vpop.f32.mrb[31].mxu0  ;;  %4708 = vmatprep.mubr.f32.mxu1 %v1430_v61 }
 0x1d8   : > { %v1436_v23 = vmul.f32 %v5950_v46, %v1135_v31  ;;  %v1500_v41 = vmul.f32 %v1404_v62, %v1135_v31 }
 0x1d9   : > { %v5984_v13 = vmul.f32 %v4591_v32, %v1501_v34 }
 0x1da   : > { %v5986_v35 = vmul.f32 %v1500_v41, %v1135_v31  ;;  %v4594_v39 = vpop.f32.mrb[32].mxu0  ;;  %4709 = vmatmul.mubr.f32.gmra.mrb[24].mxu1 %v1431_v4 }
 0x1db   : > { %v1455_v17 = vmul.f32 %v4594_v39, %v5815_v9  ;;  %v1145_v59 = vpop.f32.mrb[33].mxu0  ;;  %4711 = vmatprep.mubr.f32.mxu1 %v1432_v36  ;;  %v5112_v36 = vpack.c.bf16 %v2307_v10, %v2306_v63 }
 0x1dc   : > { %v1454_v54 = vmul.f32 %v5818_v8, %v1145_v59 }
 0x1dd   : > { %5113 = vmatprep.subr.bf16.mxu0 %v5112_v36 }
 0x1de   : > { %v4597_v55 = vpop.f32.mrb[34].mxu0  ;;  %4712 = vmatmul.mubr.f32.gmra.mrb[26].mxu1 %v1433_v14  ;;  %5115 = vmatpush3.bf16.msra.mxu0 %v5112_v36 }
 0x1df   : > { %v1457_v48 = vmul.f32 %v4597_v55, %v5826_v0  ;;  %v1155_v57 = vpop.f32.mrb[35].mxu0  ;;  %4714 = vmatprep.mubr.f32.mxu1 %v1434_v27  ;;  %v2309_v27 = vld [vmem:[%s7086_s7 + $0x78] sm:$0xff] }
 0x1e0   : > { %v1456_v62 = vmul.f32 %v5829_v20, %v1155_v57  ;;  %v5116_v51 = vpack.c.bf16 %v2309_v27, %v2308_v56 }
 0x1e2   : > { %v4600_v60 = vpop.f32.mrb[36].mxu0  ;;  %4715 = vmatmul.mubr.f32.gmra.mrb[28].mxu1 %v1435_v12  ;;  %5117 = vmatprep.subr.bf16.mxu0 %v5116_v51 }
 0x1e3   : > { %v1459_v1 = vmul.f32 %v4600_v60, %v5844_v52  ;;  %v1165_v49 = vpop.f32.mrb[37].mxu0  ;;  %4717 = vmatprep.mubr.f32.mxu1 %v1436_v23  ;;  %5119 = vmatpush3.bf16.msra.mxu0 %v5116_v51 }
 0x1e4   : > { %v1458_v4 = vmul.f32 %v5847_v42, %v1165_v49 }
 0x1e6   : > { %v4603_v61 = vpop.f32.mrb[38].mxu0  ;;  %4718 = vmatmul.mubr.f32.gmra.mrb[30].mxu1 %v1437_v43 }
 0x1e7   : > { %v1461_v33 = vmul.f32 %v4603_v61, %v5856_v58  ;;  %v1175_v40 = vpop.f32.mrb[39].mxu0  ;;  %4720 = vmatprep.mubr.f32.mxu1 %v1454_v54 }
 0x1e8   : > { %v1460_v14 = vmul.f32 %v5868_v16, %v1175_v40 }
 0x1ea   : > { %v4606_v5 = vpop.f32.mrb[40].mxu0  ;;  %4721 = vmatmul.mubr.f32.gmra.mrb[32].mxu1 %v1455_v17 }
 0x1eb   : > { %v1463_v30 = vmul.f32 %v4606_v5, %v5892_v18  ;;  %v1185_v12 = vpop.f32.mrb[41].mxu0  ;;  %4723 = vmatprep.mubr.f32.mxu1 %v1456_v62 }
 0x1ec   : > { %v1462_v25 = vmul.f32 %v5895_v22, %v1185_v12 }
 0x1ee   : > { %v4609_v32 = vpop.f32.mrb[42].mxu0  ;;  %4724 = vmatmul.mubr.f32.gmra.mrb[34].mxu1 %v1457_v48 }
 0x1ef   : > { %v1465_v43 = vmul.f32 %v4609_v32, %v5904_v45  ;;  %v1195_v34 = vpop.f32.mrb[43].mxu0  ;;  %4726 = vmatprep.mubr.f32.mxu1 %v1458_v4 }
 0x1f0   : > { %v1464_v31 = vmul.f32 %v5907_v44, %v1195_v34 }
 0x1f2   : > { %v4612_v23 = vpop.f32.mrb[44].mxu0  ;;  %4727 = vmatmul.mubr.f32.gmra.mrb[36].mxu1 %v1459_v1 }
 0x1f3   : > { %v1467_v41 = vmul.f32 %v4612_v23, %v5924_v6  ;;  %v1205_v39 = vpop.f32.mrb[45].mxu0  ;;  %4729 = vmatprep.mubr.f32.mxu1 %v1460_v14 }
 0x1f4   : > { %v1466_v17 = vmul.f32 %v5928_v50, %v1205_v39 }
 0x1f6   : > { %v4615_v59 = vpop.f32.mrb[46].mxu0  ;;  %4730 = vmatmul.mubr.f32.gmra.mrb[38].mxu1 %v1461_v33 }
 0x1f7   : > { %v1469_v54 = vmul.f32 %v4615_v59, %v5946_v38  ;;  %v1215_v55 = vpop.f32.mrb[47].mxu0  ;;  %4732 = vmatprep.mubr.f32.mxu1 %v1462_v25 }
 0x1f8   : > { %v1468_v48 = vmul.f32 %v5950_v46, %v1215_v55  ;;  %v3022_v55 = vld [vmem:[%s7088_s9] sm:$0xff] }
 0x1fa   : > { %v4618_v57 = vpop.f32.mrb[48].mxu0  ;;  %4733 = vmatmul.mubr.f32.gmra.mrb[40].mxu1 %v1463_v30 }
 0x1fb   : > { %v1519_v62 = vmul.f32 %v4618_v57, %v5815_v9  ;;  %v1225_v60 = vpop.f32.mrb[49].mxu0  ;;  %4735 = vmatprep.mubr.f32.mxu1 %v1464_v31 }
 0x1fc   : > { %v1518_v1 = vmul.f32 %v5818_v8, %v1225_v60 }
 0x1fd   : > { %v1535_v49 = vadd.f32 %v1519_v62, %v5920_v26 }
 0x1fe   : > { %v1534_v4 = vadd.f32 %v1518_v1, %v5922_v3  ;;  %v4621_v61 = vpop.f32.mrb[50].mxu0  ;;  %4736 = vmatmul.mubr.f32.gmra.mrb[42].mxu1 %v1465_v43 }
 0x1ff   : > { %v1521_v33 = vmul.f32 %v4621_v61, %v5826_v0  ;;  %v1235_v40 = vpop.f32.mrb[51].mxu0  ;;  %4738 = vmatprep.mubr.f32.mxu1 %v1466_v17 }
 0x200   : > { %v1520_v14 = vmul.f32 %v5829_v20, %v1235_v40 }
 0x201   : > { %v1537_v63 = vadd.f32 %v1521_v33, %v5933_v47 }
 0x202   : > { %v1536_v9 = vadd.f32 %v1520_v14, %v5936_v11  ;;  %v4624_v10 = vpop.f32.mrb[52].mxu0  ;;  %4739 = vmatmul.mubr.f32.gmra.mrb[44].mxu1 %v1467_v41 }
 0x203   : > { %v1523_v8 = vmul.f32 %v4624_v10, %v5844_v52  ;;  %v1245_v36 = vpop.f32.mrb[53].mxu0  ;;  %4741 = vmatprep.mubr.f32.mxu1 %v1468_v48  ;;  %v3023_v48 = vld [vmem:[%s7088_s9 + $0x8] sm:$0xff] }
 0x204   : > { %v1522_v26 = vmul.f32 %v5847_v42, %v1245_v36 }
 0x205   : > { %v1539_v3 = vadd.f32 %v1523_v8, %v5942_v28 }
 0x206   : > { %v1538_v0 = vadd.f32 %v1522_v26, %v5944_v37  ;;  %v4627_v5 = vpop.f32.mrb[54].mxu0  ;;  %4742 = vmatmul.mubr.f32.gmra.mrb[46].mxu1 %v1469_v54 }
 0x207   : > { %v1525_v20 = vmul.f32 %v4627_v5, %v5856_v58  ;;  %v1255_v30 = vpop.f32.mrb[55].mxu0  ;;  %4744 = vmatprep.mubr.f32.mxu1 %v1534_v4 }
 0x208   : > { %v1524_v47 = vmul.f32 %v5868_v16, %v1255_v30 }
 0x209   : > { %v1541_v11 = vadd.f32 %v1525_v20, %v5955_v19 }
 0x20a   : > { %v1540_v52 = vadd.f32 %v1524_v47, %v5958_v53  ;;  %v4630_v12 = vpop.f32.mrb[56].mxu0  ;;  %4745 = vmatmul.mubr.f32.gmra.mrb[48].mxu1 %v1535_v49  ;;  %v5120_v49 = vpack.c.bf16 %v3023_v48, %v3022_v55  ;;  %v3031_v55 = vld [vmem:[%s7088_s9 + $0x48] sm:$0xff] }
 0x20b   : > { %v1527_v42 = vmul.f32 %v4630_v12, %v5892_v18  ;;  %v1265_v25 = vpop.f32.mrb[57].mxu0  ;;  %4747 = vmatprep.mubr.f32.mxu1 %v1536_v9 }
 0x20c   : > { %v1526_v28 = vmul.f32 %v5895_v22, %v1265_v25  ;;  %5121 = vmatprep.subr.bf16.mxu1 %v5120_v49  ;;  %v3025_v25 = vld [vmem:[%s7088_s9 + $0x18] sm:$0xff] }
 0x20d   : > { %v1543_v37 = vadd.f32 %v1527_v42, %v5964_v7  ;;  %5123 = vmatpush3.bf16.msra.mxu1 %v5120_v49  ;;  %v3024_v42 = vld [vmem:[%s7088_s9 + $0x10] sm:$0xff] }
 0x20e   : > { %v1542_v58 = vadd.f32 %v1526_v28, %v5966_v2  ;;  %v4633_v56 = vpop.f32.mrb[58].mxu0  ;;  %4748 = vmatmul.mubr.f32.gmra.mrb[50].mxu1 %v1537_v63 }
 0x20f   : > { %v1529_v16 = vmul.f32 %v4633_v56, %v5904_v45  ;;  %v1275_v27 = vpop.f32.mrb[59].mxu0  ;;  %4750 = vmatprep.mubr.f32.mxu1 %v1538_v0 }
 0x210   : > { %v1528_v19 = vmul.f32 %v5907_v44, %v1275_v27 }
 0x211   : > { %v1545_v53 = vadd.f32 %v1529_v16, %v5972_v21 }
 0x212   : > { %v1544_v18 = vadd.f32 %v1528_v19, %v5974_v15  ;;  %v4636_v51 = vpop.f32.mrb[60].mxu0  ;;  %4751 = vmatmul.mubr.f32.gmra.mrb[52].mxu1 %v1539_v3 }
 0x213   : > { %v1531_v22 = vmul.f32 %v4636_v51, %v5924_v6  ;;  %v1285_v32 = vpop.f32.mrb[61].mxu0  ;;  %4753 = vmatprep.mubr.f32.mxu1 %v1540_v52 }
 0x214   : > { %v1530_v7 = vmul.f32 %v5928_v50, %v1285_v32  ;;  %v6051_v50 = vld [vmem:[%s7085_s6] ss:$0 sm:$0xff] }
 0x215   : > { %v1547_v2 = vadd.f32 %v1531_v22, %v5978_v24 }
 0x216   : > { %v1546_v45 = vadd.f32 %v1530_v7, %v5980_v29  ;;  %v4639_v43 = vpop.f32.mrb[62].mxu0  ;;  %4754 = vmatmul.mubr.f32.gmra.mrb[54].mxu1 %v1541_v11 }
 0x217   : > { %v1533_v44 = vmul.f32 %v4639_v43, %v5946_v38  ;;  %v1295_v34 = vpop.f32.mrb[63].mxu0  ;;  %4756 = vmatprep.mubr.f32.mxu1 %v1542_v58  ;;  %v5124_v58 = vpack.c.bf16 %v3025_v25, %v3024_v42 }
 0x218   : > { %v1532_v21 = vmul.f32 %v5950_v46, %v1295_v34 }
 0x219   : > { %v1549_v15 = vadd.f32 %v1533_v44, %v5984_v13  ;;  %5125 = vmatprep.subr.bf16.mxu1 %v5124_v58 }
 0x21a   : > { %v1548_v6 = vadd.f32 %v1532_v21, %v5986_v35  ;;  %4757 = vmatmul.mubr.f32.gmra.mrb[56].mxu1 %v1543_v37 }
 0x21b   : > { %4759 = vmatprep.mubr.f32.mxu1 %v1544_v18  ;;  %5127 = vmatpush3.bf16.msra.mxu1 %v5124_v58 }
 0x21e   : > { %4760 = vmatmul.mubr.f32.gmra.mrb[58].mxu1 %v1545_v53 }
 0x21f   : > { %4762 = vmatprep.mubr.f32.mxu1 %v1546_v45 }
 0x222   : > { %4763 = vmatmul.mubr.f32.gmra.mrb[60].mxu1 %v1547_v2 }
 0x223   : > { %4765 = vmatprep.mubr.f32.mxu1 %v1548_v6 }
 0x226   : > { %4766 = vmatmul.mubr.f32.gmra.mrb[62].mxu1 %v1549_v15 }
 0x262   : > { %v4674_v38 = vpop.f32.mrb[0].mxu1 }
 0x263   : > { %v2039_v24 = vadd.f32 %v4674_v38, %v6051_v50  ;;  %v1713_v46 = vpop.f32.mrb[1].mxu1  ;;  %v3026_v38 = vld [vmem:[%s7088_s9 + $0x20] sm:$0xff] }
 0x264   : > { %v2038_v29 = vadd.f32 %v6051_v50, %v1713_v46  ;;  %v3028_v46 = vld [vmem:[%s7088_s9 + $0x30] sm:$0xff] }
 0x265   : > { %5233 = vtanh.f32 %v2039_v24  ;;  %v3027_v24 = vld [vmem:[%s7088_s9 + $0x28] sm:$0xff] }
 0x266   : > { %5235 = vtanh.f32 %v2038_v29 }
 0x269   : > { %v4677_v13 = vpop.f32.mrb[2].mxu1 }
 0x26a   : > { %v2041_v35 = vadd.f32 %v4677_v13, %v6051_v50  ;;  %v1723_v31 = vpop.f32.mrb[3].mxu1 }
 0x26b   : > { %v2040_v23 = vadd.f32 %v6051_v50, %v1723_v31 }
 0x26c   : > { %5237 = vtanh.f32 %v2041_v35 }
 0x26d   : > { %5239 = vtanh.f32 %v2040_v23  ;;  %v5128_v23 = vpack.c.bf16 %v3027_v24, %v3026_v38 }
 0x26f   : > { %v5234_v41 = vpop.eup %5233  ;;  %5129 = vmatprep.subr.bf16.mxu1 %v5128_v23 }
 0x270   : > { %v5236_v39 = vpop.eup %5235  ;;  %v2071_v17 = vmul.f32 %v5234_v41, %v5234_v41  ;;  %v2103_v1 = vmul.f32 -2.0, %v5234_v41  ;;  %5131 = vmatpush3.bf16.msra.mxu1 %v5128_v23 }
 0x271   : > { %4800 = vmatprep.mubr.f32.mxu0 %v5236_v39  ;;  %v4680_v59 = vpop.f32.mrb[4].mxu1  ;;  %v2070_v54 = vmul.f32 %v5236_v39, %v5236_v39  ;;  %v2102_v33 = vmul.f32 -2.0, %v5236_v39 }
 0x272   : > { %v2043_v57 = vadd.f32 %v4680_v59, %v6051_v50  ;;  %4801 = vmatmul.mubr.f32.vlgmr.msra.gmra.mrb[64].mxu0 %v5234_v41  ;;  %v1733_v62 = vpop.f32.mrb[5].mxu1  ;;  %v6064_v60 = vsub.f32 1.0, %v2071_v17  ;;  %v3029_v41 = vld [vmem:[%s7088_s9 + $0x38] sm:$0xff] }
 0x273   : > { %v2042_v4 = vadd.f32 %v6051_v50, %v1733_v62  ;;  %v6067_v61 = vsub.f32 1.0, %v2070_v54  ;;  %v5132_v59 = vpack.c.bf16 %v3029_v41, %v3028_v46  ;;  %v3030_v54 = vld [vmem:[%s7088_s9 + $0x40] sm:$0xff] }
 0x274   : > { %5241 = vtanh.f32 %v2043_v57  ;;  %v6070_v40 = vmul.f32 %v2103_v1, %v6064_v60  ;;  %v5136_v62 = vpack.c.bf16 %v3031_v55, %v3030_v54 }
 0x275   : > { %5243 = vtanh.f32 %v2042_v4  ;;  %v6073_v14 = vmul.f32 %v2102_v33, %v6067_v61  ;;  %5133 = vmatprep.subr.bf16.mxu1 %v5132_v59  ;;  %v3032_v4 = vld [vmem:[%s7088_s9 + $0x50] sm:$0xff]  ;;  %v3033_v33 = vld [vmem:[%s7088_s9 + $0x58] sm:$0xff] }
 0x276   : > { %v5238_v63 = vpop.eup %5237  ;;  %5135 = vmatpush3.bf16.msra.mxu1 %v5132_v59 }
 0x277   : > { %v5240_v9 = vpop.eup %5239  ;;  %v2073_v10 = vmul.f32 %v5238_v63, %v5238_v63  ;;  %v2105_v3 = vmul.f32 -2.0, %v5238_v63  ;;  %5137 = vmatprep.subr.bf16.mxu1 %v5136_v62 }
 0x278   : > { %4803 = vmatprep.mubr.f32.mxu0 %v5240_v9  ;;  %v2072_v8 = vmul.f32 %v5240_v9, %v5240_v9  ;;  %v2104_v30 = vmul.f32 -2.0, %v5240_v9 }
 0x279   : > { %v4683_v36 = vpop.f32.mrb[6].mxu1  ;;  %4804 = vmatmul.mubr.f32.gmra.mrb[66].mxu0 %v5238_v63  ;;  %v6075_v26 = vsub.f32 1.0, %v2073_v10 }
 0x27a   : > { %v2045_v0 = vadd.f32 %v4683_v36, %v6051_v50  ;;  %v1743_v5 = vpop.f32.mrb[7].mxu1  ;;  %v6078_v20 = vsub.f32 1.0, %v2072_v8  ;;  %5139 = vmatpush3.bf16.msra.mxu1 %v5136_v62 }
 0x27b   : > { %v2044_v47 = vadd.f32 %v6051_v50, %v1743_v5  ;;  %v6082_v11 = vmul.f32 %v2105_v3, %v6075_v26 }
 0x27c   : > { %5245 = vtanh.f32 %v2045_v0  ;;  %v6085_v52 = vmul.f32 %v2104_v30, %v6078_v20  ;;  %v5140_v30 = vpack.c.bf16 %v3033_v33, %v3032_v4 }
 0x27d   : > { %5247 = vtanh.f32 %v2044_v47 }
 0x27e   : > { %v5242_v12 = vpop.eup %5241  ;;  %5141 = vmatprep.subr.bf16.mxu1 %v5140_v30 }
 0x27f   : > { %v5244_v28 = vpop.eup %5243  ;;  %v2075_v37 = vmul.f32 %v5242_v12, %v5242_v12  ;;  %v2107_v19 = vmul.f32 -2.0, %v5242_v12  ;;  %5143 = vmatpush3.bf16.msra.mxu1 %v5140_v30 }
 0x280   : > { %4806 = vmatprep.mubr.f32.mxu0 %v5244_v28  ;;  %v2074_v56 = vmul.f32 %v5244_v28, %v5244_v28  ;;  %v2106_v22 = vmul.f32 -2.0, %v5244_v28 }
 0x281   : > { %v4686_v16 = vpop.f32.mrb[8].mxu1  ;;  %4807 = vmatmul.mubr.f32.gmra.mrb[68].mxu0 %v5242_v12  ;;  %v6093_v27 = vsub.f32 1.0, %v2075_v37 }
 0x282   : > { %v2047_v53 = vadd.f32 %v4686_v16, %v6051_v50  ;;  %v1753_v18 = vpop.f32.mrb[9].mxu1  ;;  %v6096_v51 = vsub.f32 1.0, %v2074_v56 }
 0x283   : > { %v2046_v32 = vadd.f32 %v6051_v50, %v1753_v18  ;;  %v6100_v7 = vmul.f32 %v2107_v19, %v6093_v27 }
 0x284   : > { %5249 = vtanh.f32 %v2047_v53  ;;  %v6103_v2 = vmul.f32 %v2106_v22, %v6096_v51 }
 0x285   : > { %5251 = vtanh.f32 %v2046_v32 }
 0x286   : > { %v5246_v45 = vpop.eup %5245 }
 0x287   : > { %v5248_v43 = vpop.eup %5247  ;;  %v2077_v44 = vmul.f32 %v5246_v45, %v5246_v45  ;;  %v2109_v6 = vmul.f32 -2.0, %v5246_v45 }
 0x288   : > { %4809 = vmatprep.mubr.f32.mxu0 %v5248_v43  ;;  %v2076_v34 = vmul.f32 %v5248_v43, %v5248_v43  ;;  %v2108_v31 = vmul.f32 -2.0, %v5248_v43 }
 0x289   : > { %v4689_v21 = vpop.f32.mrb[10].mxu1  ;;  %4810 = vmatmul.mubr.f32.gmra.mrb[70].mxu0 %v5246_v45  ;;  %v6105_v15 = vsub.f32 1.0, %v2077_v44 }
 0x28a   : > { %v2049_v29 = vadd.f32 %v4689_v21, %v6051_v50  ;;  %v1763_v13 = vpop.f32.mrb[11].mxu1  ;;  %v6117_v35 = vsub.f32 1.0, %v2076_v34 }
 0x28b   : > { %v2048_v39 = vadd.f32 %v6051_v50, %v1763_v13  ;;  %v6124_v17 = vmul.f32 %v2109_v6, %v6105_v15 }
 0x28c   : > { %5253 = vtanh.f32 %v2049_v29  ;;  %v6133_v48 = vmul.f32 %v2108_v31, %v6117_v35 }
 0x28d   : > { %5255 = vtanh.f32 %v2048_v39 }
 0x28e   : > { %v5250_v57 = vpop.eup %5249 }
 0x28f   : > { %v5252_v1 = vpop.eup %5251  ;;  %v2079_v49 = vmul.f32 %v5250_v57, %v5250_v57  ;;  %v2111_v8 = vmul.f32 -2.0, %v5250_v57 }
 0x290   : > { %4812 = vmatprep.mubr.f32.mxu0 %v5252_v1  ;;  %v2078_v63 = vmul.f32 %v5252_v1, %v5252_v1  ;;  %v2110_v5 = vmul.f32 -2.0, %v5252_v1 }
 0x291   : > { %v4692_v9 = vpop.f32.mrb[12].mxu1  ;;  %4813 = vmatmul.mubr.f32.gmra.mrb[72].mxu0 %v5250_v57  ;;  %v6141_v10 = vsub.f32 1.0, %v2079_v49 }
 0x292   : > { %v2051_v36 = vadd.f32 %v4692_v9, %v6051_v50  ;;  %v1773_v3 = vpop.f32.mrb[13].mxu1  ;;  %v6144_v0 = vsub.f32 1.0, %v2078_v63 }
 0x293   : > { %v2050_v47 = vadd.f32 %v6051_v50, %v1773_v3  ;;  %v6148_v12 = vmul.f32 %v2111_v8, %v6141_v10 }
 0x294   : > { %5257 = vtanh.f32 %v2051_v36  ;;  %v6151_v42 = vmul.f32 %v2110_v5, %v6144_v0 }
 0x295   : > { %5259 = vtanh.f32 %v2050_v47 }
 0x296   : > { %v5254_v25 = vpop.eup %5253 }
 0x297   : > { %v5256_v28 = vpop.eup %5255  ;;  %v2081_v37 = vmul.f32 %v5254_v25, %v5254_v25  ;;  %v2113_v19 = vmul.f32 -2.0, %v5254_v25 }
 0x298   : > { %4815 = vmatprep.mubr.f32.mxu0 %v5256_v28  ;;  %v2080_v58 = vmul.f32 %v5256_v28, %v5256_v28  ;;  %v2112_v32 = vmul.f32 -2.0, %v5256_v28 }
 0x299   : > { %v4695_v56 = vpop.f32.mrb[14].mxu1  ;;  %4816 = vmatmul.mubr.f32.gmra.mrb[74].mxu0 %v5254_v25  ;;  %v6153_v16 = vsub.f32 1.0, %v2081_v37 }
 0x29a   : > { %v2053_v53 = vadd.f32 %v4695_v56, %v6051_v50  ;;  %v1783_v18 = vpop.f32.mrb[15].mxu1  ;;  %v6156_v22 = vsub.f32 1.0, %v2080_v58 }
 0x29b   : > { %v2052_v45 = vadd.f32 %v6051_v50, %v1783_v18  ;;  %v6160_v43 = vmul.f32 %v2113_v19, %v6153_v16 }
 0x29c   : > { %5261 = vtanh.f32 %v2053_v53  ;;  %v6163_v44 = vmul.f32 %v2112_v32, %v6156_v22 }
 0x29d   : > { %5263 = vtanh.f32 %v2052_v45  ;;  %v4698_v34 = vpop.f32.mrb[16].mxu1 }
 0x29e   : > { %v5258_v21 = vpop.eup %5257  ;;  %v2151_v6 = vmul.f32 %v4698_v34, %v6064_v60  ;;  %v2215_v38 = vmul.f32 %v4698_v34, %v6070_v40  ;;  %v1793_v24 = vpop.f32.mrb[17].mxu1 }
 0x29f   : > { %v5260_v46 = vpop.eup %5259  ;;  %v2150_v29 = vmul.f32 %v6067_v61, %v1793_v24  ;;  %v2214_v50 = vmul.f32 %v6073_v14, %v1793_v24  ;;  %v2083_v13 = vmul.f32 %v5258_v21, %v5258_v21  ;;  %v2115_v54 = vmul.f32 -2.0, %v5258_v21 }
 0x2a0   : > { %v6169_v31 = vmul.f32 %v4698_v34, %v2215_v38  ;;  %4818 = vmatprep.mubr.f32.mxu0 %v5260_v46  ;;  %v2082_v23 = vmul.f32 %v5260_v46, %v5260_v46  ;;  %v2114_v14 = vmul.f32 -2.0, %v5260_v46 }
 0x2a1   : > { %v6171_v41 = vmul.f32 %v2214_v50, %v1793_v24  ;;  %v4701_v39 = vpop.f32.mrb[18].mxu1  ;;  %4819 = vmatmul.mubr.f32.gmra.mrb[76].mxu0 %v5258_v21  ;;  %v6173_v59 = vsub.f32 1.0, %v2083_v13 }
 0x2a2   : > { %v2153_v40 = vmul.f32 %v4701_v39, %v6075_v26  ;;  %v2217_v55 = vmul.f32 %v4701_v39, %v6082_v11  ;;  %v1803_v57 = vpop.f32.mrb[19].mxu1  ;;  %v6177_v62 = vsub.f32 1.0, %v2082_v23 }
 0x2a3   : > { %v2152_v1 = vmul.f32 %v6078_v20, %v1803_v57  ;;  %v2216_v49 = vmul.f32 %v6085_v52, %v1803_v57  ;;  %v2131_v4 = vmul.f32 %v2115_v54, %v6173_v59 }
 0x2a4   : > { %v6182_v33 = vmul.f32 %v4701_v39, %v2217_v55  ;;  %v2130_v63 = vmul.f32 %v2114_v14, %v6177_v62 }
 0x2a5   : > { %v6185_v9 = vmul.f32 %v2216_v49, %v1803_v57  ;;  %v4704_v8 = vpop.f32.mrb[20].mxu1 }
 0x2a6   : > { %v5262_v36 = vpop.eup %5261  ;;  %v2155_v11 = vmul.f32 %v4704_v8, %v6093_v27  ;;  %v2219_v3 = vmul.f32 %v4704_v8, %v6100_v7  ;;  %v1813_v5 = vpop.f32.mrb[21].mxu1 }
 0x2a7   : > { %v5264_v30 = vpop.eup %5263  ;;  %v2154_v47 = vmul.f32 %v6096_v51, %v1813_v5  ;;  %v2218_v52 = vmul.f32 %v6103_v2, %v1813_v5  ;;  %v2085_v25 = vmul.f32 %v5262_v36, %v5262_v36  ;;  %v2117_v53 = vmul.f32 -2.0, %v5262_v36 }
 0x2a8   : > { %v6191_v28 = vmul.f32 %v4704_v8, %v2219_v3  ;;  %4821 = vmatprep.mubr.f32.mxu0 %v5264_v30  ;;  %v2084_v37 = vmul.f32 %v5264_v30, %v5264_v30  ;;  %v2116_v2 = vmul.f32 -2.0, %v5264_v30 }
 0x2a9   : > { %v6193_v58 = vmul.f32 %v2218_v52, %v1813_v5  ;;  %v4707_v56 = vpop.f32.mrb[22].mxu1  ;;  %4822 = vmatmul.mubr.f32.gmra.mrb[78].mxu0 %v5262_v36  ;;  %v6195_v19 = vsub.f32 1.0, %v2085_v25 }
 0x2aa   : > { %v2157_v7 = vmul.f32 %v4707_v56, %v6105_v15  ;;  %v2221_v18 = vmul.f32 %v4707_v56, %v6124_v17  ;;  %v1823_v32 = vpop.f32.mrb[23].mxu1  ;;  %4824 = vmatprep.mubr.f32.mxu0 %v2150_v29  ;;  %v6199_v45 = vsub.f32 1.0, %v2084_v37 }
 0x2ab   : > { %v2156_v34 = vmul.f32 %v6117_v35, %v1823_v32  ;;  %v2220_v21 = vmul.f32 %v6133_v48, %v1823_v32  ;;  %v2133_v38 = vmul.f32 %v2117_v53, %v6195_v19 }
 0x2ac   : > { %v6204_v24 = vmul.f32 %v4707_v56, %v2221_v18  ;;  %v2132_v46 = vmul.f32 %v2116_v2, %v6199_v45 }
 0x2ad   : > { %v6207_v50 = vmul.f32 %v2220_v21, %v1823_v32  ;;  %v4710_v13 = vpop.f32.mrb[24].mxu1  ;;  %4825 = vmatmul.mubr.f32.gmra.mrb[80].mxu0 %v2151_v6 }
 0x2ae   : > { %v2159_v17 = vmul.f32 %v4710_v13, %v6141_v10  ;;  %v2223_v29 = vmul.f32 %v4710_v13, %v6148_v12  ;;  %v1833_v23 = vpop.f32.mrb[25].mxu1  ;;  %4827 = vmatprep.mubr.f32.mxu0 %v2152_v1 }
 0x2af   : > { %v2158_v39 = vmul.f32 %v6144_v0, %v1833_v23  ;;  %v2222_v48 = vmul.f32 %v6151_v42, %v1833_v23 }
 0x2b0   : > { %v6213_v54 = vmul.f32 %v4710_v13, %v2223_v29 }
 0x2b1   : > { %v6215_v55 = vmul.f32 %v2222_v48, %v1833_v23  ;;  %v4713_v57 = vpop.f32.mrb[26].mxu1  ;;  %4828 = vmatmul.mubr.f32.gmra.mrb[82].mxu0 %v2153_v40 }
 0x2b2   : > { %v2161_v14 = vmul.f32 %v4713_v57, %v6153_v16  ;;  %v2225_v6 = vmul.f32 %v4713_v57, %v6160_v43  ;;  %v1843_v49 = vpop.f32.mrb[27].mxu1  ;;  %4830 = vmatprep.mubr.f32.mxu0 %v2154_v47 }
 0x2b3   : > { %v2160_v12 = vmul.f32 %v6156_v22, %v1843_v49  ;;  %v2224_v1 = vmul.f32 %v6163_v44, %v1843_v49 }
 0x2b4   : > { %v6221_v8 = vmul.f32 %v4713_v57, %v2225_v6  ;;  %v3034_v6 = vld [vmem:[%s7088_s9 + $0x60] sm:$0xff] }
 0x2b5   : > { %v6223_v36 = vmul.f32 %v2224_v1, %v1843_v49  ;;  %v4716_v42 = vpop.f32.mrb[28].mxu1  ;;  %4831 = vmatmul.mubr.f32.gmra.mrb[84].mxu0 %v2155_v11  ;;  %v3035_v49 = vld [vmem:[%s7088_s9 + $0x68] sm:$0xff] }
 0x2b6   : > { %v2163_v3 = vmul.f32 %v4716_v42, %v6173_v59  ;;  %v2227_v5 = vmul.f32 %v4716_v42, %v2131_v4  ;;  %v1853_v40 = vpop.f32.mrb[29].mxu1  ;;  %4833 = vmatprep.mubr.f32.mxu0 %v2156_v34 }
 0x2b7   : > { %v2162_v30 = vmul.f32 %v6177_v62, %v1853_v40  ;;  %v2226_v43 = vmul.f32 %v2130_v63, %v1853_v40 }
 0x2b8   : > { %v6227_v52 = vmul.f32 %v4716_v42, %v2227_v5 }
 0x2b9   : > { %v6229_v47 = vmul.f32 %v2226_v43, %v1853_v40  ;;  %v4719_v25 = vpop.f32.mrb[30].mxu1  ;;  %4834 = vmatmul.mubr.f32.gmra.mrb[86].mxu0 %v2157_v7  ;;  %v3036_v40 = vld [vmem:[%s7088_s9 + $0x70] sm:$0xff] }
 0x2ba   : > { %v2165_v44 = vmul.f32 %v4719_v25, %v6195_v19  ;;  %v2229_v37 = vmul.f32 %v4719_v25, %v2133_v38  ;;  %v1863_v56 = vpop.f32.mrb[31].mxu1  ;;  %4836 = vmatprep.mubr.f32.mxu0 %v2158_v39 }
 0x2bb   : > { %v2164_v11 = vmul.f32 %v6199_v45, %v1863_v56  ;;  %v2228_v53 = vmul.f32 %v2132_v46, %v1863_v56 }
 0x2bc   : > { %v6233_v4 = vmul.f32 %v4719_v25, %v2229_v37 }
 0x2bd   : > { %v6235_v18 = vmul.f32 %v2228_v53, %v1863_v56  ;;  %v4722_v32 = vpop.f32.mrb[32].mxu1  ;;  %4837 = vmatmul.mubr.f32.gmra.mrb[88].mxu0 %v2159_v17 }
 0x2be   : > { %v2183_v63 = vmul.f32 %v4722_v32, %v6064_v60  ;;  %v1873_v2 = vpop.f32.mrb[33].mxu1  ;;  %4839 = vmatprep.mubr.f32.mxu0 %v2160_v12  ;;  %v5144_v12 = vpack.c.bf16 %v3035_v49, %v3034_v6 }
 0x2bf   : > { %v2182_v7 = vmul.f32 %v6067_v61, %v1873_v2 }
 0x2c0   : > { %5145 = vmatprep.subr.bf16.mxu1 %v5144_v12 }
 0x2c1   : > { %v4725_v34 = vpop.f32.mrb[34].mxu1  ;;  %4840 = vmatmul.mubr.f32.gmra.mrb[90].mxu0 %v2161_v14  ;;  %5147 = vmatpush3.bf16.msra.mxu1 %v5144_v12 }
 0x2c2   : > { %v2185_v21 = vmul.f32 %v4725_v34, %v6075_v26  ;;  %v1883_v38 = vpop.f32.mrb[35].mxu1  ;;  %4842 = vmatprep.mubr.f32.mxu0 %v2162_v30  ;;  %v3037_v30 = vld [vmem:[%s7088_s9 + $0x78] sm:$0xff] }
 0x2c3   : > { %v2184_v46 = vmul.f32 %v6078_v20, %v1883_v38  ;;  %v5148_v43 = vpack.c.bf16 %v3037_v30, %v3036_v40 }
 0x2c5   : > { %v4728_v13 = vpop.f32.mrb[36].mxu1  ;;  %4843 = vmatmul.mubr.f32.gmra.mrb[92].mxu0 %v2163_v3  ;;  %5149 = vmatprep.subr.bf16.mxu1 %v5148_v43 }
 0x2c6   : > { %v2187_v29 = vmul.f32 %v4728_v13, %v6093_v27  ;;  %v1893_v23 = vpop.f32.mrb[37].mxu1  ;;  %4845 = vmatprep.mubr.f32.mxu0 %v2164_v11  ;;  %5151 = vmatpush3.bf16.msra.mxu1 %v5148_v43 }
 0x2c7   : > { %v2186_v17 = vmul.f32 %v6096_v51, %v1893_v23 }
 0x2c9   : > { %v4731_v39 = vpop.f32.mrb[38].mxu1  ;;  %4846 = vmatmul.mubr.f32.gmra.mrb[94].mxu0 %v2165_v44 }
 0x2ca   : > { %v2189_v48 = vmul.f32 %v4731_v39, %v6105_v15  ;;  %v1903_v57 = vpop.f32.mrb[39].mxu1  ;;  %4848 = vmatprep.mubr.f32.mxu0 %v2182_v7 }
 0x2cb   : > { %v2188_v14 = vmul.f32 %v6117_v35, %v1903_v57 }
 0x2cd   : > { %v4734_v1 = vpop.f32.mrb[40].mxu1  ;;  %4849 = vmatmul.mubr.f32.gmra.mrb[96].mxu0 %v2183_v63 }
 0x2ce   : > { %v2191_v42 = vmul.f32 %v4734_v1, %v6141_v10  ;;  %v1913_v3 = vpop.f32.mrb[41].mxu1  ;;  %4851 = vmatprep.mubr.f32.mxu0 %v2184_v46 }
 0x2cf   : > { %v2190_v5 = vmul.f32 %v6144_v0, %v1913_v3 }
 0x2d1   : > { %v4737_v25 = vpop.f32.mrb[42].mxu1  ;;  %4852 = vmatmul.mubr.f32.gmra.mrb[98].mxu0 %v2185_v21 }
 0x2d2   : > { %v2193_v44 = vmul.f32 %v4737_v25, %v6153_v16  ;;  %v1923_v37 = vpop.f32.mrb[43].mxu1  ;;  %4854 = vmatprep.mubr.f32.mxu0 %v2186_v17 }
 0x2d3   : > { %v2192_v56 = vmul.f32 %v6156_v22, %v1923_v37 }
 0x2d5   : > { %v4740_v11 = vpop.f32.mrb[44].mxu1  ;;  %4855 = vmatmul.mubr.f32.gmra.mrb[100].mxu0 %v2187_v29 }
 0x2d6   : > { %v2195_v53 = vmul.f32 %v4740_v11, %v6173_v59  ;;  %v1933_v32 = vpop.f32.mrb[45].mxu1  ;;  %4857 = vmatprep.mubr.f32.mxu0 %v2188_v14 }
 0x2d7   : > { %v2194_v63 = vmul.f32 %v6177_v62, %v1933_v32 }
 0x2d9   : > { %v4743_v2 = vpop.f32.mrb[46].mxu1  ;;  %4858 = vmatmul.mubr.f32.gmra.mrb[102].mxu0 %v2189_v48 }
 0x2da   : > { %v2197_v7 = vmul.f32 %v4743_v2, %v6195_v19  ;;  %v1943_v34 = vpop.f32.mrb[47].mxu1  ;;  %4860 = vmatprep.mubr.f32.mxu0 %v2190_v5 }
 0x2db   : > { %v2196_v21 = vmul.f32 %v6199_v45, %v1943_v34 }
 0x2dd   : > { %v4746_v38 = vpop.f32.mrb[48].mxu1  ;;  %4861 = vmatmul.mubr.f32.gmra.mrb[104].mxu0 %v2191_v42 }
 0x2de   : > { %v2247_v46 = vmul.f32 %v4746_v38, %v6064_v60  ;;  %v1953_v13 = vpop.f32.mrb[49].mxu1  ;;  %4863 = vmatprep.mubr.f32.mxu0 %v2192_v56 }
 0x2df   : > { %v2246_v29 = vmul.f32 %v6067_v61, %v1953_v13 }
 0x2e0   : > { %v2263_v23 = vadd.f32 %v2247_v46, %v6169_v31 }
 0x2e1   : > { %v2262_v17 = vadd.f32 %v2246_v29, %v6171_v41  ;;  %v4749_v39 = vpop.f32.mrb[50].mxu1  ;;  %4864 = vmatmul.mubr.f32.gmra.mrb[106].mxu0 %v2193_v44 }
 0x2e2   : > { %v2249_v48 = vmul.f32 %v4749_v39, %v6075_v26  ;;  %v1963_v57 = vpop.f32.mrb[51].mxu1  ;;  %4866 = vmatprep.mubr.f32.mxu0 %v2194_v63 }
 0x2e3   : > { %v2248_v14 = vmul.f32 %v6078_v20, %v1963_v57 }
 0x2e4   : > { %v2265_v6 = vadd.f32 %v2249_v48, %v6182_v33 }
 0x2e5   : > { %v2264_v60 = vadd.f32 %v2248_v14, %v6185_v9  ;;  %v4752_v49 = vpop.f32.mrb[52].mxu1  ;;  %4867 = vmatmul.mubr.f32.gmra.mrb[108].mxu0 %v2195_v53 }
 0x2e6   : > { %v2251_v61 = vmul.f32 %v4752_v49, %v6093_v27  ;;  %v1973_v12 = vpop.f32.mrb[53].mxu1  ;;  %4869 = vmatprep.mubr.f32.mxu0 %v2196_v21 }
 0x2e7   : > { %v2250_v31 = vmul.f32 %v6096_v51, %v1973_v12 }
 0x2e8   : > { %v2267_v41 = vadd.f32 %v2251_v61, %v6191_v28 }
 0x2e9   : > { %v2266_v26 = vadd.f32 %v2250_v31, %v6193_v58  ;;  %v4755_v1 = vpop.f32.mrb[54].mxu1  ;;  %4870 = vmatmul.mubr.f32.gmra.mrb[110].mxu0 %v2197_v7 }
 0x2ea   : > { %v2253_v20 = vmul.f32 %v4755_v1, %v6105_v15  ;;  %v1983_v42 = vpop.f32.mrb[55].mxu1  ;;  %4872 = vmatprep.mubr.f32.mxu0 %v2262_v17 }
 0x2eb   : > { %v2252_v33 = vmul.f32 %v6117_v35, %v1983_v42 }
 0x2ec   : > { %v2269_v9 = vadd.f32 %v2253_v20, %v6204_v24 }
 0x2ed   : > { %v2268_v27 = vadd.f32 %v2252_v33, %v6207_v50  ;;  %v4758_v3 = vpop.f32.mrb[56].mxu1  ;;  %4873 = vmatmul.mubr.f32.gmra.mrb[112].mxu0 %v2263_v23 }
 0x2ee   : > { %v2255_v51 = vmul.f32 %v4758_v3, %v6141_v10  ;;  %v1993_v5 = vpop.f32.mrb[57].mxu1  ;;  %4875 = vmatprep.mubr.f32.mxu0 %v2264_v60 }
 0x2ef   : > { %v2254_v28 = vmul.f32 %v6144_v0, %v1993_v5 }
 0x2f0   : > { %v2271_v58 = vadd.f32 %v2255_v51, %v6213_v54 }
 0x2f1   : > { %v2270_v15 = vadd.f32 %v2254_v28, %v6215_v55  ;;  %v4761_v40 = vpop.f32.mrb[58].mxu1  ;;  %4876 = vmatmul.mubr.f32.gmra.mrb[114].mxu0 %v2265_v6 }
 0x2f2   : > { %v2257_v35 = vmul.f32 %v4761_v40, %v6153_v16  ;;  %v2003_v30 = vpop.f32.mrb[59].mxu1  ;;  %4878 = vmatprep.mubr.f32.mxu0 %v2266_v26 }
 0x2f3   : > { %v2256_v24 = vmul.f32 %v6156_v22, %v2003_v30 }
 0x2f4   : > { %v2273_v50 = vadd.f32 %v2257_v35, %v6221_v8 }
 0x2f5   : > { %v2272_v10 = vadd.f32 %v2256_v24, %v6223_v36  ;;  %v4764_v43 = vpop.f32.mrb[60].mxu1  ;;  %4879 = vmatmul.mubr.f32.gmra.mrb[116].mxu0 %v2267_v41 }
 0x2f6   : > { %v2259_v0 = vmul.f32 %v4764_v43, %v6173_v59  ;;  %v2013_v25 = vpop.f32.mrb[61].mxu1  ;;  %4881 = vmatprep.mubr.f32.mxu0 %v2268_v27 }
 0x2f7   : > { %v2258_v54 = vmul.f32 %v6177_v62, %v2013_v25  ;;  %v6300_v62 = vld [vmem:[%s7087_s8] ss:$0 sm:$0xff] }
 0x2f8   : > { %v2275_v55 = vadd.f32 %v2259_v0, %v6227_v52 }
 0x2f9   : > { %v2274_v16 = vadd.f32 %v2258_v54, %v6229_v47  ;;  %v4767_v44 = vpop.f32.mrb[62].mxu1  ;;  %4882 = vmatmul.mubr.f32.gmra.mrb[118].mxu0 %v2269_v9 }
 0x2fa   : > { %v2261_v22 = vmul.f32 %v4767_v44, %v6195_v19  ;;  %v2023_v37 = vpop.f32.mrb[63].mxu1  ;;  %4884 = vmatprep.mubr.f32.mxu0 %v2270_v15 }
 0x2fb   : > { %v2260_v8 = vmul.f32 %v6199_v45, %v2023_v37 }
 0x2fc   : > { %v2277_v36 = vadd.f32 %v2261_v22, %v6233_v4 }
 0x2fd   : > { %v2276_v59 = vadd.f32 %v2260_v8, %v6235_v18  ;;  %4885 = vmatmul.mubr.f32.gmra.mrb[120].mxu0 %v2271_v58 }
 0x2fe   : > { %4887 = vmatprep.mubr.f32.mxu0 %v2272_v10 }
 0x301   : > { %4888 = vmatmul.mubr.f32.gmra.mrb[122].mxu0 %v2273_v50 }
 0x302   : > { %4890 = vmatprep.mubr.f32.mxu0 %v2274_v16 }
 0x305   : > { %4891 = vmatmul.mubr.f32.gmra.mrb[124].mxu0 %v2275_v55 }
 0x306   : > { %4893 = vmatprep.mubr.f32.mxu0 %v2276_v59 }
 0x309   : > { %4894 = vmatmul.mubr.f32.gmra.mrb[126].mxu0 %v2277_v36 }
 0x345   : > { %v4802_v19 = vpop.f32.mrb[64].mxu0 }
 0x346   : > { %v2767_v52 = vadd.f32 %v4802_v19, %v6300_v62  ;;  %v2441_v45 = vpop.f32.mrb[65].mxu0 }
 0x347   : > { %v2766_v47 = vadd.f32 %v6300_v62, %v2441_v45 }
 0x348   : > { %5265 = vtanh.f32 %v2767_v52 }
 0x349   : > { %5267 = vtanh.f32 %v2766_v47 }
 0x34c   : > { %v4805_v4 = vpop.f32.mrb[66].mxu0 }
 0x34d   : > { %v2769_v18 = vadd.f32 %v4805_v4, %v6300_v62  ;;  %v2451_v56 = vpop.f32.mrb[67].mxu0 }
 0x34e   : > { %v2768_v11 = vadd.f32 %v6300_v62, %v2451_v56 }
 0x34f   : > { %5269 = vtanh.f32 %v2769_v18 }
 0x350   : > { %5271 = vtanh.f32 %v2768_v11 }
 0x352   : > { %v5266_v53 = vpop.eup %5265 }
 0x353   : > { %v5268_v32 = vpop.eup %5267  ;;  %v2799_v63 = vmul.f32 %v5266_v53, %v5266_v53  ;;  %v2831_v46 = vmul.f32 -2.0, %v5266_v53 }
 0x354   : > { %4928 = vmatprep.mubr.f32.mxu1 %v5268_v32  ;;  %v4808_v2 = vpop.f32.mrb[68].mxu0  ;;  %v2798_v7 = vmul.f32 %v5268_v32, %v5268_v32  ;;  %v2830_v23 = vmul.f32 -2.0, %v5268_v32 }
 0x355   : > { %v2771_v34 = vadd.f32 %v4808_v2, %v6300_v62  ;;  %4929 = vmatmul.mubr.f32.vlgmr.msra.gmra.mrb[64].mxu1 %v5266_v53  ;;  %v2461_v21 = vpop.f32.mrb[69].mxu0  ;;  %v6307_v38 = vsub.f32 1.0, %v2799_v63 }
 0x356   : > { %v2770_v13 = vadd.f32 %v6300_v62, %v2461_v21  ;;  %v6310_v29 = vsub.f32 1.0, %v2798_v7 }
 0x357   : > { %5273 = vtanh.f32 %v2771_v34  ;;  %v6313_v17 = vmul.f32 %v2831_v46, %v6307_v38 }
 0x358   : > { %5275 = vtanh.f32 %v2770_v13  ;;  %v6316_v39 = vmul.f32 %v2830_v23, %v6310_v29 }
 0x359   : > { %v5270_v48 = vpop.eup %5269 }
 0x35a   : > { %v5272_v57 = vpop.eup %5271  ;;  %v2801_v14 = vmul.f32 %v5270_v48, %v5270_v48  ;;  %v2833_v61 = vmul.f32 -2.0, %v5270_v48 }
 0x35b   : > { %4931 = vmatprep.mubr.f32.mxu1 %v5272_v57  ;;  %v2800_v6 = vmul.f32 %v5272_v57, %v5272_v57  ;;  %v2832_v26 = vmul.f32 -2.0, %v5272_v57 }
 0x35c   : > { %v4811_v60 = vpop.f32.mrb[70].mxu0  ;;  %4932 = vmatmul.mubr.f32.gmra.mrb[66].mxu1 %v5270_v48  ;;  %v6318_v49 = vsub.f32 1.0, %v2801_v14 }
 0x35d   : > { %v2773_v12 = vadd.f32 %v4811_v60, %v6300_v62  ;;  %v2471_v31 = vpop.f32.mrb[71].mxu0  ;;  %v6321_v41 = vsub.f32 1.0, %v2800_v6 }
 0x35e   : > { %v2772_v1 = vadd.f32 %v6300_v62, %v2471_v31  ;;  %v6325_v20 = vmul.f32 %v2833_v61, %v6318_v49 }
 0x35f   : > { %5277 = vtanh.f32 %v2773_v12  ;;  %v6328_v42 = vmul.f32 %v2832_v26, %v6321_v41 }
 0x360   : > { %5279 = vtanh.f32 %v2772_v1 }
 0x361   : > { %v5274_v33 = vpop.eup %5273 }
 0x362   : > { %v5276_v9 = vpop.eup %5275  ;;  %v2803_v27 = vmul.f32 %v5274_v33, %v5274_v33  ;;  %v2835_v28 = vmul.f32 -2.0, %v5274_v33 }
 0x363   : > { %4934 = vmatprep.mubr.f32.mxu1 %v5276_v9  ;;  %v2802_v3 = vmul.f32 %v5276_v9, %v5276_v9  ;;  %v2834_v35 = vmul.f32 -2.0, %v5276_v9 }
 0x364   : > { %v4814_v51 = vpop.f32.mrb[72].mxu0  ;;  %4935 = vmatmul.mubr.f32.gmra.mrb[68].mxu1 %v5274_v33  ;;  %v6330_v5 = vsub.f32 1.0, %v2803_v27 }
 0x365   : > { %v2775_v58 = vadd.f32 %v4814_v51, %v6300_v62  ;;  %v2481_v15 = vpop.f32.mrb[73].mxu0  ;;  %v6333_v40 = vsub.f32 1.0, %v2802_v3 }
 0x366   : > { %v2774_v30 = vadd.f32 %v6300_v62, %v2481_v15  ;;  %v6337_v24 = vmul.f32 %v2835_v28, %v6330_v5 }
 0x367   : > { %5281 = vtanh.f32 %v2775_v58  ;;  %v6340_v50 = vmul.f32 %v2834_v35, %v6333_v40 }
 0x368   : > { %5283 = vtanh.f32 %v2774_v30 }
 0x369   : > { %v5278_v10 = vpop.eup %5277 }
 0x36a   : > { %v5280_v43 = vpop.eup %5279  ;;  %v2805_v0 = vmul.f32 %v5278_v10, %v5278_v10  ;;  %v2837_v16 = vmul.f32 -2.0, %v5278_v10 }
 0x36b   : > { %4937 = vmatprep.mubr.f32.mxu1 %v5280_v43  ;;  %v2804_v25 = vmul.f32 %v5280_v43, %v5280_v43  ;;  %v2836_v8 = vmul.f32 -2.0, %v5280_v43 }
 0x36c   : > { %v4817_v54 = vpop.f32.mrb[74].mxu0  ;;  %4938 = vmatmul.mubr.f32.gmra.mrb[70].mxu1 %v5278_v10  ;;  %v6342_v55 = vsub.f32 1.0, %v2805_v0 }
 0x36d   : > { %v2777_v44 = vadd.f32 %v4817_v54, %v6300_v62  ;;  %v2491_v22 = vpop.f32.mrb[75].mxu0  ;;  %v6345_v37 = vsub.f32 1.0, %v2804_v25 }
 0x36e   : > { %v2776_v36 = vadd.f32 %v6300_v62, %v2491_v22  ;;  %v6349_v59 = vmul.f32 %v2837_v16, %v6342_v55 }
 0x36f   : > { %5285 = vtanh.f32 %v2777_v44  ;;  %v6352_v19 = vmul.f32 %v2836_v8, %v6345_v37 }
 0x370   : > { %5287 = vtanh.f32 %v2776_v36 }
 0x371   : > { %v5282_v52 = vpop.eup %5281 }
 0x372   : > { %v5284_v45 = vpop.eup %5283  ;;  %v2807_v47 = vmul.f32 %v5282_v52, %v5282_v52  ;;  %v2839_v11 = vmul.f32 -2.0, %v5282_v52 }
 0x373   : > { %4940 = vmatprep.mubr.f32.mxu1 %v5284_v45  ;;  %v2806_v4 = vmul.f32 %v5284_v45, %v5284_v45  ;;  %v2838_v2 = vmul.f32 -2.0, %v5284_v45 }
 0x374   : > { %v4820_v18 = vpop.f32.mrb[76].mxu0  ;;  %4941 = vmatmul.mubr.f32.gmra.mrb[72].mxu1 %v5282_v52  ;;  %v6354_v56 = vsub.f32 1.0, %v2807_v47 }
 0x375   : > { %v2779_v53 = vadd.f32 %v4820_v18, %v6300_v62  ;;  %v2501_v32 = vpop.f32.mrb[77].mxu0  ;;  %v6357_v63 = vsub.f32 1.0, %v2806_v4 }
 0x376   : > { %v2778_v7 = vadd.f32 %v6300_v62, %v2501_v32  ;;  %v6361_v34 = vmul.f32 %v2839_v11, %v6354_v56 }
 0x377   : > { %5289 = vtanh.f32 %v2779_v53  ;;  %v6364_v21 = vmul.f32 %v2838_v2, %v6357_v63 }
 0x378   : > { %5291 = vtanh.f32 %v2778_v7 }
 0x379   : > { %v5286_v46 = vpop.eup %5285 }
 0x37a   : > { %v5288_v13 = vpop.eup %5287  ;;  %v2809_v23 = vmul.f32 %v5286_v46, %v5286_v46  ;;  %v2841_v6 = vmul.f32 -2.0, %v5286_v46 }
 0x37b   : > { %4943 = vmatprep.mubr.f32.mxu1 %v5288_v13  ;;  %v2808_v48 = vmul.f32 %v5288_v13, %v5288_v13  ;;  %v2840_v31 = vmul.f32 -2.0, %v5288_v13 }
 0x37c   : > { %v4823_v57 = vpop.f32.mrb[78].mxu0  ;;  %4944 = vmatmul.mubr.f32.gmra.mrb[74].mxu1 %v5286_v46  ;;  %v6366_v14 = vsub.f32 1.0, %v2809_v23 }
 0x37d   : > { %v2781_v60 = vadd.f32 %v4823_v57, %v6300_v62  ;;  %v2511_v61 = vpop.f32.mrb[79].mxu0  ;;  %v6369_v12 = vsub.f32 1.0, %v2808_v48 }
 0x37e   : > { %v2780_v26 = vadd.f32 %v6300_v62, %v2511_v61  ;;  %v6373_v1 = vmul.f32 %v2841_v6, %v6366_v14 }
 0x37f   : > { %5293 = vtanh.f32 %v2781_v60  ;;  %v6376_v33 = vmul.f32 %v2840_v31, %v6369_v12 }
 0x380   : > { %5295 = vtanh.f32 %v2780_v26  ;;  %v4826_v9 = vpop.f32.mrb[80].mxu0 }
 0x381   : > { %v5290_v27 = vpop.eup %5289  ;;  %v2879_v3 = vmul.f32 %v4826_v9, %v6307_v38  ;;  %v2943_v51 = vmul.f32 %v4826_v9, %v6313_v17  ;;  %v2521_v28 = vpop.f32.mrb[81].mxu0 }
 0x382   : > { %v5292_v58 = vpop.eup %5291  ;;  %v2878_v15 = vmul.f32 %v6310_v29, %v2521_v28  ;;  %v2942_v62 = vmul.f32 %v6316_v39, %v2521_v28  ;;  %v2811_v35 = vmul.f32 %v5290_v27, %v5290_v27  ;;  %v2843_v54 = vmul.f32 -2.0, %v5290_v27 }
 0x383   : > { %v6382_v30 = vmul.f32 %v4826_v9, %v2943_v51  ;;  %4946 = vmatprep.mubr.f32.mxu1 %v5292_v58  ;;  %v2810_v10 = vmul.f32 %v5292_v58, %v5292_v58  ;;  %v2842_v39 = vmul.f32 -2.0, %v5292_v58 }
 0x384   : > { %v6384_v43 = vmul.f32 %v2942_v62, %v2521_v28  ;;  %v4829_v0 = vpop.f32.mrb[82].mxu0  ;;  %4947 = vmatmul.mubr.f32.gmra.mrb[76].mxu1 %v5290_v27  ;;  %v6386_v25 = vsub.f32 1.0, %v2811_v35 }
 0x385   : > { %v2881_v17 = vmul.f32 %v4829_v0, %v6318_v49  ;;  %v2945_v16 = vmul.f32 %v4829_v0, %v6325_v20  ;;  %v2531_v44 = vpop.f32.mrb[83].mxu0  ;;  %v6390_v22 = vsub.f32 1.0, %v2810_v10 }
 0x386   : > { %v2880_v8 = vmul.f32 %v6321_v41, %v2531_v44  ;;  %v2944_v36 = vmul.f32 %v6328_v42, %v2531_v44  ;;  %v2859_v52 = vmul.f32 %v2843_v54, %v6386_v25 }
 0x387   : > { %v6395_v45 = vmul.f32 %v4829_v0, %v2945_v16  ;;  %v2858_v47 = vmul.f32 %v2842_v39, %v6390_v22 }
 0x388   : > { %v6398_v4 = vmul.f32 %v2944_v36, %v2531_v44  ;;  %v4832_v18 = vpop.f32.mrb[84].mxu0 }
 0x389   : > { %v5294_v11 = vpop.eup %5293  ;;  %v2883_v20 = vmul.f32 %v4832_v18, %v6330_v5  ;;  %v2947_v53 = vmul.f32 %v4832_v18, %v6337_v24  ;;  %v2541_v32 = vpop.f32.mrb[85].mxu0 }
 0x38a   : > { %v5296_v2 = vpop.eup %5295  ;;  %v2882_v7 = vmul.f32 %v6333_v40, %v2541_v32  ;;  %v2946_v42 = vmul.f32 %v6340_v50, %v2541_v32  ;;  %v2813_v46 = vmul.f32 %v5294_v11, %v5294_v11  ;;  %v2845_v60 = vmul.f32 -2.0, %v5294_v11 }
 0x38b   : > { %v6404_v13 = vmul.f32 %v4832_v18, %v2947_v53  ;;  %4949 = vmatprep.mubr.f32.mxu1 %v5296_v2  ;;  %v2812_v23 = vmul.f32 %v5296_v2, %v5296_v2  ;;  %v2844_v50 = vmul.f32 -2.0, %v5296_v2 }
 0x38c   : > { %v6406_v48 = vmul.f32 %v2946_v42, %v2541_v32  ;;  %v4835_v57 = vpop.f32.mrb[86].mxu0  ;;  %4950 = vmatmul.mubr.f32.gmra.mrb[78].mxu1 %v5294_v11  ;;  %v6408_v6 = vsub.f32 1.0, %v2813_v46 }
 0x38d   : > { %v2885_v24 = vmul.f32 %v4835_v57, %v6342_v55  ;;  %v2949_v61 = vmul.f32 %v4835_v57, %v6349_v59  ;;  %v2551_v31 = vpop.f32.mrb[87].mxu0  ;;  %4952 = vmatprep.mubr.f32.mxu1 %v2878_v15  ;;  %v6412_v26 = vsub.f32 1.0, %v2812_v23 }
 0x38e   : > { %v2884_v9 = vmul.f32 %v6345_v37, %v2551_v31  ;;  %v2948_v27 = vmul.f32 %v6352_v19, %v2551_v31  ;;  %v2861_v51 = vmul.f32 %v2845_v60, %v6408_v6 }
 0x38f   : > { %v6417_v28 = vmul.f32 %v4835_v57, %v2949_v61  ;;  %v2860_v58 = vmul.f32 %v2844_v50, %v6412_v26 }
 0x390   : > { %v6420_v62 = vmul.f32 %v2948_v27, %v2551_v31  ;;  %v4838_v35 = vpop.f32.mrb[88].mxu0  ;;  %4953 = vmatmul.mubr.f32.gmra.mrb[80].mxu1 %v2879_v3 }
 0x391   : > { %v2887_v59 = vmul.f32 %v4838_v35, %v6354_v56  ;;  %v2951_v15 = vmul.f32 %v4838_v35, %v6361_v34  ;;  %v2561_v10 = vpop.f32.mrb[89].mxu0  ;;  %4955 = vmatprep.mubr.f32.mxu1 %v2880_v8 }
 0x392   : > { %v2886_v0 = vmul.f32 %v6357_v63, %v2561_v10  ;;  %v2950_v19 = vmul.f32 %v6364_v21, %v2561_v10 }
 0x393   : > { %v6426_v54 = vmul.f32 %v4838_v35, %v2951_v15 }
 0x394   : > { %v6428_v16 = vmul.f32 %v2950_v19, %v2561_v10  ;;  %v4841_v44 = vpop.f32.mrb[90].mxu0  ;;  %4956 = vmatmul.mubr.f32.gmra.mrb[82].mxu1 %v2881_v17 }
 0x395   : > { %v2889_v39 = vmul.f32 %v4841_v44, %v6366_v14  ;;  %v2953_v3 = vmul.f32 %v4841_v44, %v6373_v1  ;;  %v2571_v36 = vpop.f32.mrb[91].mxu0  ;;  %4958 = vmatprep.mubr.f32.mxu1 %v2882_v7 }
 0x396   : > { %v2888_v34 = vmul.f32 %v6369_v12, %v2571_v36  ;;  %v2952_v8 = vmul.f32 %v6376_v33, %v2571_v36 }
 0x397   : > { %v6434_v18 = vmul.f32 %v4841_v44, %v2953_v3 }
 0x398   : > { %v6436_v11 = vmul.f32 %v2952_v8, %v2571_v36  ;;  %v4844_v21 = vpop.f32.mrb[92].mxu0  ;;  %4959 = vmatmul.mubr.f32.gmra.mrb[84].mxu1 %v2883_v20 }
 0x399   : > { %v2891_v53 = vmul.f32 %v4844_v21, %v6386_v25  ;;  %v2955_v32 = vmul.f32 %v4844_v21, %v2859_v52  ;;  %v2581_v17 = vpop.f32.mrb[93].mxu0  ;;  %4961 = vmatprep.mubr.f32.mxu1 %v2884_v9 }
 0x39a   : > { %v2890_v2 = vmul.f32 %v6390_v22, %v2581_v17  ;;  %v2954_v1 = vmul.f32 %v2858_v47, %v2581_v17 }
 0x39b   : > { %v6440_v42 = vmul.f32 %v4844_v21, %v2955_v32 }
 0x39c   : > { %v6442_v7 = vmul.f32 %v2954_v1, %v2581_v17  ;;  %v4847_v46 = vpop.f32.mrb[94].mxu0  ;;  %4962 = vmatmul.mubr.f32.gmra.mrb[86].mxu1 %v2885_v24 }
 0x39d   : > { %v2893_v33 = vmul.f32 %v4847_v46, %v6408_v6  ;;  %v2957_v23 = vmul.f32 %v4847_v46, %v2861_v51  ;;  %v2591_v57 = vpop.f32.mrb[95].mxu0  ;;  %4964 = vmatprep.mubr.f32.mxu1 %v2886_v0 }
 0x39e   : > { %v2892_v20 = vmul.f32 %v6412_v26, %v2591_v57  ;;  %v2956_v60 = vmul.f32 %v2860_v58, %v2591_v57 }
 0x39f   : > { %v6446_v52 = vmul.f32 %v4847_v46, %v2957_v23 }
 0x3a0   : > { %v6448_v61 = vmul.f32 %v2956_v60, %v2591_v57  ;;  %v4850_v31 = vpop.f32.mrb[96].mxu0  ;;  %4965 = vmatmul.mubr.f32.gmra.mrb[88].mxu1 %v2887_v59 }
 0x3a1   : > { %v2911_v47 = vmul.f32 %v4850_v31, %v6307_v38  ;;  %v2601_v50 = vpop.f32.mrb[97].mxu0  ;;  %4967 = vmatprep.mubr.f32.mxu1 %v2888_v34 }
 0x3a2   : > { %v2910_v24 = vmul.f32 %v6310_v29, %v2601_v50 }
 0x3a4   : > { %v4853_v9 = vpop.f32.mrb[98].mxu0  ;;  %4968 = vmatmul.mubr.f32.gmra.mrb[90].mxu1 %v2889_v39 }
 0x3a5   : > { %v2913_v27 = vmul.f32 %v4853_v9, %v6318_v49  ;;  %v2611_v51 = vpop.f32.mrb[99].mxu0  ;;  %4970 = vmatprep.mubr.f32.mxu1 %v2890_v2 }
 0x3a6   : > { %v2912_v58 = vmul.f32 %v6321_v41, %v2611_v51 }
 0x3a8   : > { %v4856_v35 = vpop.f32.mrb[100].mxu0  ;;  %4971 = vmatmul.mubr.f32.gmra.mrb[92].mxu1 %v2891_v53 }
 0x3a9   : > { %v2915_v15 = vmul.f32 %v4856_v35, %v6330_v5  ;;  %v2621_v10 = vpop.f32.mrb[101].mxu0  ;;  %4973 = vmatprep.mubr.f32.mxu1 %v2892_v20 }
 0x3aa   : > { %v2914_v59 = vmul.f32 %v6333_v40, %v2621_v10 }
 0x3ac   : > { %v4859_v0 = vpop.f32.mrb[102].mxu0  ;;  %4974 = vmatmul.mubr.f32.gmra.mrb[94].mxu1 %v2893_v33 }
 0x3ad   : > { %v2917_v19 = vmul.f32 %v4859_v0, %v6342_v55  ;;  %v2631_v44 = vpop.f32.mrb[103].mxu0  ;;  %4976 = vmatprep.mubr.f32.mxu1 %v2910_v24 }
 0x3ae   : > { %v2916_v39 = vmul.f32 %v6345_v37, %v2631_v44 }
 0x3b0   : > { %v4862_v3 = vpop.f32.mrb[104].mxu0  ;;  %4977 = vmatmul.mubr.f32.gmra.mrb[96].mxu1 %v2911_v47 }
 0x3b1   : > { %v2919_v36 = vmul.f32 %v4862_v3, %v6354_v56  ;;  %v2641_v34 = vpop.f32.mrb[105].mxu0  ;;  %4979 = vmatprep.mubr.f32.mxu1 %v2912_v58 }
 0x3b2   : > { %v2918_v8 = vmul.f32 %v6357_v63, %v2641_v34 }
 0x3b4   : > { %v4865_v21 = vpop.f32.mrb[106].mxu0  ;;  %4980 = vmatmul.mubr.f32.gmra.mrb[98].mxu1 %v2913_v27 }
 0x3b5   : > { %v2921_v53 = vmul.f32 %v4865_v21, %v6366_v14  ;;  %v2651_v32 = vpop.f32.mrb[107].mxu0  ;;  %4982 = vmatprep.mubr.f32.mxu1 %v2914_v59 }
 0x3b6   : > { %v2920_v17 = vmul.f32 %v6369_v12, %v2651_v32 }
 0x3b8   : > { %v4868_v2 = vpop.f32.mrb[108].mxu0  ;;  %4983 = vmatmul.mubr.f32.gmra.mrb[100].mxu1 %v2915_v15 }
 0x3b9   : > { %v2923_v1 = vmul.f32 %v4868_v2, %v6386_v25  ;;  %v2661_v46 = vpop.f32.mrb[109].mxu0  ;;  %4985 = vmatprep.mubr.f32.mxu1 %v2916_v39 }
 0x3ba   : > { %v2922_v33 = vmul.f32 %v6390_v22, %v2661_v46 }
 0x3bc   : > { %v4871_v23 = vpop.f32.mrb[110].mxu0  ;;  %4986 = vmatmul.mubr.f32.gmra.mrb[102].mxu1 %v2917_v19 }
 0x3bd   : > { %v2925_v57 = vmul.f32 %v4871_v23, %v6408_v6  ;;  %v2671_v20 = vpop.f32.mrb[111].mxu0  ;;  %4988 = vmatprep.mubr.f32.mxu1 %v2918_v8 }
 0x3be   : > { %v2924_v60 = vmul.f32 %v6412_v26, %v2671_v20 }
 0x3c0   : > { %v4874_v31 = vpop.f32.mrb[112].mxu0  ;;  %4989 = vmatmul.mubr.f32.gmra.mrb[104].mxu1 %v2919_v36 }
 0x3c1   : > { %v2975_v47 = vmul.f32 %v4874_v31, %v6307_v38  ;;  %v2681_v50 = vpop.f32.mrb[113].mxu0  ;;  %4991 = vmatprep.mubr.f32.mxu1 %v2920_v17 }
 0x3c2   : > { %v2974_v24 = vmul.f32 %v6310_v29, %v2681_v50 }
 0x3c3   : > { %v2991_v9 = vadd.f32 %v2975_v47, %v6382_v30 }
 0x3c4   : > { %v2990_v27 = vadd.f32 %v2974_v24, %v6384_v43  ;;  %v4877_v51 = vpop.f32.mrb[114].mxu0  ;;  %4992 = vmatmul.mubr.f32.gmra.mrb[106].mxu1 %v2921_v53 }
 0x3c5   : > { %v2977_v58 = vmul.f32 %v4877_v51, %v6318_v49  ;;  %v2691_v35 = vpop.f32.mrb[115].mxu0  ;;  %4994 = vmatprep.mubr.f32.mxu1 %v2922_v33 }
 0x3c6   : > { %v2976_v15 = vmul.f32 %v6321_v41, %v2691_v35 }
 0x3c7   : > { %v2993_v10 = vadd.f32 %v2977_v58, %v6395_v45 }
 0x3c8   : > { %v2992_v38 = vadd.f32 %v2976_v15, %v6398_v4  ;;  %v4880_v59 = vpop.f32.mrb[116].mxu0  ;;  %4995 = vmatmul.mubr.f32.gmra.mrb[108].mxu1 %v2923_v1 }
 0x3c9   : > { %v2979_v29 = vmul.f32 %v4880_v59, %v6330_v5  ;;  %v2701_v0 = vpop.f32.mrb[117].mxu0  ;;  %4997 = vmatprep.mubr.f32.mxu1 %v2924_v60 }
 0x3ca   : > { %v2978_v30 = vmul.f32 %v6333_v40, %v2701_v0 }
 0x3cb   : > { %v2995_v43 = vadd.f32 %v2979_v29, %v6404_v13 }
 0x3cc   : > { %v2994_v49 = vadd.f32 %v2978_v30, %v6406_v48  ;;  %v4883_v19 = vpop.f32.mrb[118].mxu0  ;;  %4998 = vmatmul.mubr.f32.gmra.mrb[110].mxu1 %v2925_v57 }
 0x3cd   : > { %v2981_v41 = vmul.f32 %v4883_v19, %v6342_v55  ;;  %v2711_v44 = vpop.f32.mrb[119].mxu0  ;;  %5000 = vmatprep.mubr.f32.mxu1 %v2990_v27 }
 0x3ce   : > { %v2980_v45 = vmul.f32 %v6345_v37, %v2711_v44 }
 0x3cf   : > { %v2997_v4 = vadd.f32 %v2981_v41, %v6417_v28 }
 0x3d0   : > { %v2996_v5 = vadd.f32 %v2980_v45, %v6420_v62  ;;  %v4886_v39 = vpop.f32.mrb[120].mxu0  ;;  %5001 = vmatmul.mubr.f32.gmra.mrb[112].mxu1 %v2991_v9 }
 0x3d1   : > { %v2983_v40 = vmul.f32 %v4886_v39, %v6354_v56  ;;  %v2721_v3 = vpop.f32.mrb[121].mxu0  ;;  %5003 = vmatprep.mubr.f32.mxu1 %v2992_v38 }
 0x3d2   : > { %v2982_v13 = vmul.f32 %v6357_v63, %v2721_v3 }
 0x3d3   : > { %v2999_v48 = vadd.f32 %v2983_v40, %v6426_v54 }
 0x3d4   : > { %v2998_v55 = vadd.f32 %v2982_v13, %v6428_v16  ;;  %v4889_v36 = vpop.f32.mrb[122].mxu0  ;;  %5004 = vmatmul.mubr.f32.gmra.mrb[114].mxu1 %v2993_v10 }
 0x3d5   : > { %v2985_v37 = vmul.f32 %v4889_v36, %v6366_v14  ;;  %v2731_v34 = vpop.f32.mrb[123].mxu0  ;;  %5006 = vmatprep.mubr.f32.mxu1 %v2994_v49 }
 0x3d6   : > { %v2984_v28 = vmul.f32 %v6369_v12, %v2731_v34 }
 0x3d7   : > { %v3001_v62 = vadd.f32 %v2985_v37, %v6434_v18 }
 0x3d8   : > { %v3000_v56 = vadd.f32 %v2984_v28, %v6436_v11  ;;  %v4892_v8 = vpop.f32.mrb[124].mxu0  ;;  %5007 = vmatmul.mubr.f32.gmra.mrb[116].mxu1 %v2995_v43 }
 0x3d9   : > { %v2987_v63 = vmul.f32 %v4892_v8, %v6386_v25  ;;  %v2741_v21 = vpop.f32.mrb[125].mxu0  ;;  %5009 = vmatprep.mubr.f32.mxu1 %v2996_v5 }
 0x3da   : > { %v2986_v54 = vmul.f32 %v6390_v22, %v2741_v21  ;;  %v6501_v22 = vld [vmem:[%s7089_s10] ss:$0 sm:$0xff] }
 0x3db   : > { %v3003_v16 = vadd.f32 %v2987_v63, %v6440_v42 }
 0x3dc   : > { %v3002_v14 = vadd.f32 %v2986_v54, %v6442_v7  ;;  %v4895_v53 = vpop.f32.mrb[126].mxu0  ;;  %5010 = vmatmul.mubr.f32.gmra.mrb[118].mxu1 %v2997_v4 }
 0x3dd   : > { %v2989_v12 = vmul.f32 %v4895_v53, %v6408_v6  ;;  %v2751_v32 = vpop.f32.mrb[127].mxu0  ;;  %5012 = vmatprep.mubr.f32.mxu1 %v2998_v55 }
 0x3de   : > { %v2988_v18 = vmul.f32 %v6412_v26, %v2751_v32 }
 0x3df   : > { %v3005_v11 = vadd.f32 %v2989_v12, %v6446_v52 }
 0x3e0   : > { %v3004_v25 = vadd.f32 %v2988_v18, %v6448_v61  ;;  %5013 = vmatmul.mubr.f32.gmra.mrb[120].mxu1 %v2999_v48 }
 0x3e1   : > { %5015 = vmatprep.mubr.f32.mxu1 %v3000_v56 }
 0x3e4   : > { %5016 = vmatmul.mubr.f32.gmra.mrb[122].mxu1 %v3001_v62 }
 0x3e5   : > { %5018 = vmatprep.mubr.f32.mxu1 %v3002_v14 }
 0x3e8   : > { %5019 = vmatmul.mubr.f32.gmra.mrb[124].mxu1 %v3003_v16 }
 0x3e9   : > { %5021 = vmatprep.mubr.f32.mxu1 %v3004_v25 }
 0x3ec   : > { %5022 = vmatmul.mubr.f32.gmra.mrb[126].mxu1 %v3005_v11 }
 0x428   : > { %v4930_v6 = vpop.f32.mrb[64].mxu1 }
 0x429   : > { %v6504_v42 = vadd.f32 %v4930_v6, %v6501_v22  ;;  %v3169_v26 = vpop.f32.mrb[65].mxu1 }
 0x42a   : > { %v6507_v7 = vadd.f32 %v6501_v22, %v3169_v26 }
 0x42b   : > { %3961 = vrot.lane.b32.xlu0 %v6504_v42, %s5307_s20  ;;  %v6515_v52 = vmul.f32 %v6504_v42, %v6504_v42 }
 0x42c   : > { %3959 = vrot.lane.b32.xlu1 %v6507_v7, %s5307_s20  ;;  %v6519_v61 = vmul.f32 %v6507_v7, %v6507_v7 }
 0x42f   : > { %3528 = vrot.lane.b32.xlu0 %v6515_v52, %s5307_s20  ;;  %v4933_v17 = vpop.f32.mrb[66].mxu1 }
 0x430   : > { %3526 = vrot.lane.b32.xlu1 %v6519_v61, %s5307_s20  ;;  %v6526_v2 = vadd.f32 %v4933_v17, %v6501_v22  ;;  %v3179_v1 = vpop.f32.mrb[67].mxu1 }
 0x431   : > { %v6529_v46 = vadd.f32 %v6501_v22, %v3179_v1 }
 0x432   : > { %v6537_v33 = vmul.f32 %v6526_v2, %v6526_v2 }
 0x433   : > { %3965 = vrot.lane.b32.xlu0 %v6526_v2, %s5307_s20  ;;  %v6541_v23 = vmul.f32 %v6529_v46, %v6529_v46 }
 0x434   : > { %3963 = vrot.lane.b32.xlu1 %v6529_v46, %s5307_s20 }
 0x437   : > { %3532 = vrot.lane.b32.xlu0 %v6537_v33, %s5307_s20  ;;  %v4936_v57 = vpop.f32.mrb[68].mxu1 }
 0x438   : > { %3530 = vrot.lane.b32.xlu1 %v6541_v23, %s5307_s20  ;;  %v6548_v20 = vadd.f32 %v4936_v57, %v6501_v22  ;;  %v3189_v60 = vpop.f32.mrb[69].mxu1 }
 0x439   : > { %v6551_v31 = vadd.f32 %v6501_v22, %v3189_v60 }
 0x43a   : > { %v6559_v47 = vmul.f32 %v6548_v20, %v6548_v20 }
 0x43b   : > { %3969 = vrot.lane.b32.xlu0 %v6548_v20, %s5307_s20  ;;  %v6563_v50 = vmul.f32 %v6551_v31, %v6551_v31 }
 0x43c   : > { %3967 = vrot.lane.b32.xlu1 %v6551_v31, %s5307_s20 }
 0x43f   : > { %3536 = vrot.lane.b32.xlu0 %v6559_v47, %s5307_s20  ;;  %v4939_v24 = vpop.f32.mrb[70].mxu1 }
 0x440   : > { %3534 = vrot.lane.b32.xlu1 %v6563_v50, %s5307_s20  ;;  %v6570_v9 = vadd.f32 %v4939_v24, %v6501_v22  ;;  %v3199_v27 = vpop.f32.mrb[71].mxu1 }
 0x441   : > { %v6573_v51 = vadd.f32 %v6501_v22, %v3199_v27 }
 0x442   : > { %v6581_v58 = vmul.f32 %v6570_v9, %v6570_v9 }
 0x443   : > { %3973 = vrot.lane.b32.xlu0 %v6570_v9, %s5307_s20  ;;  %v6585_v35 = vmul.f32 %v6573_v51, %v6573_v51 }
 0x444   : > { %3971 = vrot.lane.b32.xlu1 %v6573_v51, %s5307_s20 }
 0x447   : > { %3540 = vrot.lane.b32.xlu0 %v6581_v58, %s5307_s20  ;;  %v4942_v15 = vpop.f32.mrb[72].mxu1 }
 0x448   : > { %3538 = vrot.lane.b32.xlu1 %v6585_v35, %s5307_s20  ;;  %v6592_v10 = vadd.f32 %v4942_v15, %v6501_v22  ;;  %v3209_v38 = vpop.f32.mrb[73].mxu1 }
 0x449   : > { %v6595_v59 = vadd.f32 %v6501_v22, %v3209_v38 }
 0x44a   : > { %v6603_v29 = vmul.f32 %v6592_v10, %v6592_v10 }
 0x44b   : > { %3977 = vrot.lane.b32.xlu0 %v6592_v10, %s5307_s20  ;;  %v6607_v0 = vmul.f32 %v6595_v59, %v6595_v59 }
 0x44c   : > { %3975 = vrot.lane.b32.xlu1 %v6595_v59, %s5307_s20 }
 0x44f   : > { %3544 = vrot.lane.b32.xlu0 %v6603_v29, %s5307_s20  ;;  %v4945_v30 = vpop.f32.mrb[74].mxu1 }
 0x450   : > { %3542 = vrot.lane.b32.xlu1 %v6607_v0, %s5307_s20  ;;  %v6614_v43 = vadd.f32 %v4945_v30, %v6501_v22  ;;  %v3219_v49 = vpop.f32.mrb[75].mxu1 }
 0x451   : > { %v6617_v19 = vadd.f32 %v6501_v22, %v3219_v49 }
 0x452   : > { %v6625_v41 = vmul.f32 %v6614_v43, %v6614_v43 }
 0x453   : > { %3981 = vrot.lane.b32.xlu0 %v6614_v43, %s5307_s20  ;;  %v6629_v44 = vmul.f32 %v6617_v19, %v6617_v19 }
 0x454   : > { %3979 = vrot.lane.b32.xlu1 %v6617_v19, %s5307_s20 }
 0x457   : > { %3548 = vrot.lane.b32.xlu0 %v6625_v41, %s5307_s20  ;;  %v4948_v45 = vpop.f32.mrb[76].mxu1 }
 0x458   : > { %3546 = vrot.lane.b32.xlu1 %v6629_v44, %s5307_s20  ;;  %v6636_v4 = vadd.f32 %v4948_v45, %v6501_v22  ;;  %v3229_v5 = vpop.f32.mrb[77].mxu1 }
 0x459   : > { %v6639_v39 = vadd.f32 %v6501_v22, %v3229_v5 }
 0x45a   : > { %v6647_v40 = vmul.f32 %v6636_v4, %v6636_v4 }
 0x45b   : > { %3985 = vrot.lane.b32.xlu0 %v6636_v4, %s5307_s20  ;;  %v6651_v3 = vmul.f32 %v6639_v39, %v6639_v39 }
 0x45c   : > { %3983 = vrot.lane.b32.xlu1 %v6639_v39, %s5307_s20 }
 0x45f   : > { %3552 = vrot.lane.b32.xlu0 %v6647_v40, %s5307_s20  ;;  %v4951_v13 = vpop.f32.mrb[78].mxu1 }
 0x460   : > { %3550 = vrot.lane.b32.xlu1 %v6651_v3, %s5307_s20  ;;  %v6658_v48 = vadd.f32 %v4951_v13, %v6501_v22  ;;  %v3239_v55 = vpop.f32.mrb[79].mxu1 }
 0x461   : > { %v6661_v36 = vadd.f32 %v6501_v22, %v3239_v55 }
 0x462   : > { %v6669_v28 = vmul.f32 %v6658_v48, %v6658_v48 }
 0x463   : > { %3989 = vrot.lane.b32.xlu0 %v6658_v48, %s5307_s20  ;;  %v4954_v37 = vpop.f32.mrb[80].mxu1  ;;  %v6673_v62 = vmul.f32 %v6661_v36, %v6661_v36 }
 0x464   : > { %3987 = vrot.lane.b32.xlu1 %v6661_v36, %s5307_s20  ;;  %v3249_v34 = vpop.f32.mrb[81].mxu1 }
 0x467   : > { %3556 = vrot.lane.b32.xlu0 %v6669_v28, %s5307_s20  ;;  %v4957_v56 = vpop.f32.mrb[82].mxu1 }
 0x468   : > { %3554 = vrot.lane.b32.xlu1 %v6673_v62, %s5307_s20  ;;  %v3257_v8 = vpop.f32.mrb[83].mxu1 }
 0x46b   : > { %v4960_v63 = vpop.f32.mrb[84].mxu1 }
 0x46c   : > { %v3265_v21 = vpop.f32.mrb[85].mxu1 }
 0x46f   : > { %v4963_v54 = vpop.f32.mrb[86].mxu1 }
 0x470   : > { %v3273_v16 = vpop.f32.mrb[87].mxu1 }
 0x473   : > { %v4966_v14 = vpop.f32.mrb[88].mxu1 }
 0x474   : > { %v3281_v53 = vpop.f32.mrb[89].mxu1 }
 0x477   : > { %v4969_v12 = vpop.f32.mrb[90].mxu1 }
 0x478   : > { %v3289_v32 = vpop.f32.mrb[91].mxu1 }
 0x47b   : > { %v4972_v18 = vpop.f32.mrb[92].mxu1 }
 0x47c   : > { %v3297_v11 = vpop.f32.mrb[93].mxu1 }
 0x47f   : > { %v4975_v25 = vpop.f32.mrb[94].mxu1 }
 0x480   : > { %v3305_v22 = vpop.f32.mrb[95].mxu1 }
 0x483   : > { %v6679_v6 = vpop.f32.mrb[96].mxu1 }
 0x484   : > { %v6681_v26 = vpop.f32.mrb[97].mxu1 }
 0x485   : > { %7106 = vst [vmem:[#allocation3_spill] sm:$0xff] %v6681_v26 }
 0x487   : > { %v6683_v17 = vpop.f32.mrb[98].mxu1 }
 0x488   : > { %7107 = vst [vmem:[#allocation4_spill] sm:$0xff] %v6683_v17  ;;  %v6685_v1 = vpop.f32.mrb[99].mxu1 }
 0x489   : > { %7108 = vst [vmem:[#allocation5_spill] sm:$0xff] %v6685_v1 }
 0x48b   : > { %v6687_v57 = vpop.f32.mrb[100].mxu1 }
 0x48c   : > { %7109 = vst [vmem:[#allocation6_spill] sm:$0xff] %v6687_v57  ;;  %v6689_v60 = vpop.f32.mrb[101].mxu1 }
 0x48d   : > { %7110 = vst [vmem:[#allocation7_spill] sm:$0xff] %v6689_v60 }
 0x48f   : > { %v6691_v24 = vpop.f32.mrb[102].mxu1 }
 0x490   : > { %7111 = vst [vmem:[#allocation8_spill] sm:$0xff] %v6691_v24  ;;  %v6693_v27 = vpop.f32.mrb[103].mxu1 }
 0x491   : > { %7112 = vst [vmem:[#allocation9_spill] sm:$0xff] %v6693_v27 }
 0x493   : > { %v6695_v15 = vpop.f32.mrb[104].mxu1 }
 0x494   : > { %7113 = vst [vmem:[#allocation10_spill] sm:$0xff] %v6695_v15  ;;  %v6697_v38 = vpop.f32.mrb[105].mxu1 }
 0x495   : > { %7114 = vst [vmem:[#allocation11_spill] sm:$0xff] %v6697_v38 }
 0x497   : > { %v6699_v30 = vpop.f32.mrb[106].mxu1 }
 0x498   : > { %7115 = vst [vmem:[#allocation12_spill] sm:$0xff] %v6699_v30  ;;  %v6701_v49 = vpop.f32.mrb[107].mxu1 }
 0x499   : > { %7116 = vst [vmem:[#allocation13_spill] sm:$0xff] %v6701_v49 }
 0x49b   : > { %v6703_v45 = vpop.f32.mrb[108].mxu1 }
 0x49c   : > { %7117 = vst [vmem:[#allocation14_spill] sm:$0xff] %v6703_v45  ;;  %v6705_v5 = vpop.f32.mrb[109].mxu1 }
 0x49d   : > { %7118 = vst [vmem:[#allocation15_spill] sm:$0xff] %v6705_v5  ;;  %v6707_v13 = vpop.permute.xlu0 %3961 }
 0x49e   : > { %v6709_v55 = vpop.permute.xlu1 %3959 }
 0x49f   : > { %7119 = vst [vmem:[#allocation16_spill] sm:$0xff] %v6709_v55  ;;  %v6711_v37 = vpop.f32.mrb[110].mxu1 }
 0x4a0   : > { %7120 = vst [vmem:[#allocation17_spill] sm:$0xff] %v6711_v37  ;;  %v6713_v34 = vpop.f32.mrb[111].mxu1 }
 0x4a1   : > { %7121 = vst [vmem:[#allocation18_spill] sm:$0xff] %v6713_v34  ;;  %v6715_v56 = vpop.permute.xlu0 %3528 }
 0x4a2   : > { %v6717_v8 = vpop.permute.xlu1 %3526 }
 0x4a3   : > { %v5002_v63 = vpop.f32.mrb[112].mxu1 }
 0x4a4   : > { %v3607_v21 = vmul.f32 0.5, %v5002_v63  ;;  %v3393_v54 = vpop.f32.mrb[113].mxu1 }
 0x4a5   : > { %v6719_v16 = vpop.permute.xlu0 %3965  ;;  %v3606_v14 = vmul.f32 0.5, %v3393_v54 }
 0x4a6   : > { %7122 = vst [vmem:[#allocation19_spill] sm:$0xff] %v6719_v16  ;;  %v6721_v53 = vpop.permute.xlu1 %3963  ;;  %3640 = vrot.lane.b32.xlu0 %v3607_v21, %s5308_s21 }
 0x4a7   : > { %7123 = vst [vmem:[#allocation20_spill] sm:$0xff] %v6721_v53  ;;  %3638 = vrot.lane.b32.xlu1 %v3606_v14, %s5308_s21  ;;  %v5005_v12 = vpop.f32.mrb[114].mxu1 }
 0x4a8   : > { %v3403_v32 = vpop.f32.mrb[115].mxu1  ;;  %v3609_v22 = vmul.f32 0.5, %v5005_v12 }
 0x4a9   : > { %v6725_v18 = vpop.permute.xlu0 %3532  ;;  %v3608_v54 = vmul.f32 0.5, %v3403_v32 }
 0x4aa   : > { %v6727_v11 = vpop.permute.xlu1 %3530  ;;  %3881 = vrot.lane.b32.xlu0 %v3607_v21, %s5307_s20 }
 0x4ab   : > { %3879 = vrot.lane.b32.xlu1 %v3606_v14, %s5307_s20  ;;  %v5008_v25 = vpop.f32.mrb[116].mxu1 }
 0x4ac   : > { %v3413_v63 = vpop.f32.mrb[117].mxu1  ;;  %v3611_v14 = vmul.f32 0.5, %v5008_v25 }
 0x4ad   : > { %v6731_v34 = vpop.permute.xlu0 %3969  ;;  %v3610_v32 = vmul.f32 0.5, %v3413_v63 }
 0x4ae   : > { %7124 = vst [vmem:[#allocation21_spill] sm:$0xff] %v6731_v34  ;;  %v6733_v37 = vpop.permute.xlu1 %3967  ;;  %3644 = vrot.lane.b32.xlu0 %v3609_v22, %s5308_s21 }
 0x4af   : > { %7125 = vst [vmem:[#allocation22_spill] sm:$0xff] %v6733_v37  ;;  %3642 = vrot.lane.b32.xlu1 %v3608_v54, %s5308_s21  ;;  %v5011_v5 = vpop.f32.mrb[118].mxu1 }
 0x4b0   : > { %v3423_v45 = vpop.f32.mrb[119].mxu1 }
 0x4b1   : > { %v6737_v49 = vpop.permute.xlu0 %3536 }
 0x4b2   : > { %v6739_v30 = vpop.permute.xlu1 %3534  ;;  %3885 = vrot.lane.b32.xlu0 %v3609_v22, %s5307_s20  ;;  %v3613_v22 = vmul.f32 0.5, %v5011_v5 }
 0x4b3   : > { %3883 = vrot.lane.b32.xlu1 %v3608_v54, %s5307_s20  ;;  %v5014_v21 = vpop.f32.mrb[120].mxu1  ;;  %v3612_v54 = vmul.f32 0.5, %v3423_v45 }
 0x4b4   : > { %v3433_v12 = vpop.f32.mrb[121].mxu1  ;;  %v3615_v45 = vmul.f32 0.5, %v5014_v21 }
 0x4b5   : > { %v6743_v38 = vpop.permute.xlu0 %3973 }
 0x4b6   : > { %7126 = vst [vmem:[#allocation23_spill] sm:$0xff] %v6743_v38  ;;  %v6745_v15 = vpop.permute.xlu1 %3971  ;;  %3648 = vrot.lane.b32.xlu0 %v3611_v14, %s5308_s21 }
 0x4b7   : > { %7127 = vst [vmem:[#allocation24_spill] sm:$0xff] %v6745_v15  ;;  %3646 = vrot.lane.b32.xlu1 %v3610_v32, %s5308_s21  ;;  %v5017_v27 = vpop.f32.mrb[122].mxu1 }
 0x4b8   : > { %v3443_v24 = vpop.f32.mrb[123].mxu1 }
 0x4b9   : > { %v6749_v60 = vpop.permute.xlu0 %3540  ;;  %v3616_v21 = vmul.f32 0.5, %v3443_v24 }
 0x4ba   : > { %v6751_v37 = vpop.permute.xlu1 %3538  ;;  %3889 = vrot.lane.b32.xlu0 %v3611_v14, %s5307_s20 }
 0x4bb   : > { %3887 = vrot.lane.b32.xlu1 %v3610_v32, %s5307_s20  ;;  %v5020_v25 = vpop.f32.mrb[124].mxu1  ;;  %v3614_v32 = vmul.f32 0.5, %v3433_v12 }
 0x4bc   : > { %v3453_v63 = vpop.f32.mrb[125].mxu1 }
 0x4bd   : > { %v3978_v38 = vpop.permute.xlu0 %3977 }
 0x4be   : > { %v3976_v15 = vpop.permute.xlu1 %3975  ;;  %3652 = vrot.lane.b32.xlu0 %v3613_v22, %s5308_s21 }
 0x4bf   : > { %3650 = vrot.lane.b32.xlu1 %v3612_v54, %s5308_s21  ;;  %v5023_v57 = vpop.f32.mrb[126].mxu1 }
 0x4c0   : > { %v3463_v34 = vpop.f32.mrb[127].mxu1 }
 0x4c1   : > { %v3545_v1 = vpop.permute.xlu0 %3544 }
 0x4c2   : > { %v6758_v53 = vadd.f32 %v3545_v1, %v6603_v29  ;;  %v3543_v17 = vpop.permute.xlu1 %3542  ;;  %3893 = vrot.lane.b32.xlu0 %v3613_v22, %s5307_s20 }
 0x4c3   : > { %v6762_v14 = vadd.f32 %v3543_v17, %v6607_v0  ;;  %3891 = vrot.lane.b32.xlu1 %v3612_v54, %s5307_s20 }
 0x4c4   : > { %v6766_v5 = vmul.f32 %v3978_v38, %v6758_v53 }
 0x4c5   : > { %v6769_v16 = vmul.f32 %v3976_v15, %v6762_v14  ;;  %v3982_v26 = vpop.permute.xlu0 %3981  ;;  %v3617_v15 = vmul.f32 0.5, %v5017_v27 }
 0x4c6   : > { %v3980_v55 = vpop.permute.xlu1 %3979  ;;  %3656 = vrot.lane.b32.xlu0 %v3615_v45, %s5308_s21 }
 0x4c7   : > { %3654 = vrot.lane.b32.xlu1 %v3614_v32, %s5308_s21 }
 0x4c9   : > { %v3549_v29 = vpop.permute.xlu0 %3548 }
 0x4ca   : > { %v6774_v0 = vadd.f32 %v3549_v29, %v6625_v41  ;;  %v3547_v17 = vpop.permute.xlu1 %3546  ;;  %3897 = vrot.lane.b32.xlu0 %v3615_v45, %s5307_s20 }
 0x4cb   : > { %v6778_v1 = vadd.f32 %v3547_v17, %v6629_v44  ;;  %3895 = vrot.lane.b32.xlu1 %v3614_v32, %s5307_s20 }
 0x4cc   : > { %v6782_v38 = vmul.f32 %v3982_v26, %v6774_v0  ;;  %v3619_v26 = vmul.f32 0.5, %v5020_v25 }
 0x4cd   : > { %v6785_v12 = vmul.f32 %v3980_v55, %v6778_v1  ;;  %v3986_v22 = vpop.permute.xlu0 %3985  ;;  %v3618_v55 = vmul.f32 0.5, %v3453_v63 }
 0x4ce   : > { %v3984_v54 = vpop.permute.xlu1 %3983  ;;  %3660 = vrot.lane.b32.xlu0 %v3617_v15, %s5308_s21 }
 0x4cf   : > { %3658 = vrot.lane.b32.xlu1 %v3616_v21, %s5308_s21 }
 0x4d1   : > { %v3553_v41 = vpop.permute.xlu0 %3552 }
 0x4d2   : > { %v3587_v44 = vadd.f32 %v3553_v41, %v6647_v40  ;;  %v3551_v45 = vpop.permute.xlu1 %3550  ;;  %3901 = vrot.lane.b32.xlu0 %v3617_v15, %s5307_s20  ;;  %v3575_v40 = vadd.f32 %v6715_v56, %v6515_v52  ;;  %v3578_v56 = vadd.f32 %v6739_v30, %v6563_v50  ;;  %v3710_v50 = vmul.f32 %v6762_v14, %v6595_v59 }
 0x4d3   : > { %v3586_v27 = vadd.f32 %v3551_v45, %v6651_v3  ;;  %3899 = vrot.lane.b32.xlu1 %v3616_v21, %s5307_s20  ;;  %v3574_v3 = vadd.f32 %v6717_v8, %v6519_v61  ;;  %v3621_v61 = vmul.f32 0.5, %v5023_v57  ;;  %v3579_v57 = vadd.f32 %v6737_v49, %v6559_v47  ;;  %v7128_v49 = vld [vmem:[#allocation16_spill] sm:$0xff]  ;;  %v7129_v8 = vld [vmem:[#allocation3_spill] sm:$0xff] }
 0x4d4   : > { %v6793_v24 = vmul.f32 %v3986_v22, %v3587_v44  ;;  %v3703_v22 = vmul.f32 %v3575_v40, %v6504_v42  ;;  %v3576_v42 = vadd.f32 %v6727_v11, %v6541_v23  ;;  %v6834_v23 = vadd.f32 %v6749_v60, %v6581_v58 }
 0x4d5   : > { %v6795_v32 = vmul.f32 %v3984_v54, %v3586_v27  ;;  %v3990_v29 = vpop.permute.xlu0 %3989  ;;  %v3702_v41 = vmul.f32 %v3574_v3, %v6507_v7  ;;  %v6839_v47 = vadd.f32 %v6751_v37, %v6585_v35  ;;  %v3715_v58 = vmul.f32 %v3587_v44, %v6636_v4 }
 0x4d6   : > { %v3988_v17 = vpop.permute.xlu1 %3987  ;;  %3664 = vrot.lane.b32.xlu0 %v3619_v26, %s5308_s21  ;;  %v3714_v35 = vmul.f32 %v3586_v27, %v6639_v39  ;;  %v4008_v4 = vmul.f32 %v6707_v13, %v3575_v40  ;;  %v4007_v37 = vmul.f32 %v7128_v49, %v3574_v3  ;;  %v7132_v27 = vld [vmem:[#allocation20_spill] sm:$0xff] }
 0x4d7   : > { %3662 = vrot.lane.b32.xlu1 %v3618_v55, %s5308_s21 }
 0x4d9   : > { %v3557_v15 = vpop.permute.xlu0 %3556 }
 0x4da   : > { %v3589_v25 = vadd.f32 %v3557_v15, %v6669_v28  ;;  %v3555_v21 = vpop.permute.xlu1 %3554  ;;  %3905 = vrot.lane.b32.xlu0 %v3619_v26, %s5307_s20  ;;  %v3620_v28 = vmul.f32 0.5, %v3463_v34  ;;  %v3704_v34 = vmul.f32 %v3576_v42, %v6529_v46  ;;  %v3709_v46 = vmul.f32 %v6834_v23, %v6570_v9 }
 0x4db   : > { %v3588_v63 = vadd.f32 %v3555_v21, %v6673_v62  ;;  %3903 = vrot.lane.b32.xlu1 %v3618_v55, %s5307_s20  ;;  %v3577_v62 = vadd.f32 %v6725_v18, %v6537_v33  ;;  %v3707_v33 = vmul.f32 %v3579_v57, %v6548_v20  ;;  %v3708_v20 = vmul.f32 %v6839_v47, %v6573_v51  ;;  %v7133_v55 = vld [vmem:[#allocation5_spill] sm:$0xff] }
 0x4dc   : > { %v6808_v54 = vmul.f32 %v3990_v29, %v3589_v25  ;;  %v3713_v9 = vmul.f32 %v6774_v0, %v6614_v43  ;;  %v3712_v51 = vmul.f32 %v6778_v1, %v6617_v19  ;;  %v7130_v0 = vld [vmem:[#allocation19_spill] sm:$0xff]  ;;  %v7131_v1 = vld [vmem:[#allocation4_spill] sm:$0xff]  ;;  %v4009_v26 = vmul.f32 %v7132_v27, %v3576_v42  ;;  %v7134_v21 = vld [vmem:[#allocation21_spill] sm:$0xff] }
 0x4dd   : > { %v6811_v52 = vmul.f32 %v3988_v17, %v3588_v63  ;;  %v3705_v7 = vmul.f32 %v3577_v62, %v6526_v2  ;;  %v3706_v2 = vmul.f32 %v3578_v56, %v6551_v31  ;;  %v3711_v31 = vmul.f32 %v6758_v53, %v6592_v10  ;;  %v7137_v42 = vld [vmem:[#allocation7_spill] sm:$0xff] }
 0x4de   : > { %3736 = vrot.lane.b32.xlu0 %v3703_v22, %s5308_s21  ;;  %v3717_v10 = vmul.f32 %v3589_v25, %v6658_v48  ;;  %v3716_v59 = vmul.f32 %v3588_v63, %v6661_v36  ;;  %v4010_v13 = vmul.f32 %v7130_v0, %v3577_v62  ;;  %v4012_v63 = vmul.f32 %v7134_v21, %v3579_v57  ;;  %v7135_v22 = vld [vmem:[#allocation6_spill] sm:$0xff]  ;;  %v7138_v57 = vld [vmem:[#allocation23_spill] sm:$0xff] }
 0x4df   : > { %3734 = vrot.lane.b32.xlu1 %v3702_v41, %s5308_s21  ;;  %v3591_v21 = vsub.f32 0.0, %v6679_v6 }
 0x4e2   : > { %3668 = vrot.lane.b32.xlu0 %v3621_v61, %s5308_s21 }
 0x4e3   : > { %3666 = vrot.lane.b32.xlu1 %v3620_v28, %s5308_s21 }
 0x4e6   : > { %3909 = vrot.lane.b32.xlu0 %v3621_v61, %s5307_s20 }
 0x4e7   : > { %3907 = vrot.lane.b32.xlu1 %v3620_v28, %s5307_s20  ;;  %v7136_v28 = vld [vmem:[#allocation22_spill] sm:$0xff] }
 0x4e8   : > { %v4011_v62 = vmul.f32 %v7136_v28, %v3578_v56  ;;  %v7140_v56 = vld [vmem:[#allocation24_spill] sm:$0xff]  ;;  %v3590_v28 = vsub.f32 0.0, %v7129_v8 }
 0x4ea   : > { %3740 = vrot.lane.b32.xlu0 %v3705_v7, %s5308_s21 }
 0x4eb   : > { %3738 = vrot.lane.b32.xlu1 %v3704_v34, %s5308_s21 }
 0x4ee   : > { %3744 = vrot.lane.b32.xlu0 %v3707_v33, %s5308_s21 }
 0x4ef   : > { %3742 = vrot.lane.b32.xlu1 %v3706_v2, %s5308_s21 }
 0x4f2   : > { %3748 = vrot.lane.b32.xlu0 %v3709_v46, %s5308_s21 }
 0x4f3   : > { %3746 = vrot.lane.b32.xlu1 %v3708_v20, %s5308_s21 }
 0x4f6   : > { %3752 = vrot.lane.b32.xlu0 %v3711_v31, %s5308_s21  ;;  %v4014_v31 = vmul.f32 %v7138_v57, %v6834_v23  ;;  %v7142_v23 = vld [vmem:[#allocation10_spill] sm:$0xff] }
 0x4f7   : > { %3750 = vrot.lane.b32.xlu1 %v3710_v50, %s5308_s21  ;;  %v7139_v50 = vld [vmem:[#allocation8_spill] sm:$0xff] }
 0x4fa   : > { %3756 = vrot.lane.b32.xlu0 %v3713_v9, %s5308_s21 }
 0x4fb   : > { %3754 = vrot.lane.b32.xlu1 %v3712_v51, %s5308_s21 }
 0x4fe   : > { %3760 = vrot.lane.b32.xlu0 %v3715_v58, %s5308_s21  ;;  %v4013_v58 = vmul.f32 %v7140_v56, %v6839_v47  ;;  %v3592_v56 = vsub.f32 0.0, %v7133_v55 }
 0x4ff   : > { %3758 = vrot.lane.b32.xlu1 %v3714_v35, %s5308_s21  ;;  %v7141_v35 = vld [vmem:[#allocation9_spill] sm:$0xff] }
 0x502   : > { %3764 = vrot.lane.b32.xlu0 %v3717_v10, %s5308_s21 }
 0x503   : > { %3762 = vrot.lane.b32.xlu1 %v3716_v59, %s5308_s21 }
 0x518   : > { %v6869_v43 = vpop.permute.xlu0 %3640 }
 0x519   : > { %v6871_v19 = vpop.permute.xlu1 %3638 }
 0x51c   : > { %v3882_v60 = vpop.permute.xlu0 %3881 }
 0x51d   : > { %v3928_v39 = vadd.f32 %v6679_v6, %v3882_v60  ;;  %v3880_v30 = vpop.permute.xlu1 %3879 }
 0x51e   : > { %v3927_v48 = vadd.f32 %v3880_v30, %v7129_v8 }
 0x51f   : > { %v4024_v53 = vadd.f32 %v4008_v4, %v3928_v39 }
 0x520   : > { %v4023_v36 = vadd.f32 %v4007_v37, %v3927_v48  ;;  %v6877_v18 = vpop.permute.xlu0 %3644  ;;  %v7143_v48 = vld [vmem:[#allocation11_spill] sm:$0xff] }
 0x521   : > { %v6879_v11 = vpop.permute.xlu1 %3642  ;;  %4057 = vrot.lane.b32.xlu0 %v4024_v53, %s5308_s21 }
 0x522   : > { %4055 = vrot.lane.b32.xlu1 %v4023_v36, %s5308_s21 }
 0x524   : > { %v3886_v14 = vpop.permute.xlu0 %3885 }
 0x525   : > { %v3930_v44 = vadd.f32 %v7131_v1, %v3886_v14  ;;  %v3884_v45 = vpop.permute.xlu1 %3883 }
 0x526   : > { %v3929_v29 = vadd.f32 %v3884_v45, %v7133_v55 }
 0x527   : > { %v4026_v17 = vadd.f32 %v4010_v13, %v3930_v44  ;;  %v7144_v44 = vld [vmem:[#allocation12_spill] sm:$0xff] }
 0x528   : > { %v4025_v40 = vadd.f32 %v4009_v26, %v3929_v29  ;;  %v6887_v3 = vpop.permute.xlu0 %3648  ;;  %v7145_v26 = vld [vmem:[#allocation13_spill] sm:$0xff] }
 0x529   : > { %v6889_v15 = vpop.permute.xlu1 %3646  ;;  %4061 = vrot.lane.b32.xlu0 %v4026_v17, %s5308_s21 }
 0x52a   : > { %4059 = vrot.lane.b32.xlu1 %v4025_v40, %s5308_s21 }
 0x52c   : > { %v3890_v25 = vpop.permute.xlu0 %3889 }
 0x52d   : > { %v3932_v41 = vadd.f32 %v7135_v22, %v3890_v25  ;;  %v3888_v61 = vpop.permute.xlu1 %3887 }
 0x52e   : > { %v3931_v7 = vadd.f32 %v3888_v61, %v7137_v42 }
 0x52f   : > { %v4028_v34 = vadd.f32 %v4012_v63, %v3932_v41  ;;  %v7146_v63 = vld [vmem:[#allocation14_spill] sm:$0xff] }
 0x530   : > { %v4027_v33 = vadd.f32 %v4011_v62, %v3931_v7  ;;  %v6897_v2 = vpop.permute.xlu0 %3652  ;;  %v7147_v62 = vld [vmem:[#allocation15_spill] sm:$0xff] }
 0x531   : > { %v6899_v46 = vpop.permute.xlu1 %3650  ;;  %4065 = vrot.lane.b32.xlu0 %v4028_v34, %s5308_s21  ;;  %v3686_v34 = vadd.f32 %v6871_v19, %v3590_v28 }
 0x532   : > { %4063 = vrot.lane.b32.xlu1 %v4027_v33, %s5308_s21 }
 0x534   : > { %v3894_v20 = vpop.permute.xlu0 %3893 }
 0x535   : > { %v3934_v9 = vadd.f32 %v7139_v50, %v3894_v20  ;;  %v3892_v51 = vpop.permute.xlu1 %3891 }
 0x536   : > { %v3933_v10 = vadd.f32 %v3892_v51, %v7141_v35 }
 0x537   : > { %v4030_v59 = vadd.f32 %v4014_v31, %v3934_v9 }
 0x538   : > { %v4029_v60 = vadd.f32 %v4013_v58, %v3933_v10  ;;  %v6909_v4 = vpop.permute.xlu0 %3656  ;;  %v7149_v58 = vld [vmem:[#allocation18_spill] sm:$0xff] }
 0x539   : > { %v6911_v39 = vpop.permute.xlu1 %3654  ;;  %4069 = vrot.lane.b32.xlu0 %v4030_v59, %s5308_s21 }
 0x53a   : > { %4067 = vrot.lane.b32.xlu1 %v4029_v60, %s5308_s21 }
 0x53c   : > { %v3898_v30 = vpop.permute.xlu0 %3897 }
 0x53d   : > { %v3936_v49 = vadd.f32 %v7142_v23, %v3898_v30  ;;  %v3896_v37 = vpop.permute.xlu1 %3895  ;;  %v3688_v30 = vadd.f32 %v6879_v11, %v3592_v56 }
 0x53e   : > { %v3935_v53 = vadd.f32 %v3896_v37, %v7143_v48 }
 0x53f   : > { %v4032_v47 = vadd.f32 %v6766_v5, %v3936_v49 }
 0x540   : > { %v4031_v36 = vadd.f32 %v6769_v16, %v3935_v53  ;;  %v6919_v14 = vpop.permute.xlu0 %3660 }
 0x541   : > { %v6921_v0 = vpop.permute.xlu1 %3658  ;;  %4073 = vrot.lane.b32.xlu0 %v4032_v47, %s5308_s21 }
 0x542   : > { %4071 = vrot.lane.b32.xlu1 %v4031_v36, %s5308_s21  ;;  %v3594_v36 = vsub.f32 0.0, %v7137_v42 }
 0x544   : > { %v3902_v13 = vpop.permute.xlu0 %3901 }
 0x545   : > { %v3938_v45 = vadd.f32 %v7144_v44, %v3902_v13  ;;  %v3900_v27 = vpop.permute.xlu1 %3899 }
 0x546   : > { %v3937_v29 = vadd.f32 %v3900_v27, %v7145_v26 }
 0x547   : > { %v4034_v17 = vadd.f32 %v6782_v38, %v3938_v45 }
 0x548   : > { %v4033_v5 = vadd.f32 %v6785_v12, %v3937_v29  ;;  %v6929_v40 = vpop.permute.xlu0 %3664  ;;  %v3687_v12 = vadd.f32 %v6869_v43, %v3591_v21 }
 0x549   : > { %v6931_v16 = vpop.permute.xlu1 %3662  ;;  %4077 = vrot.lane.b32.xlu0 %v4034_v17, %s5308_s21 }
 0x54a   : > { %4075 = vrot.lane.b32.xlu1 %v4033_v5, %s5308_s21 }
 0x54c   : > { %v3906_v25 = vpop.permute.xlu0 %3905 }
 0x54d   : > { %v3940_v41 = vadd.f32 %v7146_v63, %v3906_v25  ;;  %v3904_v61 = vpop.permute.xlu1 %3903 }
 0x54e   : > { %v3939_v38 = vadd.f32 %v3904_v61, %v7147_v62 }
 0x54f   : > { %v4036_v7 = vadd.f32 %v6793_v24, %v3940_v41  ;;  %v3593_v24 = vsub.f32 0.0, %v7131_v1  ;;  %v3595_v1 = vsub.f32 0.0, %v7135_v22  ;;  %v3596_v22 = vsub.f32 0.0, %v7141_v35 }
 0x550   : > { %v4035_v33 = vadd.f32 %v6795_v32, %v3939_v38  ;;  %v3737_v20 = vpop.permute.xlu0 %3736  ;;  %v7148_v32 = vld [vmem:[#allocation17_spill] sm:$0xff] }
 0x551   : > { %v3783_v57 = vadd.f32 %v3737_v20, %v3687_v12  ;;  %v3735_v31 = vpop.permute.xlu1 %3734  ;;  %v3689_v59 = vadd.f32 %v6877_v18, %v3593_v24  ;;  %v3691_v13 = vadd.f32 %v6887_v3, %v3595_v1  ;;  %v3692_v3 = vadd.f32 %v6899_v46, %v3596_v22 }
 0x552   : > { %v3782_v9 = vadd.f32 %v3735_v31, %v3686_v34  ;;  %v3601_v46 = vsub.f32 0.0, %v7144_v44  ;;  %v3602_v44 = vsub.f32 0.0, %v7147_v62 }
 0x553   : > { %3816 = vrot.lane.b32.xlu0 %v3783_v57, %s5307_s20 }
 0x554   : > { %v6944_v6 = vpop.permute.xlu0 %3668  ;;  %3814 = vrot.lane.b32.xlu1 %v3782_v9, %s5307_s20  ;;  %v3697_v38 = vadd.f32 %v6919_v14, %v3601_v46  ;;  %v3698_v14 = vadd.f32 %v6931_v16, %v3602_v44 }
 0x555   : > { %v6947_v8 = vpop.permute.xlu1 %3666 }
 0x557   : > { %4081 = vrot.lane.b32.xlu0 %v4036_v7, %s5308_s21 }
 0x558   : > { %v3910_v43 = vpop.permute.xlu0 %3909  ;;  %4079 = vrot.lane.b32.xlu1 %v4035_v33, %s5308_s21 }
 0x559   : > { %v3942_v19 = vadd.f32 %v7148_v32, %v3910_v43  ;;  %v3908_v51 = vpop.permute.xlu1 %3907 }
 0x55a   : > { %v3941_v10 = vadd.f32 %v3908_v51, %v7149_v58 }
 0x55b   : > { %v6957_v60 = vadd.f32 %v6808_v54, %v3942_v19  ;;  %v3690_v54 = vadd.f32 %v6889_v15, %v3594_v36  ;;  %v3599_v15 = vsub.f32 0.0, %v7142_v23  ;;  %v3600_v23 = vsub.f32 0.0, %v7145_v26 }
 0x55c   : > { %v6961_v49 = vadd.f32 %v6811_v52, %v3941_v10  ;;  %v3741_v37 = vpop.permute.xlu0 %3740  ;;  %v3597_v52 = vsub.f32 0.0, %v7139_v50  ;;  %v3598_v50 = vsub.f32 0.0, %v7143_v48 }
 0x55d   : > { %v3785_v53 = vadd.f32 %v3741_v37, %v3689_v59  ;;  %v3739_v47 = vpop.permute.xlu1 %3738  ;;  %v3695_v21 = vadd.f32 %v6909_v4, %v3599_v15  ;;  %v3696_v4 = vadd.f32 %v6921_v0, %v3600_v23  ;;  %v3605_v0 = vsub.f32 0.0, %v7148_v32 }
 0x55e   : > { %v3784_v55 = vadd.f32 %v3739_v47, %v3688_v30  ;;  %v3693_v29 = vadd.f32 %v6897_v2, %v3597_v52  ;;  %v3694_v2 = vadd.f32 %v6911_v39, %v3598_v50  ;;  %v3603_v39 = vsub.f32 0.0, %v7146_v63 }
 0x55f   : > { %3820 = vrot.lane.b32.xlu0 %v3785_v53, %s5307_s20  ;;  %v3604_v63 = vsub.f32 0.0, %v7149_v58  ;;  %v3701_v9 = vadd.f32 %v6944_v6, %v3605_v0 }
 0x560   : > { %v3745_v18 = vpop.permute.xlu0 %3744  ;;  %3818 = vrot.lane.b32.xlu1 %v3784_v55, %s5307_s20  ;;  %v3699_v33 = vadd.f32 %v6929_v40, %v3603_v39 }
 0x561   : > { %v3787_v11 = vadd.f32 %v3745_v18, %v3691_v13  ;;  %v3743_v45 = vpop.permute.xlu1 %3742  ;;  %v3700_v40 = vadd.f32 %v6947_v8, %v3604_v63 }
 0x562   : > { %v3786_v27 = vadd.f32 %v3743_v45, %v3690_v54 }
 0x563   : > { %3824 = vrot.lane.b32.xlu0 %v3787_v11, %s5307_s20 }
 0x564   : > { %v3749_v42 = vpop.permute.xlu0 %3748  ;;  %3822 = vrot.lane.b32.xlu1 %v3786_v27, %s5307_s20 }
 0x565   : > { %v3789_v17 = vadd.f32 %v3749_v42, %v3693_v29  ;;  %v3747_v5 = vpop.permute.xlu1 %3746 }
 0x566   : > { %v3788_v25 = vadd.f32 %v3747_v5, %v3692_v3 }
 0x567   : > { %3828 = vrot.lane.b32.xlu0 %v3789_v17, %s5307_s20 }
 0x568   : > { %v3753_v35 = vpop.permute.xlu0 %3752  ;;  %3826 = vrot.lane.b32.xlu1 %v3788_v25, %s5307_s20 }
 0x569   : > { %v3791_v41 = vadd.f32 %v3753_v35, %v3695_v21  ;;  %v3751_v61 = vpop.permute.xlu1 %3750 }
 0x56a   : > { %v3790_v28 = vadd.f32 %v3751_v61, %v3694_v2 }
 0x56b   : > { %3832 = vrot.lane.b32.xlu0 %v3791_v41, %s5307_s20 }
 0x56c   : > { %v3757_v48 = vpop.permute.xlu0 %3756  ;;  %3830 = vrot.lane.b32.xlu1 %v3790_v28, %s5307_s20 }
 0x56d   : > { %v3793_v12 = vadd.f32 %v3757_v48, %v3697_v38  ;;  %v3755_v7 = vpop.permute.xlu1 %3754 }
 0x56e   : > { %v3792_v34 = vadd.f32 %v3755_v7, %v3696_v4 }
 0x56f   : > { %3836 = vrot.lane.b32.xlu0 %v3793_v12, %s5307_s20 }
 0x570   : > { %v3761_v26 = vpop.permute.xlu0 %3760  ;;  %3834 = vrot.lane.b32.xlu1 %v3792_v34, %s5307_s20 }
 0x571   : > { %v3795_v20 = vadd.f32 %v3761_v26, %v3699_v33  ;;  %v3759_v57 = vpop.permute.xlu1 %3758 }
 0x572   : > { %v3794_v31 = vadd.f32 %v3759_v57, %v3698_v14 }
 0x573   : > { %3840 = vrot.lane.b32.xlu0 %v3795_v20, %s5307_s20 }
 0x574   : > { %v3765_v62 = vpop.permute.xlu0 %3764  ;;  %3838 = vrot.lane.b32.xlu1 %v3794_v31, %s5307_s20 }
 0x575   : > { %v3797_v16 = vadd.f32 %v3765_v62, %v3701_v9  ;;  %v3763_v43 = vpop.permute.xlu1 %3762 }
 0x576   : > { %v3796_v24 = vadd.f32 %v3763_v43, %v3700_v40 }
 0x577   : > { %3844 = vrot.lane.b32.xlu0 %v3797_v16, %s5307_s20 }
 0x578   : > { %3842 = vrot.lane.b32.xlu1 %v3796_v24, %s5307_s20 }
 0x57b   : > { %4085 = vrot.lane.b32.xlu0 %v6957_v60, %s5308_s21 }
 0x57c   : > { %4083 = vrot.lane.b32.xlu1 %v6961_v49, %s5308_s21 }
 0x593   : > { %v4058_v6 = vpop.permute.xlu0 %4057 }
 0x594   : > { %v4056_v32 = vpop.permute.xlu1 %4055 }
 0x59b   : > { %v4062_v8 = vpop.permute.xlu0 %4061 }
 0x59c   : > { %v4060_v19 = vpop.permute.xlu1 %4059 }
 0x5a3   : > { %v4066_v51 = vpop.permute.xlu0 %4065 }
 0x5a4   : > { %v4064_v56 = vpop.permute.xlu1 %4063 }
 0x5ab   : > { %v4070_v58 = vpop.permute.xlu0 %4069 }
 0x5ac   : > { %v4068_v10 = vpop.permute.xlu1 %4067 }
 0x5b3   : > { %v4074_v59 = vpop.permute.xlu0 %4073 }
 0x5b4   : > { %v4072_v30 = vpop.permute.xlu1 %4071 }
 0x5bb   : > { %v4078_v37 = vpop.permute.xlu0 %4077 }
 0x5bc   : > { %v4076_v1 = vpop.permute.xlu1 %4075 }
 0x5c5   : > { %v3817_v60 = vpop.permute.xlu0 %3816 }
 0x5c6   : > { %3864 = vst.msk [vmem:[%s7010_s24 + $0x8] sm:$0xff] %vm3862_vm0, %v3817_v60  ;;  %v3815_v49 = vpop.permute.xlu1 %3814 }
 0x5c7   : > { %4105 = vst.msk [vmem:[%s7010_s24 + $0x8] sm:$0xff] %vm4103_vm1, %v4058_v6 }
 0x5c8   : > { %3863 = vst.msk [vmem:[%s7010_s24] sm:$0xff] %vm3862_vm0, %v3815_v49 }
 0x5c9   : > { %4104 = vst.msk [vmem:[%s7010_s24] sm:$0xff] %vm4103_vm1, %v4056_v32  ;;  %v4082_v53 = vpop.permute.xlu0 %4081 }
 0x5ca   : > { %v4080_v47 = vpop.permute.xlu1 %4079 }
 0x5d1   : > { %v3821_v36 = vpop.permute.xlu0 %3820 }
 0x5d2   : > { %3866 = vst.msk [vmem:[%s7010_s24 + $0x18] sm:$0xff] %vm3862_vm0, %v3821_v36  ;;  %v3819_v55 = vpop.permute.xlu1 %3818 }
 0x5d3   : > { %4107 = vst.msk [vmem:[%s7010_s24 + $0x18] sm:$0xff] %vm4103_vm1, %v4062_v8 }
 0x5d4   : > { %3865 = vst.msk [vmem:[%s7010_s24 + $0x10] sm:$0xff] %vm3862_vm0, %v3819_v55 }
 0x5d5   : > { %4106 = vst.msk [vmem:[%s7010_s24 + $0x10] sm:$0xff] %vm4103_vm1, %v4060_v19  ;;  %v3825_v13 = vpop.permute.xlu0 %3824 }
 0x5d6   : > { %3868 = vst.msk [vmem:[%s7010_s24 + $0x28] sm:$0xff] %vm3862_vm0, %v3825_v13  ;;  %v3823_v54 = vpop.permute.xlu1 %3822 }
 0x5d7   : > { %4109 = vst.msk [vmem:[%s7010_s24 + $0x28] sm:$0xff] %vm4103_vm1, %v4066_v51 }
 0x5d8   : > { %3867 = vst.msk [vmem:[%s7010_s24 + $0x20] sm:$0xff] %vm3862_vm0, %v3823_v54 }
 0x5d9   : > { %4108 = vst.msk [vmem:[%s7010_s24 + $0x20] sm:$0xff] %vm4103_vm1, %v4064_v56  ;;  %v3829_v18 = vpop.permute.xlu0 %3828 }
 0x5da   : > { %3870 = vst.msk [vmem:[%s7010_s24 + $0x38] sm:$0xff] %vm3862_vm0, %v3829_v18  ;;  %v3827_v52 = vpop.permute.xlu1 %3826 }
 0x5db   : > { %4111 = vst.msk [vmem:[%s7010_s24 + $0x38] sm:$0xff] %vm4103_vm1, %v4070_v58 }
 0x5dc   : > { %3869 = vst.msk [vmem:[%s7010_s24 + $0x30] sm:$0xff] %vm3862_vm0, %v3827_v52 }
 0x5dd   : > { %4110 = vst.msk [vmem:[%s7010_s24 + $0x30] sm:$0xff] %vm4103_vm1, %v4068_v10  ;;  %v3833_v11 = vpop.permute.xlu0 %3832 }
 0x5de   : > { %3872 = vst.msk [vmem:[%s7010_s24 + $0x48] sm:$0xff] %vm3862_vm0, %v3833_v11  ;;  %v3831_v45 = vpop.permute.xlu1 %3830 }
 0x5df   : > { %4113 = vst.msk [vmem:[%s7010_s24 + $0x48] sm:$0xff] %vm4103_vm1, %v4074_v59 }
 0x5e0   : > { %3871 = vst.msk [vmem:[%s7010_s24 + $0x40] sm:$0xff] %vm3862_vm0, %v3831_v45 }
 0x5e1   : > { %4112 = vst.msk [vmem:[%s7010_s24 + $0x40] sm:$0xff] %vm4103_vm1, %v4072_v30  ;;  %v3837_v22 = vpop.permute.xlu0 %3836 }
 0x5e2   : > { %3874 = vst.msk [vmem:[%s7010_s24 + $0x58] sm:$0xff] %vm3862_vm0, %v3837_v22  ;;  %v3835_v27 = vpop.permute.xlu1 %3834 }
 0x5e3   : > { %4115 = vst.msk [vmem:[%s7010_s24 + $0x58] sm:$0xff] %vm4103_vm1, %v4078_v37 }
 0x5e4   : > { %3873 = vst.msk [vmem:[%s7010_s24 + $0x50] sm:$0xff] %vm3862_vm0, %v3835_v27 }
 0x5e5   : > { %4114 = vst.msk [vmem:[%s7010_s24 + $0x50] sm:$0xff] %vm4103_vm1, %v4076_v1  ;;  %v3841_v29 = vpop.permute.xlu0 %3840 }
 0x5e6   : > { %3876 = vst.msk [vmem:[%s7010_s24 + $0x68] sm:$0xff] %vm3862_vm0, %v3841_v29  ;;  %v3839_v3 = vpop.permute.xlu1 %3838 }
 0x5e7   : > { %4117 = vst.msk [vmem:[%s7010_s24 + $0x68] sm:$0xff] %vm4103_vm1, %v4082_v53 }
 0x5e8   : > { %3875 = vst.msk [vmem:[%s7010_s24 + $0x60] sm:$0xff] %vm3862_vm0, %v3839_v3 }
 0x5e9   : > { %4116 = vst.msk [vmem:[%s7010_s24 + $0x60] sm:$0xff] %vm4103_vm1, %v4080_v47  ;;  %v3845_v42 = vpop.permute.xlu0 %3844 }
 0x5ea   : > { %3878 = vst.msk [vmem:[%s7010_s24 + $0x78] sm:$0xff] %vm3862_vm0, %v3845_v42  ;;  %v3843_v15 = vpop.permute.xlu1 %3842 }
 0x5eb   : > { %3877 = vst.msk [vmem:[%s7010_s24 + $0x70] sm:$0xff] %vm3862_vm0, %v3843_v15 }
 0x5ed   : > { %v4086_v17 = vpop.permute.xlu0 %4085 }
 0x5ee   : > { %4119 = vst.msk [vmem:[%s7010_s24 + $0x78] sm:$0xff] %vm4103_vm1, %v4086_v17  ;;  %v4084_v5 = vpop.permute.xlu1 %4083 }
 0x5ef   : > { %4118 = vst.msk [vmem:[%s7010_s24 + $0x70] sm:$0xff] %vm4103_vm1, %v4084_v5 }
 0x5f0 PF: > { %s21_s17 = sadd.s32 1, %s5303_s17  }
 0x5f1   : > { %p18_p4 = scmp.ge.s32.totalorder %s21_s17, 4  }
 0x5f3   :  { %20 = sbr.rel (!%p18_p4) target bundleno = 1 (0x1), region = 94 }

</bundles_post_ra>
